<compile_context>
chip_gen: v5e
topology: v5e:2x2
jax: 0.10.0
libtpu: 0.0.40
codegen_flags: <defaults>
</compile_context>

<pallas_src>
import jax
import jax.numpy as jnp
from jax import lax
from jax.experimental import pallas as pl
from jax.experimental.pallas import tpu as pltpu

COLOR_TOP_N = 10

B, C_IN, H, W = 2, 4, 16, 16
HW = H * W
C_MID = 32       # deep_module conv_out channels
C_COLOR = 8      # color_module output channels
C_ALL = C_MID + C_COLOR


# --------------------------------------------------------------------------
# Fused kernel: backbone + avg-pool + weight map + top-N + gather.
# Single program; whole batch lives in VMEM.
# --------------------------------------------------------------------------
def fused_kernel(x_ref, w_ref, b_ref, wp_ref, bp_ref, pool_ref,
                 feat_ref, sel_ref):
    # ---- combined 1x1 convs ([deep | color]) as one MXU matmul ----
    x = x_ref[...]                                                  # (B*HW, Cin)
    y = jnp.dot(x, w_ref[...],
                preferred_element_type=jnp.float32) + b_ref[...]    # (B*HW, C_ALL)
    # columns [:C_MID]  -> pre-ReLU deep conv_out
    # columns [C_MID:]  -> raw color features
    # ReLU over the extra color columns is harmless: those columns are either
    # multiplied by zero (padded wp) or sliced away from tiny results.
    y_relu = jnp.maximum(y, 0.0)                                    # (B*HW, C_ALL)

    # ---- deep_module head: global average pool as a matmul ----
    featp = jnp.dot(pool_ref[...], y_relu,
                    preferred_element_type=jnp.float32)             # (B, C_ALL)
    feat_ref[...] = featp[:, :C_MID]                                # (B, C_MID)

    # ---- pooling_module: lane-dense spatial weight map (1, B*HW) ----
    # wp_ref is (1, C_ALL) = [wp^T | 0]; contraction over channels.
    weight = jnp.einsum("cd,pd->cp", wp_ref[...], y_relu,
                        preferred_element_type=jnp.float32) + bp_ref[...]

    # ---- per-batch top-N + gather (gather = one MXU matmul) ----
    pos = lax.broadcasted_iota(jnp.int32, (1, HW), 1)               # (1, HW)
    row = lax.broadcasted_iota(jnp.int32, (COLOR_TOP_N, 1), 0)      # (TOP_N, 1)
    col = lax.broadcasted_iota(jnp.int32, (COLOR_TOP_N, HW), 1)     # (TOP_N, HW)
    for b in range(B):                                              # B=2, static
        wcur = weight[:, b * HW:(b + 1) * HW]                       # (1, HW) lane slice
        y_b = y[b * HW:(b + 1) * HW, :]                             # (HW, C_ALL) raw
        idx_col = jnp.zeros((COLOR_TOP_N, 1), jnp.int32)
        for t in range(COLOR_TOP_N):                                # 10 unrolled argmax steps
            m = jnp.max(wcur)
            idx = jnp.min(jnp.where(wcur == m, pos, jnp.int32(HW)))  # scalar index
            idx_col = jnp.where(row == t, idx, idx_col)
            wcur = jnp.where(pos == idx, jnp.float32(-jnp.inf), wcur)
        onehot = (col == idx_col).astype(jnp.float32)               # (TOP_N, HW)
        gathered = jnp.dot(onehot, y_b,
                           preferred_element_type=jnp.float32)      # (TOP_N, C_ALL)
        sel_ref[b] = gathered[:, C_MID:]                            # (TOP_N, C_COLOR)


# --------------------------------------------------------------------------
# Params / wrapper
# --------------------------------------------------------------------------
def make_params(key):
    ks = jax.random.split(key, 6)
    return dict(
        w1=0.1 * jax.random.normal(ks[0], (C_IN, C_MID), jnp.float32),
        b1=0.1 * jax.random.normal(ks[1], (1, C_MID), jnp.float32),
        wc=0.1 * jax.random.normal(ks[2], (C_IN, C_COLOR), jnp.float32),
        bc=0.1 * jax.random.normal(ks[3], (1, C_COLOR), jnp.float32),
        wp=0.1 * jax.random.normal(ks[4], (C_MID, 1), jnp.float32),
        bp=0.1 * jax.random.normal(ks[5], (1, 1), jnp.float32),
    )


@jax.jit
def feature_extractor_forward(x_nchw, params):
    # NCHW (torch) -> (B*HW, Cin); spatial flatten is row-major (H, W), matching
    # torch's .reshape(-1) on (C, H, W) per channel.
    x = jnp.transpose(x_nchw, (0, 2, 3, 1)).reshape(B * HW, C_IN).astype(jnp.float32)

    # Fold the two 1x1 convs into one weight / bias; pad wp with zeros over the
    # color columns; pooling matrix implements the per-batch spatial mean.
    w_comb = jnp.concatenate([params["w1"], params["wc"]], axis=1)        # (Cin, C_ALL)
    b_comb = jnp.concatenate([params["b1"], params["bc"]], axis=1)        # (1, C_ALL)
    wp_row = jnp.concatenate([params["wp"].T,
                              jnp.zeros((1, C_COLOR), jnp.float32)], axis=1)  # (1, C_ALL)
    pool = jnp.repeat(jnp.eye(B, dtype=jnp.float32), HW, axis=1) / HW     # (B, B*HW)

    vmem = pl.BlockSpec(memory_space=pltpu.MemorySpace.VMEM)
    feat, sel = pl.pallas_call(
        fused_kernel,
        out_shape=(
            jax.ShapeDtypeStruct((B, C_MID), jnp.float32),
            jax.ShapeDtypeStruct((B, COLOR_TOP_N, C_COLOR), jnp.float32),
        ),
        in_specs=[vmem] * 6,
        out_specs=(vmem, vmem),
    )(x, w_comb, b_comb, wp_row, params["bp"], pool)

    # torch: color_n[:, idx].reshape(-1) -> channel-major flatten of (C, TOP_N)
    result = jnp.transpose(sel, (0, 2, 1)).reshape(B, C_COLOR * COLOR_TOP_N)
    return feat, result


def _reference(x_nchw, params):
    # Pure-JAX reference for validation (uses lax.top_k).
    x = jnp.transpose(x_nchw, (0, 2, 3, 1)).reshape(B, HW, C_IN).astype(jnp.float32)
    conv = jnp.maximum(x @ params["w1"] + params["b1"], 0.0)
    color = x @ params["wc"] + params["bc"]
    weight = (conv @ params["wp"] + params["bp"])[..., 0]        # (B, HW)
    feat = jnp.mean(conv, axis=1)                                # (B, Cmid)
    _, idx = lax.top_k(weight, COLOR_TOP_N)                      # (B, TOP_N)
    sel = jnp.take_along_axis(color, idx[:, :, None], axis=1)    # (B, TOP_N, Ccolor)
    result = jnp.transpose(sel, (0, 2, 1)).reshape(B, -1)
    return feat, result


if __name__ == "__main__":
    key = jax.random.PRNGKey(0)
    kx, kp = jax.random.split(key)
    x = jax.random.normal(kx, (B, C_IN, H, W), jnp.float32)      # NCHW like torch
    params = make_params(kp)

    feat, result = feature_extractor_forward(x, params)
    jax.block_until_ready((feat, result))

    feat_ref, result_ref = _reference(x, params)
    assert jnp.allclose(feat, feat_ref, atol=1e-5, rtol=1e-5)
    assert jnp.allclose(result, result_ref, atol=1e-5, rtol=1e-5)

    print("KERNEL_OK")
</pallas_src>

<mosaic_0001>
module attributes {stable_mosaic.version = 11 : i64} {
  func.func @fused_kernel(%arg0: memref<512x4xf32, #tpu.memory_space<vmem>>, %arg1: memref<4x40xf32, #tpu.memory_space<vmem>>, %arg2: memref<1x40xf32, #tpu.memory_space<vmem>>, %arg3: memref<1x40xf32, #tpu.memory_space<vmem>>, %arg4: memref<1x1xf32, #tpu.memory_space<vmem>>, %arg5: memref<2x512xf32, #tpu.memory_space<vmem>>, %arg6: memref<2x32xf32, #tpu.memory_space<vmem>>, %arg7: memref<2x10x8xf32, #tpu.memory_space<vmem>>) attributes {dimension_semantics = [], scalar_prefetch = 0 : i64, scratch_operands = 0 : i64, tpu.core_type = #tpu.core_type<tc>} {
    %c0 = arith.constant 0 : index
    %c0_0 = arith.constant 0 : index
    %0 = vector.load %arg0[%c0, %c0_0] : memref<512x4xf32, #tpu.memory_space<vmem>>, vector<512x4xf32>
    %c0_1 = arith.constant 0 : index
    %c0_2 = arith.constant 0 : index
    %1 = vector.load %arg1[%c0_1, %c0_2] : memref<4x40xf32, #tpu.memory_space<vmem>>, vector<4x40xf32>
    %cst = arith.constant dense<0.000000e+00> : vector<512x40xf32>
    %2 = tpu.matmul %0, %1, %cst {dimension_numbers = #tpu.dot_dimension_numbers<[1], [0], [0], [1], [0, 0, 1, 1], [], []>} : vector<512x4xf32>, vector<4x40xf32>, vector<512x40xf32> -> vector<512x40xf32>
    %c0_3 = arith.constant 0 : index
    %c0_4 = arith.constant 0 : index
    %3 = vector.load %arg2[%c0_3, %c0_4] : memref<1x40xf32, #tpu.memory_space<vmem>>, vector<1x40xf32>
    %4 = vector.broadcast %3 : vector<1x40xf32> to vector<512x40xf32>
    %5 = arith.addf %2, %4 : vector<512x40xf32>
    %cst_5 = arith.constant 0.000000e+00 : f32
    %6 = vector.broadcast %cst_5 : f32 to vector<512x40xf32>
    %7 = arith.maximumf %5, %6 : vector<512x40xf32>
    %c0_6 = arith.constant 0 : index
    %c0_7 = arith.constant 0 : index
    %8 = vector.load %arg5[%c0_6, %c0_7] : memref<2x512xf32, #tpu.memory_space<vmem>>, vector<2x512xf32>
    %cst_8 = arith.constant dense<0.000000e+00> : vector<2x40xf32>
    %9 = tpu.matmul %8, %7, %cst_8 {dimension_numbers = #tpu.dot_dimension_numbers<[1], [0], [0], [1], [0, 0, 1, 1], [], []>} : vector<2x512xf32>, vector<512x40xf32>, vector<2x40xf32> -> vector<2x40xf32>
    %10 = vector.extract_strided_slice %9 {offsets = [0, 0], sizes = [2, 32], strides = [1, 1]} : vector<2x40xf32> to vector<2x32xf32>
    %c0_9 = arith.constant 0 : index
    %c0_10 = arith.constant 0 : index
    %11 = vector.load %arg6[%c0_9, %c0_10] : memref<2x32xf32, #tpu.memory_space<vmem>>, vector<2x32xf32>
    tpu.vector_store %arg6[%c0_9, %c0_10], %10 {strides = array<i32>} : memref<2x32xf32, #tpu.memory_space<vmem>>, vector<2x32xf32>,
    %c0_11 = arith.constant 0 : index
    %c0_12 = arith.constant 0 : index
    %12 = vector.load %arg3[%c0_11, %c0_12] : memref<1x40xf32, #tpu.memory_space<vmem>>, vector<1x40xf32>
    "tpu.trace_start"() <{level = 10 : i32, message = "cd,pd->cp"}> : () -> ()
    %cst_13 = arith.constant dense<0.000000e+00> : vector<1x512xf32>
    %13 = tpu.matmul %12, %7, %cst_13 {dimension_numbers = #tpu.dot_dimension_numbers<[1], [1], [0], [0], [0, 0, 1, 0], [], []>} : vector<1x40xf32>, vector<512x40xf32>, vector<1x512xf32> -> vector<1x512xf32>
    "tpu.trace_stop"() : () -> ()
    %c0_14 = arith.constant 0 : index
    %c0_15 = arith.constant 0 : index
    %14 = vector.load %arg4[%c0_14, %c0_15] : memref<1x1xf32, #tpu.memory_space<vmem>>, vector<1x1xf32>
    %15 = vector.broadcast %14 : vector<1x1xf32> to vector<1x512xf32>
    %16 = arith.addf %13, %15 : vector<1x512xf32>
    %17 = tpu.iota {dimensions = array<i32: 1>} : vector<1x256xi32>
    %18 = tpu.iota {dimensions = array<i32: 0>} : vector<10x1xi32>
    %19 = tpu.iota {dimensions = array<i32: 1>} : vector<10x256xi32>
    %20 = vector.extract_strided_slice %16 {offsets = [0, 0], sizes = [1, 256], strides = [1, 1]} : vector<1x512xf32> to vector<1x256xf32>
    %21 = vector.extract_strided_slice %5 {offsets = [0, 0], sizes = [256, 40], strides = [1, 1]} : vector<512x40xf32> to vector<256x40xf32>
    %c0_i32 = arith.constant 0 : i32
    %22 = vector.broadcast %c0_i32 : i32 to vector<10x1xi32>
    %23 = vector.shape_cast %20 : vector<1x256xf32> to vector<1x1x256xf32>
    %cst_16 = arith.constant dense<0xFF800000> : vector<1xf32>
    %24 = vector.multi_reduction <maximumf>, %23, %cst_16 [1, 2] : vector<1x1x256xf32> to vector<1xf32>
    %25 = vector.shape_cast %24 : vector<1xf32> to vector<1x1x1xf32>
    %26 = vector.extract %25[0, 0, 0] : f32 from vector<1x1x1xf32>
    %27 = vector.broadcast %26 : f32 to vector<1x256xf32>
    %28 = arith.cmpf oeq, %20, %27 : vector<1x256xf32>
    %c256_i32 = arith.constant 256 : i32
    %29 = vector.broadcast %c256_i32 : i32 to vector<1x256xi32>
    %30 = arith.select %28, %17, %29 : vector<1x256xi1>, vector<1x256xi32>
    %31 = vector.shape_cast %30 : vector<1x256xi32> to vector<1x1x256xi32>
    %cst_17 = arith.constant dense<2147483647> : vector<1xi32>
    %32 = vector.multi_reduction <minsi>, %31, %cst_17 [1, 2] : vector<1x1x256xi32> to vector<1xi32>
    %33 = vector.shape_cast %32 : vector<1xi32> to vector<1x1x1xi32>
    %34 = vector.extract %33[0, 0, 0] : i32 from vector<1x1x1xi32>
    %c0_i32_18 = arith.constant 0 : i32
    %35 = vector.broadcast %c0_i32_18 : i32 to vector<10x1xi32>
    %36 = arith.cmpi eq, %18, %35 : vector<10x1xi32>
    %37 = vector.broadcast %34 : i32 to vector<10x1xi32>
    %38 = arith.select %36, %37, %22 : vector<10x1xi1>, vector<10x1xi32>
    %39 = vector.broadcast %34 : i32 to vector<1x256xi32>
    %40 = arith.cmpi eq, %17, %39 : vector<1x256xi32>
    %cst_19 = arith.constant 0xFF800000 : f32
    %41 = vector.broadcast %cst_19 : f32 to vector<1x256xf32>
    %42 = arith.select %40, %41, %20 : vector<1x256xi1>, vector<1x256xf32>
    %43 = vector.shape_cast %42 : vector<1x256xf32> to vector<1x1x256xf32>
    %cst_20 = arith.constant dense<0xFF800000> : vector<1xf32>
    %44 = vector.multi_reduction <maximumf>, %43, %cst_20 [1, 2] : vector<1x1x256xf32> to vector<1xf32>
    %45 = vector.shape_cast %44 : vector<1xf32> to vector<1x1x1xf32>
    %46 = vector.extract %45[0, 0, 0] : f32 from vector<1x1x1xf32>
    %47 = vector.broadcast %46 : f32 to vector<1x256xf32>
    %48 = arith.cmpf oeq, %42, %47 : vector<1x256xf32>
    %c256_i32_21 = arith.constant 256 : i32
    %49 = vector.broadcast %c256_i32_21 : i32 to vector<1x256xi32>
    %50 = arith.select %48, %17, %49 : vector<1x256xi1>, vector<1x256xi32>
    %51 = vector.shape_cast %50 : vector<1x256xi32> to vector<1x1x256xi32>
    %cst_22 = arith.constant dense<2147483647> : vector<1xi32>
    %52 = vector.multi_reduction <minsi>, %51, %cst_22 [1, 2] : vector<1x1x256xi32> to vector<1xi32>
    %53 = vector.shape_cast %52 : vector<1xi32> to vector<1x1x1xi32>
    %54 = vector.extract %53[0, 0, 0] : i32 from vector<1x1x1xi32>
    %c1_i32 = arith.constant 1 : i32
    %55 = vector.broadcast %c1_i32 : i32 to vector<10x1xi32>
    %56 = arith.cmpi eq, %18, %55 : vector<10x1xi32>
    %57 = vector.broadcast %54 : i32 to vector<10x1xi32>
    %58 = arith.select %56, %57, %38 : vector<10x1xi1>, vector<10x1xi32>
    %59 = vector.broadcast %54 : i32 to vector<1x256xi32>
    %60 = arith.cmpi eq, %17, %59 : vector<1x256xi32>
    %cst_23 = arith.constant 0xFF800000 : f32
    %61 = vector.broadcast %cst_23 : f32 to vector<1x256xf32>
    %62 = arith.select %60, %61, %42 : vector<1x256xi1>, vector<1x256xf32>
    %63 = vector.shape_cast %62 : vector<1x256xf32> to vector<1x1x256xf32>
    %cst_24 = arith.constant dense<0xFF800000> : vector<1xf32>
    %64 = vector.multi_reduction <maximumf>, %63, %cst_24 [1, 2] : vector<1x1x256xf32> to vector<1xf32>
    %65 = vector.shape_cast %64 : vector<1xf32> to vector<1x1x1xf32>
    %66 = vector.extract %65[0, 0, 0] : f32 from vector<1x1x1xf32>
    %67 = vector.broadcast %66 : f32 to vector<1x256xf32>
    %68 = arith.cmpf oeq, %62, %67 : vector<1x256xf32>
    %c256_i32_25 = arith.constant 256 : i32
    %69 = vector.broadcast %c256_i32_25 : i32 to vector<1x256xi32>
    %70 = arith.select %68, %17, %69 : vector<1x256xi1>, vector<1x256xi32>
    %71 = vector.shape_cast %70 : vector<1x256xi32> to vector<1x1x256xi32>
    %cst_26 = arith.constant dense<2147483647> : vector<1xi32>
    %72 = vector.multi_reduction <minsi>, %71, %cst_26 [1, 2] : vector<1x1x256xi32> to vector<1xi32>
    %73 = vector.shape_cast %72 : vector<1xi32> to vector<1x1x1xi32>
    %74 = vector.extract %73[0, 0, 0] : i32 from vector<1x1x1xi32>
    %c2_i32 = arith.constant 2 : i32
    %75 = vector.broadcast %c2_i32 : i32 to vector<10x1xi32>
    %76 = arith.cmpi eq, %18, %75 : vector<10x1xi32>
    %77 = vector.broadcast %74 : i32 to vector<10x1xi32>
    %78 = arith.select %76, %77, %58 : vector<10x1xi1>, vector<10x1xi32>
    %79 = vector.broadcast %74 : i32 to vector<1x256xi32>
    %80 = arith.cmpi eq, %17, %79 : vector<1x256xi32>
    %cst_27 = arith.constant 0xFF800000 : f32
    %81 = vector.broadcast %cst_27 : f32 to vector<1x256xf32>
    %82 = arith.select %80, %81, %62 : vector<1x256xi1>, vector<1x256xf32>
    %83 = vector.shape_cast %82 : vector<1x256xf32> to vector<1x1x256xf32>
    %cst_28 = arith.constant dense<0xFF800000> : vector<1xf32>
    %84 = vector.multi_reduction <maximumf>, %83, %cst_28 [1, 2] : vector<1x1x256xf32> to vector<1xf32>
    %85 = vector.shape_cast %84 : vector<1xf32> to vector<1x1x1xf32>
    %86 = vector.extract %85[0, 0, 0] : f32 from vector<1x1x1xf32>
    %87 = vector.broadcast %86 : f32 to vector<1x256xf32>
    %88 = arith.cmpf oeq, %82, %87 : vector<1x256xf32>
    %c256_i32_29 = arith.constant 256 : i32
    %89 = vector.broadcast %c256_i32_29 : i32 to vector<1x256xi32>
    %90 = arith.select %88, %17, %89 : vector<1x256xi1>, vector<1x256xi32>
    %91 = vector.shape_cast %90 : vector<1x256xi32> to vector<1x1x256xi32>
    %cst_30 = arith.constant dense<2147483647> : vector<1xi32>
    %92 = vector.multi_reduction <minsi>, %91, %cst_30 [1, 2] : vector<1x1x256xi32> to vector<1xi32>
    %93 = vector.shape_cast %92 : vector<1xi32> to vector<1x1x1xi32>
    %94 = vector.extract %93[0, 0, 0] : i32 from vector<1x1x1xi32>
    %c3_i32 = arith.constant 3 : i32
    %95 = vector.broadcast %c3_i32 : i32 to vector<10x1xi32>
    %96 = arith.cmpi eq, %18, %95 : vector<10x1xi32>
    %97 = vector.broadcast %94 : i32 to vector<10x1xi32>
    %98 = arith.select %96, %97, %78 : vector<10x1xi1>, vector<10x1xi32>
    %99 = vector.broadcast %94 : i32 to vector<1x256xi32>
    %100 = arith.cmpi eq, %17, %99 : vector<1x256xi32>
    %cst_31 = arith.constant 0xFF800000 : f32
    %101 = vector.broadcast %cst_31 : f32 to vector<1x256xf32>
    %102 = arith.select %100, %101, %82 : vector<1x256xi1>, vector<1x256xf32>
    %103 = vector.shape_cast %102 : vector<1x256xf32> to vector<1x1x256xf32>
    %cst_32 = arith.constant dense<0xFF800000> : vector<1xf32>
    %104 = vector.multi_reduction <maximumf>, %103, %cst_32 [1, 2] : vector<1x1x256xf32> to vector<1xf32>
    %105 = vector.shape_cast %104 : vector<1xf32> to vector<1x1x1xf32>
    %106 = vector.extract %105[0, 0, 0] : f32 from vector<1x1x1xf32>
    %107 = vector.broadcast %106 : f32 to vector<1x256xf32>
    %108 = arith.cmpf oeq, %102, %107 : vector<1x256xf32>
    %c256_i32_33 = arith.constant 256 : i32
    %109 = vector.broadcast %c256_i32_33 : i32 to vector<1x256xi32>
    %110 = arith.select %108, %17, %109 : vector<1x256xi1>, vector<1x256xi32>
    %111 = vector.shape_cast %110 : vector<1x256xi32> to vector<1x1x256xi32>
    %cst_34 = arith.constant dense<2147483647> : vector<1xi32>
    %112 = vector.multi_reduction <minsi>, %111, %cst_34 [1, 2] : vector<1x1x256xi32> to vector<1xi32>
    %113 = vector.shape_cast %112 : vector<1xi32> to vector<1x1x1xi32>
    %114 = vector.extract %113[0, 0, 0] : i32 from vector<1x1x1xi32>
    %c4_i32 = arith.constant 4 : i32
    %115 = vector.broadcast %c4_i32 : i32 to vector<10x1xi32>
    %116 = arith.cmpi eq, %18, %115 : vector<10x1xi32>
    %117 = vector.broadcast %114 : i32 to vector<10x1xi32>
    %118 = arith.select %116, %117, %98 : vector<10x1xi1>, vector<10x1xi32>
    %119 = vector.broadcast %114 : i32 to vector<1x256xi32>
    %120 = arith.cmpi eq, %17, %119 : vector<1x256xi32>
    %cst_35 = arith.constant 0xFF800000 : f32
    %121 = vector.broadcast %cst_35 : f32 to vector<1x256xf32>
    %122 = arith.select %120, %121, %102 : vector<1x256xi1>, vector<1x256xf32>
    %123 = vector.shape_cast %122 : vector<1x256xf32> to vector<1x1x256xf32>
    %cst_36 = arith.constant dense<0xFF800000> : vector<1xf32>
    %124 = vector.multi_reduction <maximumf>, %123, %cst_36 [1, 2] : vector<1x1x256xf32> to vector<1xf32>
    %125 = vector.shape_cast %124 : vector<1xf32> to vector<1x1x1xf32>
    %126 = vector.extract %125[0, 0, 0] : f32 from vector<1x1x1xf32>
    %127 = vector.broadcast %126 : f32 to vector<1x256xf32>
    %128 = arith.cmpf oeq, %122, %127 : vector<1x256xf32>
    %c256_i32_37 = arith.constant 256 : i32
    %129 = vector.broadcast %c256_i32_37 : i32 to vector<1x256xi32>
    %130 = arith.select %128, %17, %129 : vector<1x256xi1>, vector<1x256xi32>
    %131 = vector.shape_cast %130 : vector<1x256xi32> to vector<1x1x256xi32>
    %cst_38 = arith.constant dense<2147483647> : vector<1xi32>
    %132 = vector.multi_reduction <minsi>, %131, %cst_38 [1, 2] : vector<1x1x256xi32> to vector<1xi32>
    %133 = vector.shape_cast %132 : vector<1xi32> to vector<1x1x1xi32>
    %134 = vector.extract %133[0, 0, 0] : i32 from vector<1x1x1xi32>
    %c5_i32 = arith.constant 5 : i32
    %135 = vector.broadcast %c5_i32 : i32 to vector<10x1xi32>
    %136 = arith.cmpi eq, %18, %135 : vector<10x1xi32>
    %137 = vector.broadcast %134 : i32 to vector<10x1xi32>
    %138 = arith.select %136, %137, %118 : vector<10x1xi1>, vector<10x1xi32>
    %139 = vector.broadcast %134 : i32 to vector<1x256xi32>
    %140 = arith.cmpi eq, %17, %139 : vector<1x256xi32>
    %cst_39 = arith.constant 0xFF800000 : f32
    %141 = vector.broadcast %cst_39 : f32 to vector<1x256xf32>
    %142 = arith.select %140, %141, %122 : vector<1x256xi1>, vector<1x256xf32>
    %143 = vector.shape_cast %142 : vector<1x256xf32> to vector<1x1x256xf32>
    %cst_40 = arith.constant dense<0xFF800000> : vector<1xf32>
    %144 = vector.multi_reduction <maximumf>, %143, %cst_40 [1, 2] : vector<1x1x256xf32> to vector<1xf32>
    %145 = vector.shape_cast %144 : vector<1xf32> to vector<1x1x1xf32>
    %146 = vector.extract %145[0, 0, 0] : f32 from vector<1x1x1xf32>
    %147 = vector.broadcast %146 : f32 to vector<1x256xf32>
    %148 = arith.cmpf oeq, %142, %147 : vector<1x256xf32>
    %c256_i32_41 = arith.constant 256 : i32
    %149 = vector.broadcast %c256_i32_41 : i32 to vector<1x256xi32>
    %150 = arith.select %148, %17, %149 : vector<1x256xi1>, vector<1x256xi32>
    %151 = vector.shape_cast %150 : vector<1x256xi32> to vector<1x1x256xi32>
    %cst_42 = arith.constant dense<2147483647> : vector<1xi32>
    %152 = vector.multi_reduction <minsi>, %151, %cst_42 [1, 2] : vector<1x1x256xi32> to vector<1xi32>
    %153 = vector.shape_cast %152 : vector<1xi32> to vector<1x1x1xi32>
    %154 = vector.extract %153[0, 0, 0] : i32 from vector<1x1x1xi32>
    %c6_i32 = arith.constant 6 : i32
    %155 = vector.broadcast %c6_i32 : i32 to vector<10x1xi32>
    %156 = arith.cmpi eq, %18, %155 : vector<10x1xi32>
    %157 = vector.broadcast %154 : i32 to vector<10x1xi32>
    %158 = arith.select %156, %157, %138 : vector<10x1xi1>, vector<10x1xi32>
    %159 = vector.broadcast %154 : i32 to vector<1x256xi32>
    %160 = arith.cmpi eq, %17, %159 : vector<1x256xi32>
    %cst_43 = arith.constant 0xFF800000 : f32
    %161 = vector.broadcast %cst_43 : f32 to vector<1x256xf32>
    %162 = arith.select %160, %161, %142 : vector<1x256xi1>, vector<1x256xf32>
    %163 = vector.shape_cast %162 : vector<1x256xf32> to vector<1x1x256xf32>
    %cst_44 = arith.constant dense<0xFF800000> : vector<1xf32>
    %164 = vector.multi_reduction <maximumf>, %163, %cst_44 [1, 2] : vector<1x1x256xf32> to vector<1xf32>
    %165 = vector.shape_cast %164 : vector<1xf32> to vector<1x1x1xf32>
    %166 = vector.extract %165[0, 0, 0] : f32 from vector<1x1x1xf32>
    %167 = vector.broadcast %166 : f32 to vector<1x256xf32>
    %168 = arith.cmpf oeq, %162, %167 : vector<1x256xf32>
    %c256_i32_45 = arith.constant 256 : i32
    %169 = vector.broadcast %c256_i32_45 : i32 to vector<1x256xi32>
    %170 = arith.select %168, %17, %169 : vector<1x256xi1>, vector<1x256xi32>
    %171 = vector.shape_cast %170 : vector<1x256xi32> to vector<1x1x256xi32>
    %cst_46 = arith.constant dense<2147483647> : vector<1xi32>
    %172 = vector.multi_reduction <minsi>, %171, %cst_46 [1, 2] : vector<1x1x256xi32> to vector<1xi32>
    %173 = vector.shape_cast %172 : vector<1xi32> to vector<1x1x1xi32>
    %174 = vector.extract %173[0, 0, 0] : i32 from vector<1x1x1xi32>
    %c7_i32 = arith.constant 7 : i32
    %175 = vector.broadcast %c7_i32 : i32 to vector<10x1xi32>
    %176 = arith.cmpi eq, %18, %175 : vector<10x1xi32>
    %177 = vector.broadcast %174 : i32 to vector<10x1xi32>
    %178 = arith.select %176, %177, %158 : vector<10x1xi1>, vector<10x1xi32>
    %179 = vector.broadcast %174 : i32 to vector<1x256xi32>
    %180 = arith.cmpi eq, %17, %179 : vector<1x256xi32>
    %cst_47 = arith.constant 0xFF800000 : f32
    %181 = vector.broadcast %cst_47 : f32 to vector<1x256xf32>
    %182 = arith.select %180, %181, %162 : vector<1x256xi1>, vector<1x256xf32>
    %183 = vector.shape_cast %182 : vector<1x256xf32> to vector<1x1x256xf32>
    %cst_48 = arith.constant dense<0xFF800000> : vector<1xf32>
    %184 = vector.multi_reduction <maximumf>, %183, %cst_48 [1, 2] : vector<1x1x256xf32> to vector<1xf32>
    %185 = vector.shape_cast %184 : vector<1xf32> to vector<1x1x1xf32>
    %186 = vector.extract %185[0, 0, 0] : f32 from vector<1x1x1xf32>
    %187 = vector.broadcast %186 : f32 to vector<1x256xf32>
    %188 = arith.cmpf oeq, %182, %187 : vector<1x256xf32>
    %c256_i32_49 = arith.constant 256 : i32
    %189 = vector.broadcast %c256_i32_49 : i32 to vector<1x256xi32>
    %190 = arith.select %188, %17, %189 : vector<1x256xi1>, vector<1x256xi32>
    %191 = vector.shape_cast %190 : vector<1x256xi32> to vector<1x1x256xi32>
    %cst_50 = arith.constant dense<2147483647> : vector<1xi32>
    %192 = vector.multi_reduction <minsi>, %191, %cst_50 [1, 2] : vector<1x1x256xi32> to vector<1xi32>
    %193 = vector.shape_cast %192 : vector<1xi32> to vector<1x1x1xi32>
    %194 = vector.extract %193[0, 0, 0] : i32 from vector<1x1x1xi32>
    %c8_i32 = arith.constant 8 : i32
    %195 = vector.broadcast %c8_i32 : i32 to vector<10x1xi32>
    %196 = arith.cmpi eq, %18, %195 : vector<10x1xi32>
    %197 = vector.broadcast %194 : i32 to vector<10x1xi32>
    %198 = arith.select %196, %197, %178 : vector<10x1xi1>, vector<10x1xi32>
    %199 = vector.broadcast %194 : i32 to vector<1x256xi32>
    %200 = arith.cmpi eq, %17, %199 : vector<1x256xi32>
    %cst_51 = arith.constant 0xFF800000 : f32
    %201 = vector.broadcast %cst_51 : f32 to vector<1x256xf32>
    %202 = arith.select %200, %201, %182 : vector<1x256xi1>, vector<1x256xf32>
    %203 = vector.shape_cast %202 : vector<1x256xf32> to vector<1x1x256xf32>
    %cst_52 = arith.constant dense<0xFF800000> : vector<1xf32>
    %204 = vector.multi_reduction <maximumf>, %203, %cst_52 [1, 2] : vector<1x1x256xf32> to vector<1xf32>
    %205 = vector.shape_cast %204 : vector<1xf32> to vector<1x1x1xf32>
    %206 = vector.extract %205[0, 0, 0] : f32 from vector<1x1x1xf32>
    %207 = vector.broadcast %206 : f32 to vector<1x256xf32>
    %208 = arith.cmpf oeq, %202, %207 : vector<1x256xf32>
    %c256_i32_53 = arith.constant 256 : i32
    %209 = vector.broadcast %c256_i32_53 : i32 to vector<1x256xi32>
    %210 = arith.select %208, %17, %209 : vector<1x256xi1>, vector<1x256xi32>
    %211 = vector.shape_cast %210 : vector<1x256xi32> to vector<1x1x256xi32>
    %cst_54 = arith.constant dense<2147483647> : vector<1xi32>
    %212 = vector.multi_reduction <minsi>, %211, %cst_54 [1, 2] : vector<1x1x256xi32> to vector<1xi32>
    %213 = vector.shape_cast %212 : vector<1xi32> to vector<1x1x1xi32>
    %214 = vector.extract %213[0, 0, 0] : i32 from vector<1x1x1xi32>
    %c9_i32 = arith.constant 9 : i32
    %215 = vector.broadcast %c9_i32 : i32 to vector<10x1xi32>
    %216 = arith.cmpi eq, %18, %215 : vector<10x1xi32>
    %217 = vector.broadcast %214 : i32 to vector<10x1xi32>
    %218 = arith.select %216, %217, %198 : vector<10x1xi1>, vector<10x1xi32>
    %219 = vector.broadcast %218 : vector<10x1xi32> to vector<10x256xi32>
    %220 = arith.cmpi eq, %19, %219 : vector<10x256xi32>
    %221 = arith.extui %220 : vector<10x256xi1> to vector<10x256xi32>
    %222 = arith.sitofp %221 : vector<10x256xi32> to vector<10x256xf32>
    %cst_55 = arith.constant dense<0.000000e+00> : vector<10x40xf32>
    %223 = tpu.matmul %222, %21, %cst_55 {dimension_numbers = #tpu.dot_dimension_numbers<[1], [0], [0], [1], [0, 0, 1, 1], [], []>} : vector<10x256xf32>, vector<256x40xf32>, vector<10x40xf32> -> vector<10x40xf32>
    %224 = vector.extract_strided_slice %223 {offsets = [0, 32], sizes = [10, 8], strides = [1, 1]} : vector<10x40xf32> to vector<10x8xf32>
    %c0_56 = arith.constant 0 : index
    %c0_57 = arith.constant 0 : index
    %c0_58 = arith.constant 0 : index
    %225 = vector.load %arg7[%c0_56, %c0_57, %c0_58] : memref<2x10x8xf32, #tpu.memory_space<vmem>>, vector<1x10x8xf32>
    %226 = vector.shape_cast %225 : vector<1x10x8xf32> to vector<10x8xf32>
    %227 = vector.shape_cast %224 : vector<10x8xf32> to vector<1x10x8xf32>
    tpu.vector_store %arg7[%c0_56, %c0_57, %c0_58], %227 {strides = array<i32>} : memref<2x10x8xf32, #tpu.memory_space<vmem>>, vector<1x10x8xf32>,
    %228 = vector.extract_strided_slice %16 {offsets = [0, 256], sizes = [1, 256], strides = [1, 1]} : vector<1x512xf32> to vector<1x256xf32>
    %229 = vector.extract_strided_slice %5 {offsets = [256, 0], sizes = [256, 40], strides = [1, 1]} : vector<512x40xf32> to vector<256x40xf32>
    %c0_i32_59 = arith.constant 0 : i32
    %230 = vector.broadcast %c0_i32_59 : i32 to vector<10x1xi32>
    %231 = vector.shape_cast %228 : vector<1x256xf32> to vector<1x1x256xf32>
    %cst_60 = arith.constant dense<0xFF800000> : vector<1xf32>
    %232 = vector.multi_reduction <maximumf>, %231, %cst_60 [1, 2] : vector<1x1x256xf32> to vector<1xf32>
    %233 = vector.shape_cast %232 : vector<1xf32> to vector<1x1x1xf32>
    %234 = vector.extract %233[0, 0, 0] : f32 from vector<1x1x1xf32>
    %235 = vector.broadcast %234 : f32 to vector<1x256xf32>
    %236 = arith.cmpf oeq, %228, %235 : vector<1x256xf32>
    %c256_i32_61 = arith.constant 256 : i32
    %237 = vector.broadcast %c256_i32_61 : i32 to vector<1x256xi32>
    %238 = arith.select %236, %17, %237 : vector<1x256xi1>, vector<1x256xi32>
    %239 = vector.shape_cast %238 : vector<1x256xi32> to vector<1x1x256xi32>
    %cst_62 = arith.constant dense<2147483647> : vector<1xi32>
    %240 = vector.multi_reduction <minsi>, %239, %cst_62 [1, 2] : vector<1x1x256xi32> to vector<1xi32>
    %241 = vector.shape_cast %240 : vector<1xi32> to vector<1x1x1xi32>
    %242 = vector.extract %241[0, 0, 0] : i32 from vector<1x1x1xi32>
    %c0_i32_63 = arith.constant 0 : i32
    %243 = vector.broadcast %c0_i32_63 : i32 to vector<10x1xi32>
    %244 = arith.cmpi eq, %18, %243 : vector<10x1xi32>
    %245 = vector.broadcast %242 : i32 to vector<10x1xi32>
    %246 = arith.select %244, %245, %230 : vector<10x1xi1>, vector<10x1xi32>
    %247 = vector.broadcast %242 : i32 to vector<1x256xi32>
    %248 = arith.cmpi eq, %17, %247 : vector<1x256xi32>
    %cst_64 = arith.constant 0xFF800000 : f32
    %249 = vector.broadcast %cst_64 : f32 to vector<1x256xf32>
    %250 = arith.select %248, %249, %228 : vector<1x256xi1>, vector<1x256xf32>
    %251 = vector.shape_cast %250 : vector<1x256xf32> to vector<1x1x256xf32>
    %cst_65 = arith.constant dense<0xFF800000> : vector<1xf32>
    %252 = vector.multi_reduction <maximumf>, %251, %cst_65 [1, 2] : vector<1x1x256xf32> to vector<1xf32>
    %253 = vector.shape_cast %252 : vector<1xf32> to vector<1x1x1xf32>
    %254 = vector.extract %253[0, 0, 0] : f32 from vector<1x1x1xf32>
    %255 = vector.broadcast %254 : f32 to vector<1x256xf32>
    %256 = arith.cmpf oeq, %250, %255 : vector<1x256xf32>
    %c256_i32_66 = arith.constant 256 : i32
    %257 = vector.broadcast %c256_i32_66 : i32 to vector<1x256xi32>
    %258 = arith.select %256, %17, %257 : vector<1x256xi1>, vector<1x256xi32>
    %259 = vector.shape_cast %258 : vector<1x256xi32> to vector<1x1x256xi32>
    %cst_67 = arith.constant dense<2147483647> : vector<1xi32>
    %260 = vector.multi_reduction <minsi>, %259, %cst_67 [1, 2] : vector<1x1x256xi32> to vector<1xi32>
    %261 = vector.shape_cast %260 : vector<1xi32> to vector<1x1x1xi32>
    %262 = vector.extract %261[0, 0, 0] : i32 from vector<1x1x1xi32>
    %c1_i32_68 = arith.constant 1 : i32
    %263 = vector.broadcast %c1_i32_68 : i32 to vector<10x1xi32>
    %264 = arith.cmpi eq, %18, %263 : vector<10x1xi32>
    %265 = vector.broadcast %262 : i32 to vector<10x1xi32>
    %266 = arith.select %264, %265, %246 : vector<10x1xi1>, vector<10x1xi32>
    %267 = vector.broadcast %262 : i32 to vector<1x256xi32>
    %268 = arith.cmpi eq, %17, %267 : vector<1x256xi32>
    %cst_69 = arith.constant 0xFF800000 : f32
    %269 = vector.broadcast %cst_69 : f32 to vector<1x256xf32>
    %270 = arith.select %268, %269, %250 : vector<1x256xi1>, vector<1x256xf32>
    %271 = vector.shape_cast %270 : vector<1x256xf32> to vector<1x1x256xf32>
    %cst_70 = arith.constant dense<0xFF800000> : vector<1xf32>
    %272 = vector.multi_reduction <maximumf>, %271, %cst_70 [1, 2] : vector<1x1x256xf32> to vector<1xf32>
    %273 = vector.shape_cast %272 : vector<1xf32> to vector<1x1x1xf32>
    %274 = vector.extract %273[0, 0, 0] : f32 from vector<1x1x1xf32>
    %275 = vector.broadcast %274 : f32 to vector<1x256xf32>
    %276 = arith.cmpf oeq, %270, %275 : vector<1x256xf32>
    %c256_i32_71 = arith.constant 256 : i32
    %277 = vector.broadcast %c256_i32_71 : i32 to vector<1x256xi32>
    %278 = arith.select %276, %17, %277 : vector<1x256xi1>, vector<1x256xi32>
    %279 = vector.shape_cast %278 : vector<1x256xi32> to vector<1x1x256xi32>
    %cst_72 = arith.constant dense<2147483647> : vector<1xi32>
    %280 = vector.multi_reduction <minsi>, %279, %cst_72 [1, 2] : vector<1x1x256xi32> to vector<1xi32>
    %281 = vector.shape_cast %280 : vector<1xi32> to vector<1x1x1xi32>
    %282 = vector.extract %281[0, 0, 0] : i32 from vector<1x1x1xi32>
    %c2_i32_73 = arith.constant 2 : i32
    %283 = vector.broadcast %c2_i32_73 : i32 to vector<10x1xi32>
    %284 = arith.cmpi eq, %18, %283 : vector<10x1xi32>
    %285 = vector.broadcast %282 : i32 to vector<10x1xi32>
    %286 = arith.select %284, %285, %266 : vector<10x1xi1>, vector<10x1xi32>
    %287 = vector.broadcast %282 : i32 to vector<1x256xi32>
    %288 = arith.cmpi eq, %17, %287 : vector<1x256xi32>
    %cst_74 = arith.constant 0xFF800000 : f32
    %289 = vector.broadcast %cst_74 : f32 to vector<1x256xf32>
    %290 = arith.select %288, %289, %270 : vector<1x256xi1>, vector<1x256xf32>
    %291 = vector.shape_cast %290 : vector<1x256xf32> to vector<1x1x256xf32>
    %cst_75 = arith.constant dense<0xFF800000> : vector<1xf32>
    %292 = vector.multi_reduction <maximumf>, %291, %cst_75 [1, 2] : vector<1x1x256xf32> to vector<1xf32>
    %293 = vector.shape_cast %292 : vector<1xf32> to vector<1x1x1xf32>
    %294 = vector.extract %293[0, 0, 0] : f32 from vector<1x1x1xf32>
    %295 = vector.broadcast %294 : f32 to vector<1x256xf32>
    %296 = arith.cmpf oeq, %290, %295 : vector<1x256xf32>
    %c256_i32_76 = arith.constant 256 : i32
    %297 = vector.broadcast %c256_i32_76 : i32 to vector<1x256xi32>
    %298 = arith.select %296, %17, %297 : vector<1x256xi1>, vector<1x256xi32>
    %299 = vector.shape_cast %298 : vector<1x256xi32> to vector<1x1x256xi32>
    %cst_77 = arith.constant dense<2147483647> : vector<1xi32>
    %300 = vector.multi_reduction <minsi>, %299, %cst_77 [1, 2] : vector<1x1x256xi32> to vector<1xi32>
    %301 = vector.shape_cast %300 : vector<1xi32> to vector<1x1x1xi32>
    %302 = vector.extract %301[0, 0, 0] : i32 from vector<1x1x1xi32>
    %c3_i32_78 = arith.constant 3 : i32
    %303 = vector.broadcast %c3_i32_78 : i32 to vector<10x1xi32>
    %304 = arith.cmpi eq, %18, %303 : vector<10x1xi32>
    %305 = vector.broadcast %302 : i32 to vector<10x1xi32>
    %306 = arith.select %304, %305, %286 : vector<10x1xi1>, vector<10x1xi32>
    %307 = vector.broadcast %302 : i32 to vector<1x256xi32>
    %308 = arith.cmpi eq, %17, %307 : vector<1x256xi32>
    %cst_79 = arith.constant 0xFF800000 : f32
    %309 = vector.broadcast %cst_79 : f32 to vector<1x256xf32>
    %310 = arith.select %308, %309, %290 : vector<1x256xi1>, vector<1x256xf32>
    %311 = vector.shape_cast %310 : vector<1x256xf32> to vector<1x1x256xf32>
    %cst_80 = arith.constant dense<0xFF800000> : vector<1xf32>
    %312 = vector.multi_reduction <maximumf>, %311, %cst_80 [1, 2] : vector<1x1x256xf32> to vector<1xf32>
    %313 = vector.shape_cast %312 : vector<1xf32> to vector<1x1x1xf32>
    %314 = vector.extract %313[0, 0, 0] : f32 from vector<1x1x1xf32>
    %315 = vector.broadcast %314 : f32 to vector<1x256xf32>
    %316 = arith.cmpf oeq, %310, %315 : vector<1x256xf32>
    %c256_i32_81 = arith.constant 256 : i32
    %317 = vector.broadcast %c256_i32_81 : i32 to vector<1x256xi32>
    %318 = arith.select %316, %17, %317 : vector<1x256xi1>, vector<1x256xi32>
    %319 = vector.shape_cast %318 : vector<1x256xi32> to vector<1x1x256xi32>
    %cst_82 = arith.constant dense<2147483647> : vector<1xi32>
    %320 = vector.multi_reduction <minsi>, %319, %cst_82 [1, 2] : vector<1x1x256xi32> to vector<1xi32>
    %321 = vector.shape_cast %320 : vector<1xi32> to vector<1x1x1xi32>
    %322 = vector.extract %321[0, 0, 0] : i32 from vector<1x1x1xi32>
    %c4_i32_83 = arith.constant 4 : i32
    %323 = vector.broadcast %c4_i32_83 : i32 to vector<10x1xi32>
    %324 = arith.cmpi eq, %18, %323 : vector<10x1xi32>
    %325 = vector.broadcast %322 : i32 to vector<10x1xi32>
    %326 = arith.select %324, %325, %306 : vector<10x1xi1>, vector<10x1xi32>
    %327 = vector.broadcast %322 : i32 to vector<1x256xi32>
    %328 = arith.cmpi eq, %17, %327 : vector<1x256xi32>
    %cst_84 = arith.constant 0xFF800000 : f32
    %329 = vector.broadcast %cst_84 : f32 to vector<1x256xf32>
    %330 = arith.select %328, %329, %310 : vector<1x256xi1>, vector<1x256xf32>
    %331 = vector.shape_cast %330 : vector<1x256xf32> to vector<1x1x256xf32>
    %cst_85 = arith.constant dense<0xFF800000> : vector<1xf32>
    %332 = vector.multi_reduction <maximumf>, %331, %cst_85 [1, 2] : vector<1x1x256xf32> to vector<1xf32>
    %333 = vector.shape_cast %332 : vector<1xf32> to vector<1x1x1xf32>
    %334 = vector.extract %333[0, 0, 0] : f32 from vector<1x1x1xf32>
    %335 = vector.broadcast %334 : f32 to vector<1x256xf32>
    %336 = arith.cmpf oeq, %330, %335 : vector<1x256xf32>
    %c256_i32_86 = arith.constant 256 : i32
    %337 = vector.broadcast %c256_i32_86 : i32 to vector<1x256xi32>
    %338 = arith.select %336, %17, %337 : vector<1x256xi1>, vector<1x256xi32>
    %339 = vector.shape_cast %338 : vector<1x256xi32> to vector<1x1x256xi32>
    %cst_87 = arith.constant dense<2147483647> : vector<1xi32>
    %340 = vector.multi_reduction <minsi>, %339, %cst_87 [1, 2] : vector<1x1x256xi32> to vector<1xi32>
    %341 = vector.shape_cast %340 : vector<1xi32> to vector<1x1x1xi32>
    %342 = vector.extract %341[0, 0, 0] : i32 from vector<1x1x1xi32>
    %c5_i32_88 = arith.constant 5 : i32
    %343 = vector.broadcast %c5_i32_88 : i32 to vector<10x1xi32>
    %344 = arith.cmpi eq, %18, %343 : vector<10x1xi32>
    %345 = vector.broadcast %342 : i32 to vector<10x1xi32>
    %346 = arith.select %344, %345, %326 : vector<10x1xi1>, vector<10x1xi32>
    %347 = vector.broadcast %342 : i32 to vector<1x256xi32>
    %348 = arith.cmpi eq, %17, %347 : vector<1x256xi32>
    %cst_89 = arith.constant 0xFF800000 : f32
    %349 = vector.broadcast %cst_89 : f32 to vector<1x256xf32>
    %350 = arith.select %348, %349, %330 : vector<1x256xi1>, vector<1x256xf32>
    %351 = vector.shape_cast %350 : vector<1x256xf32> to vector<1x1x256xf32>
    %cst_90 = arith.constant dense<0xFF800000> : vector<1xf32>
    %352 = vector.multi_reduction <maximumf>, %351, %cst_90 [1, 2] : vector<1x1x256xf32> to vector<1xf32>
    %353 = vector.shape_cast %352 : vector<1xf32> to vector<1x1x1xf32>
    %354 = vector.extract %353[0, 0, 0] : f32 from vector<1x1x1xf32>
    %355 = vector.broadcast %354 : f32 to vector<1x256xf32>
    %356 = arith.cmpf oeq, %350, %355 : vector<1x256xf32>
    %c256_i32_91 = arith.constant 256 : i32
    %357 = vector.broadcast %c256_i32_91 : i32 to vector<1x256xi32>
    %358 = arith.select %356, %17, %357 : vector<1x256xi1>, vector<1x256xi32>
    %359 = vector.shape_cast %358 : vector<1x256xi32> to vector<1x1x256xi32>
    %cst_92 = arith.constant dense<2147483647> : vector<1xi32>
    %360 = vector.multi_reduction <minsi>, %359, %cst_92 [1, 2] : vector<1x1x256xi32> to vector<1xi32>
    %361 = vector.shape_cast %360 : vector<1xi32> to vector<1x1x1xi32>
    %362 = vector.extract %361[0, 0, 0] : i32 from vector<1x1x1xi32>
    %c6_i32_93 = arith.constant 6 : i32
    %363 = vector.broadcast %c6_i32_93 : i32 to vector<10x1xi32>
    %364 = arith.cmpi eq, %18, %363 : vector<10x1xi32>
    %365 = vector.broadcast %362 : i32 to vector<10x1xi32>
    %366 = arith.select %364, %365, %346 : vector<10x1xi1>, vector<10x1xi32>
    %367 = vector.broadcast %362 : i32 to vector<1x256xi32>
    %368 = arith.cmpi eq, %17, %367 : vector<1x256xi32>
    %cst_94 = arith.constant 0xFF800000 : f32
    %369 = vector.broadcast %cst_94 : f32 to vector<1x256xf32>
    %370 = arith.select %368, %369, %350 : vector<1x256xi1>, vector<1x256xf32>
    %371 = vector.shape_cast %370 : vector<1x256xf32> to vector<1x1x256xf32>
    %cst_95 = arith.constant dense<0xFF800000> : vector<1xf32>
    %372 = vector.multi_reduction <maximumf>, %371, %cst_95 [1, 2] : vector<1x1x256xf32> to vector<1xf32>
    %373 = vector.shape_cast %372 : vector<1xf32> to vector<1x1x1xf32>
    %374 = vector.extract %373[0, 0, 0] : f32 from vector<1x1x1xf32>
    %375 = vector.broadcast %374 : f32 to vector<1x256xf32>
    %376 = arith.cmpf oeq, %370, %375 : vector<1x256xf32>
    %c256_i32_96 = arith.constant 256 : i32
    %377 = vector.broadcast %c256_i32_96 : i32 to vector<1x256xi32>
    %378 = arith.select %376, %17, %377 : vector<1x256xi1>, vector<1x256xi32>
    %379 = vector.shape_cast %378 : vector<1x256xi32> to vector<1x1x256xi32>
    %cst_97 = arith.constant dense<2147483647> : vector<1xi32>
    %380 = vector.multi_reduction <minsi>, %379, %cst_97 [1, 2] : vector<1x1x256xi32> to vector<1xi32>
    %381 = vector.shape_cast %380 : vector<1xi32> to vector<1x1x1xi32>
    %382 = vector.extract %381[0, 0, 0] : i32 from vector<1x1x1xi32>
    %c7_i32_98 = arith.constant 7 : i32
    %383 = vector.broadcast %c7_i32_98 : i32 to vector<10x1xi32>
    %384 = arith.cmpi eq, %18, %383 : vector<10x1xi32>
    %385 = vector.broadcast %382 : i32 to vector<10x1xi32>
    %386 = arith.select %384, %385, %366 : vector<10x1xi1>, vector<10x1xi32>
    %387 = vector.broadcast %382 : i32 to vector<1x256xi32>
    %388 = arith.cmpi eq, %17, %387 : vector<1x256xi32>
    %cst_99 = arith.constant 0xFF800000 : f32
    %389 = vector.broadcast %cst_99 : f32 to vector<1x256xf32>
    %390 = arith.select %388, %389, %370 : vector<1x256xi1>, vector<1x256xf32>
    %391 = vector.shape_cast %390 : vector<1x256xf32> to vector<1x1x256xf32>
    %cst_100 = arith.constant dense<0xFF800000> : vector<1xf32>
    %392 = vector.multi_reduction <maximumf>, %391, %cst_100 [1, 2] : vector<1x1x256xf32> to vector<1xf32>
    %393 = vector.shape_cast %392 : vector<1xf32> to vector<1x1x1xf32>
    %394 = vector.extract %393[0, 0, 0] : f32 from vector<1x1x1xf32>
    %395 = vector.broadcast %394 : f32 to vector<1x256xf32>
    %396 = arith.cmpf oeq, %390, %395 : vector<1x256xf32>
    %c256_i32_101 = arith.constant 256 : i32
    %397 = vector.broadcast %c256_i32_101 : i32 to vector<1x256xi32>
    %398 = arith.select %396, %17, %397 : vector<1x256xi1>, vector<1x256xi32>
    %399 = vector.shape_cast %398 : vector<1x256xi32> to vector<1x1x256xi32>
    %cst_102 = arith.constant dense<2147483647> : vector<1xi32>
    %400 = vector.multi_reduction <minsi>, %399, %cst_102 [1, 2] : vector<1x1x256xi32> to vector<1xi32>
    %401 = vector.shape_cast %400 : vector<1xi32> to vector<1x1x1xi32>
    %402 = vector.extract %401[0, 0, 0] : i32 from vector<1x1x1xi32>
    %c8_i32_103 = arith.constant 8 : i32
    %403 = vector.broadcast %c8_i32_103 : i32 to vector<10x1xi32>
    %404 = arith.cmpi eq, %18, %403 : vector<10x1xi32>
    %405 = vector.broadcast %402 : i32 to vector<10x1xi32>
    %406 = arith.select %404, %405, %386 : vector<10x1xi1>, vector<10x1xi32>
    %407 = vector.broadcast %402 : i32 to vector<1x256xi32>
    %408 = arith.cmpi eq, %17, %407 : vector<1x256xi32>
    %cst_104 = arith.constant 0xFF800000 : f32
    %409 = vector.broadcast %cst_104 : f32 to vector<1x256xf32>
    %410 = arith.select %408, %409, %390 : vector<1x256xi1>, vector<1x256xf32>
    %411 = vector.shape_cast %410 : vector<1x256xf32> to vector<1x1x256xf32>
    %cst_105 = arith.constant dense<0xFF800000> : vector<1xf32>
    %412 = vector.multi_reduction <maximumf>, %411, %cst_105 [1, 2] : vector<1x1x256xf32> to vector<1xf32>
    %413 = vector.shape_cast %412 : vector<1xf32> to vector<1x1x1xf32>
    %414 = vector.extract %413[0, 0, 0] : f32 from vector<1x1x1xf32>
    %415 = vector.broadcast %414 : f32 to vector<1x256xf32>
    %416 = arith.cmpf oeq, %410, %415 : vector<1x256xf32>
    %c256_i32_106 = arith.constant 256 : i32
    %417 = vector.broadcast %c256_i32_106 : i32 to vector<1x256xi32>
    %418 = arith.select %416, %17, %417 : vector<1x256xi1>, vector<1x256xi32>
    %419 = vector.shape_cast %418 : vector<1x256xi32> to vector<1x1x256xi32>
    %cst_107 = arith.constant dense<2147483647> : vector<1xi32>
    %420 = vector.multi_reduction <minsi>, %419, %cst_107 [1, 2] : vector<1x1x256xi32> to vector<1xi32>
    %421 = vector.shape_cast %420 : vector<1xi32> to vector<1x1x1xi32>
    %422 = vector.extract %421[0, 0, 0] : i32 from vector<1x1x1xi32>
    %c9_i32_108 = arith.constant 9 : i32
    %423 = vector.broadcast %c9_i32_108 : i32 to vector<10x1xi32>
    %424 = arith.cmpi eq, %18, %423 : vector<10x1xi32>
    %425 = vector.broadcast %422 : i32 to vector<10x1xi32>
    %426 = arith.select %424, %425, %406 : vector<10x1xi1>, vector<10x1xi32>
    %427 = vector.broadcast %426 : vector<10x1xi32> to vector<10x256xi32>
    %428 = arith.cmpi eq, %19, %427 : vector<10x256xi32>
    %429 = arith.extui %428 : vector<10x256xi1> to vector<10x256xi32>
    %430 = arith.sitofp %429 : vector<10x256xi32> to vector<10x256xf32>
    %cst_109 = arith.constant dense<0.000000e+00> : vector<10x40xf32>
    %431 = tpu.matmul %430, %229, %cst_109 {dimension_numbers = #tpu.dot_dimension_numbers<[1], [0], [0], [1], [0, 0, 1, 1], [], []>} : vector<10x256xf32>, vector<256x40xf32>, vector<10x40xf32> -> vector<10x40xf32>
    %432 = vector.extract_strided_slice %431 {offsets = [0, 32], sizes = [10, 8], strides = [1, 1]} : vector<10x40xf32> to vector<10x8xf32>
    %c1 = arith.constant 1 : index
    %c0_110 = arith.constant 0 : index
    %c0_111 = arith.constant 0 : index
    %433 = vector.load %arg7[%c1, %c0_110, %c0_111] : memref<2x10x8xf32, #tpu.memory_space<vmem>>, vector<1x10x8xf32>
    %434 = vector.shape_cast %433 : vector<1x10x8xf32> to vector<10x8xf32>
    %435 = vector.shape_cast %432 : vector<10x8xf32> to vector<1x10x8xf32>
    tpu.vector_store %arg7[%c1, %c0_110, %c0_111], %435 {strides = array<i32>} : memref<2x10x8xf32, #tpu.memory_space<vmem>>, vector<1x10x8xf32>,
    return
  }
}

</mosaic_0001>

<bundles_post_ra>
// kernel: feature_extractor_forward.1
= control target key start
LH: loop header
LB: loop body
LE: loop exit
PB: predicated region body
PF: predicated region fallthrough
CT: control target
= control target key end

     0   :  { %s3727_s0 = inlined_call_operand.vmem [shape: f32[512,4], index: 0, kind: input, shape index: {}]   ;;  %s3728_s1 = inlined_call_operand.vmem [shape: f32[4,40], index: 1, kind: input, shape index: {}]   ;;  %s3729_s2 = inlined_call_operand.vmem [shape: f32[1,40], index: 2, kind: input, shape index: {}]   ;;  %s3730_s3 = inlined_call_operand.vmem [shape: f32[1,40], index: 3, kind: input, shape index: {}]   ;;  %s3731_s4 = inlined_call_operand.<no memory space> [shape: f32[1,1], index: 4, kind: input, shape index: {}]   ;;  %s3732_s5 = inlined_call_operand.vmem [shape: f32[2,512], index: 5, kind: input, shape index: {}]   ;;  %s3733_s6 = inlined_call_operand.hbm [shape: f32[2,32], index: 6, kind: output, shape index: {0}]   ;;  %s3734_s7 = inlined_call_operand.vmem [shape: f32[2,10,8], index: 7, kind: output, shape index: {1}]  }
   0x1   :  { %v13_v0 = vstv %s3731_s4 }
   0x2   :  { %14 = vst [vmem:[#allocation2] sm:$0x1] %v13_v0 }
   0x3   :  { %v92_v1 = vld [vmem:[%s3728_s1] sm:$0xf]  ;;  %vm290_vm0 = vcmask 1043456   ;;  %vm97_vm1 = vcmask 31744  }
   0x4   :  { %v28_v2 = vld [vmem:[%s3727_s0] sm:$0xff]  ;;  %2162 = vmatpush.msk.msra.mxu0 %vm290_vm0, %v92_v1  ;;  %2313 = vmatpush.msk.msra.mxu2 %vm290_vm0, %v92_v1 }
   0x5   :  { %2163 = vmatmul.msk.f32.vlgmr.msra.gmra.mxu0 %vm97_vm1, %v28_v2  ;;  %2314 = vmatpush.msk.msra.mxu3 %vm290_vm0, %v92_v1 }
   0x6   :  { %15 = vsyncpa [#allocation4], 0  ;;  %v29_v3 = vld [vmem:[%s3727_s0 + $0x8] sm:$0xff]  ;;  %v30_v4 = vld [vmem:[%s3727_s0 + $0x10] sm:$0xff]  ;;  %vm668_vm2 = vcmask 326656   ;;  %vm658_vm3 = vcmask 254976  }
   0x7   :  { %v31_v5 = vld [vmem:[%s3727_s0 + $0x18] sm:$0xff]  ;;  %v32_v6 = vld [vmem:[%s3727_s0 + $0x20] sm:$0xff]  ;;  %v33_v7 = vld [vmem:[%s3727_s0 + $0x28] sm:$0xff]  ;;  %vm950_vm4 = vcmask 1040384  }
   0x8   :  { %v34_v8 = vld [vmem:[%s3727_s0 + $0x30] sm:$0xff]  ;;  %v35_v9 = vld [vmem:[%s3727_s0 + $0x38] sm:$0xff]  ;;  %v36_v10 = vld [vmem:[%s3727_s0 + $0x40] sm:$0xff] }
   0x9   :  { %v37_v11 = vld [vmem:[%s3727_s0 + $0x48] sm:$0xff]  ;;  %v38_v13 = vld [vmem:[%s3727_s0 + $0x50] sm:$0xff]  ;;  %v39_v15 = vld [vmem:[%s3727_s0 + $0x58] sm:$0xff] }
   0xa   :  { %v61_v12 = vld [vmem:[%s3727_s0 + $0x108] sm:$0xff]  ;;  %v62_v14 = vld [vmem:[%s3727_s0 + $0x110] sm:$0xff]  ;;  %v63_v16 = vld [vmem:[%s3727_s0 + $0x118] sm:$0xff] }
   0xb   :  { %2196 = vmatmul.msk.f32.vlgmr.msra.gmra.mxu2 %vm97_vm1, %v61_v12  ;;  %v40_v17 = vld [vmem:[%s3727_s0 + $0x60] sm:$0xff]  ;;  %v41_v20 = vld [vmem:[%s3727_s0 + $0x68] sm:$0xff]  ;;  %v42_v23 = vld [vmem:[%s3727_s0 + $0x70] sm:$0xff] }
   0xc   :  { %v76_v18 = vld [vmem:[%s3727_s0 + $0x180] sm:$0xff]  ;;  %v77_v21 = vld [vmem:[%s3727_s0 + $0x188] sm:$0xff]  ;;  %v78_v24 = vld [vmem:[%s3727_s0 + $0x190] sm:$0xff] }
   0xd   :  { %2164 = vmatmul.msk.f32.gmra.mxu0 %vm97_vm1, %v29_v3  ;;  %v64_v19 = vld [vmem:[%s3727_s0 + $0x120] sm:$0xff]  ;;  %2211 = vmatmul.msk.f32.vlgmr.msra.gmra.mxu3 %vm97_vm1, %v76_v18  ;;  %v65_v22 = vld [vmem:[%s3727_s0 + $0x128] sm:$0xff]  ;;  %v66_v25 = vld [vmem:[%s3727_s0 + $0x130] sm:$0xff] }
   0xe   :  { %v43_v26 = vld [vmem:[%s3727_s0 + $0x78] sm:$0xff]  ;;  %v44_v30 = vld [vmem:[%s3727_s0 + $0x80] sm:$0xff]  ;;  %v45_v34 = vld [vmem:[%s3727_s0 + $0x88] sm:$0xff] }
   0xf   :  { %v79_v27 = vld [vmem:[%s3727_s0 + $0x198] sm:$0xff]  ;;  %v80_v31 = vld [vmem:[%s3727_s0 + $0x1a0] sm:$0xff]  ;;  %v81_v35 = vld [vmem:[%s3727_s0 + $0x1a8] sm:$0xff] }
  0x10   :  { %v67_v28 = vld [vmem:[%s3727_s0 + $0x138] sm:$0xff]  ;;  %v68_v32 = vld [vmem:[%s3727_s0 + $0x140] sm:$0xff]  ;;  %v69_v36 = vld [vmem:[%s3727_s0 + $0x148] sm:$0xff] }
  0x11   :  { %v46_v38 = vld [vmem:[%s3727_s0 + $0x90] sm:$0xff]  ;;  %v47_v42 = vld [vmem:[%s3727_s0 + $0x98] sm:$0xff]  ;;  %v48_v46 = vld [vmem:[%s3727_s0 + $0xa0] sm:$0xff] }
  0x12   :  { %v82_v39 = vld [vmem:[%s3727_s0 + $0x1b0] sm:$0xff]  ;;  %v83_v43 = vld [vmem:[%s3727_s0 + $0x1b8] sm:$0xff]  ;;  %v84_v47 = vld [vmem:[%s3727_s0 + $0x1c0] sm:$0xff] }
  0x13   :  { %2197 = vmatmul.msk.f32.gmra.mxu2 %vm97_vm1, %v62_v14  ;;  %v70_v40 = vld [vmem:[%s3727_s0 + $0x150] sm:$0xff]  ;;  %v71_v44 = vld [vmem:[%s3727_s0 + $0x158] sm:$0xff]  ;;  %v72_v48 = vld [vmem:[%s3727_s0 + $0x160] sm:$0xff] }
  0x14   :  { %v49_v50 = vld [vmem:[%s3727_s0 + $0xa8] sm:$0xff]  ;;  %v50_v54 = vld [vmem:[%s3727_s0 + $0xb0] sm:$0xff]  ;;  %v51_v58 = vld [vmem:[%s3727_s0 + $0xb8] sm:$0xff] }
  0x15   :  { %2165 = vmatmul.msk.f32.gmra.mxu0 %vm97_vm1, %v30_v4  ;;  %2212 = vmatmul.msk.f32.gmra.mxu3 %vm97_vm1, %v77_v21  ;;  %v85_v51 = vld [vmem:[%s3727_s0 + $0x1c8] sm:$0xff]  ;;  %v86_v55 = vld [vmem:[%s3727_s0 + $0x1d0] sm:$0xff]  ;;  %v87_v59 = vld [vmem:[%s3727_s0 + $0x1d8] sm:$0xff] }
  0x16   :  { %v73_v52 = vld [vmem:[%s3727_s0 + $0x168] sm:$0xff]  ;;  %v74_v56 = vld [vmem:[%s3727_s0 + $0x170] sm:$0xff]  ;;  %v75_v60 = vld [vmem:[%s3727_s0 + $0x178] sm:$0xff] }
  0x17   :  { %v52_v62 = vld [vmem:[%s3727_s0 + $0xc0] sm:$0xff]  ;;  %v53_v1 = vld [vmem:[%s3727_s0 + $0xc8] sm:$0xff]  ;;  %v54_v4 = vld [vmem:[%s3727_s0 + $0xd0] sm:$0xff] }
  0x18   :  { %v88_v63 = vld [vmem:[%s3727_s0 + $0x1e0] sm:$0xff]  ;;  %v89_v2 = vld [vmem:[%s3727_s0 + $0x1e8] sm:$0xff] }
  0x19   :  { %v56_v12 = vld [vmem:[%s3727_s0 + $0xe0] sm:$0xff] }
  0x1b   :  { %2198 = vmatmul.msk.f32.gmra.mxu2 %vm97_vm1, %v63_v16 }
  0x1d   :  { %2166 = vmatmul.msk.f32.gmra.mxu0 %vm97_vm1, %v31_v5  ;;  %2213 = vmatmul.msk.f32.gmra.mxu3 %vm97_vm1, %v78_v24  ;;  %v59_v24 = vld [vmem:[%s3727_s0 + $0xf8] sm:$0xff] }
  0x23   :  { %2199 = vmatmul.msk.f32.gmra.mxu2 %vm97_vm1, %v64_v19  ;;  %v58_v19 = vld [vmem:[%s3727_s0 + $0xf0] sm:$0xff] }
  0x25   :  { %2167 = vmatmul.msk.f32.gmra.mxu0 %vm97_vm1, %v32_v6  ;;  %2214 = vmatmul.msk.f32.gmra.mxu3 %vm97_vm1, %v79_v27  ;;  %v90_v6 = vld [vmem:[%s3727_s0 + $0x1f0] sm:$0xff] }
  0x2b   :  { %2200 = vmatmul.msk.f32.gmra.mxu2 %vm97_vm1, %v65_v22  ;;  %v2760_v22 = vld [vmem:[%s3729_s2] ss:$0 sm:$0xff] }
  0x2d   :  { %2168 = vmatmul.msk.f32.gmra.mxu0 %vm97_vm1, %v33_v7  ;;  %2215 = vmatmul.msk.f32.gmra.mxu3 %vm97_vm1, %v80_v31 }
  0x33   :  { %2201 = vmatmul.msk.f32.gmra.mxu2 %vm97_vm1, %v66_v25 }
  0x35   :  { %2169 = vmatmul.msk.f32.gmra.mxu0 %vm97_vm1, %v34_v8  ;;  %2216 = vmatmul.msk.f32.gmra.mxu3 %vm97_vm1, %v81_v35  ;;  %v55_v8 = vld [vmem:[%s3727_s0 + $0xd8] sm:$0xff] }
  0x3b   :  { %2202 = vmatmul.msk.f32.gmra.mxu2 %vm97_vm1, %v67_v28 }
  0x3d   :  { %2170 = vmatmul.msk.f32.gmra.mxu0 %vm97_vm1, %v35_v9  ;;  %2217 = vmatmul.msk.f32.gmra.mxu3 %vm97_vm1, %v82_v39  ;;  %v60_v39 = vld [vmem:[%s3727_s0 + $0x100] sm:$0xff] }
  0x43   :  { %2203 = vmatmul.msk.f32.gmra.mxu2 %vm97_vm1, %v68_v32 }
  0x45   :  { %2171 = vmatmul.msk.f32.gmra.mxu0 %vm97_vm1, %v36_v10  ;;  %2218 = vmatmul.msk.f32.gmra.mxu3 %vm97_vm1, %v83_v43  ;;  %v91_v10 = vld [vmem:[%s3727_s0 + $0x1f8] sm:$0xff] }
  0x4b   :  { %2204 = vmatmul.msk.f32.gmra.mxu2 %vm97_vm1, %v69_v36 }
  0x4d   :  { %2172 = vmatmul.msk.f32.gmra.mxu0 %vm97_vm1, %v37_v11  ;;  %2219 = vmatmul.msk.f32.gmra.mxu3 %vm97_vm1, %v84_v47 }
  0x53   :  { %2205 = vmatmul.msk.f32.gmra.mxu2 %vm97_vm1, %v70_v40 }
  0x55   :  { %2173 = vmatmul.msk.f32.gmra.mxu0 %vm97_vm1, %v38_v13  ;;  %2220 = vmatmul.msk.f32.gmra.mxu3 %vm97_vm1, %v85_v51 }
  0x5b   :  { %2206 = vmatmul.msk.f32.gmra.mxu2 %vm97_vm1, %v71_v44 }
  0x5d   :  { %2174 = vmatmul.msk.f32.gmra.mxu0 %vm97_vm1, %v39_v15  ;;  %2221 = vmatmul.msk.f32.gmra.mxu3 %vm97_vm1, %v86_v55  ;;  %v57_v15 = vld [vmem:[%s3727_s0 + $0xe8] sm:$0xff] }
  0x63   :  { %2207 = vmatmul.msk.f32.gmra.mxu2 %vm97_vm1, %v72_v48 }
  0x65   :  { %2175 = vmatmul.msk.f32.gmra.mxu0 %vm97_vm1, %v40_v17  ;;  %2222 = vmatmul.msk.f32.gmra.mxu3 %vm97_vm1, %v87_v59 }
  0x6b   :  { %2208 = vmatmul.msk.f32.gmra.mxu2 %vm97_vm1, %v73_v52 }
  0x6d   :  { %2176 = vmatmul.msk.f32.gmra.mxu0 %vm97_vm1, %v41_v20  ;;  %2223 = vmatmul.msk.f32.gmra.mxu3 %vm97_vm1, %v88_v63 }
  0x73   :  { %2209 = vmatmul.msk.f32.gmra.mxu2 %vm97_vm1, %v74_v56 }
  0x75   :  { %2177 = vmatmul.msk.f32.gmra.mxu0 %vm97_vm1, %v42_v23  ;;  %2224 = vmatmul.msk.f32.gmra.mxu3 %vm97_vm1, %v89_v2 }
  0x7b   :  { %2210 = vmatmul.msk.f32.gmra.mxu2 %vm97_vm1, %v75_v60 }
  0x7d   :  { %2178 = vmatmul.msk.f32.gmra.mxu0 %vm97_vm1, %v43_v26  ;;  %2225 = vmatmul.msk.f32.gmra.mxu3 %vm97_vm1, %v90_v6 }
  0x82   :  { %v2585_v29 = vpop.f32.mrf.mxu0 }
  0x85   :  { %2179 = vmatmul.msk.f32.gmra.mxu0 %vm97_vm1, %v44_v30  ;;  %2226 = vmatmul.msk.f32.gmra.mxu3 %vm97_vm1, %v91_v10 }
  0x8a   :  { %v2599_v33 = vpop.f32.mrf.mxu0 }
  0x8d   :  { %2180 = vmatmul.msk.f32.gmra.mxu0 %vm97_vm1, %v45_v34 }
  0x8e   :  { %v2718_v5 = vpop.f32.mrf.mxu2 }
  0x90   :  { %v2744_v16 = vpop.f32.mrf.mxu3 }
  0x92   :  { %v2613_v37 = vpop.f32.mrf.mxu0 }
  0x95   :  { %2181 = vmatmul.msk.f32.gmra.mxu0 %vm97_vm1, %v46_v38 }
  0x96   :  { %v2728_v9 = vpop.f32.mrf.mxu2 }
  0x98   :  { %v2752_v20 = vpop.f32.mrf.mxu3 }
  0x9a   :  { %v2627_v41 = vpop.f32.mrf.mxu0 }
  0x9d   :  { %2182 = vmatmul.msk.f32.gmra.mxu0 %vm97_vm1, %v47_v42 }
  0x9e   :  { %v2738_v13 = vpop.f32.mrf.mxu2 }
  0xa0   :  { %v2771_v27 = vpop.f32.mrf.mxu3 }
  0xa2   :  { %v2641_v45 = vpop.f32.mrf.mxu0 }
  0xa3   :  { %v2846_v60 = vadd.f32 %v2760_v22, %v2641_v45  ;;  %v2864_v45 = vadd.f32 %v2760_v22, %v2613_v37 }
  0xa5   :  { %2183 = vmatmul.msk.f32.gmra.mxu0 %vm97_vm1, %v48_v46  ;;  %3792 = vst [vmem:[#allocation6_spill] sm:$0xff] %v2864_v45  ;;  %v3737_v37 = vmax.f32 %v2864_v45, 0.0 }
  0xa6   :  { %v2746_v17 = vpop.f32.mrf.mxu2 }
  0xa8   :  { %v2812_v47 = vpop.f32.mrf.mxu3 }
  0xaa   :  { %v2655_v49 = vpop.f32.mrf.mxu0 }
  0xad   :  { %2184 = vmatmul.msk.f32.gmra.mxu0 %vm97_vm1, %v49_v50 }
  0xae   :  { %v2754_v21 = vpop.f32.mrf.mxu2 }
  0xb2   :  { %v2669_v53 = vpop.f32.mrf.mxu0 }
  0xb3   :  { %v2832_v55 = vadd.f32 %v2760_v22, %v2669_v53 }
  0xb5   :  { %2185 = vmatmul.msk.f32.gmra.mxu0 %vm97_vm1, %v50_v54  ;;  %v3741_v53 = vmax.f32 %v2832_v55, 0.0 }
  0xb6   :  { %v2773_v28 = vpop.f32.mrf.mxu2 }
  0xba   :  { %v2683_v57 = vpop.f32.mrf.mxu0 }
  0xbb   :  { %v2823_v51 = vadd.f32 %v2760_v22, %v2683_v57  ;;  %v2839_v57 = vadd.f32 %v2760_v22, %v2655_v49  ;;  %v2855_v49 = vadd.f32 %v2760_v22, %v2627_v41  ;;  %v2871_v41 = vadd.f32 %v2760_v22, %v2599_v33 }
  0xbd   :  { %2186 = vmatmul.msk.f32.gmra.mxu0 %vm97_vm1, %v51_v58  ;;  %v3742_v59 = vmax.f32 %v2823_v51, 0.0  ;;  %3793 = vst [vmem:[#allocation7_spill] sm:$0xff] %v2871_v41  ;;  %v3738_v2 = vmax.f32 %v2855_v49, 0.0  ;;  %v3735_v33 = vmax.f32 %v2871_v41, 0.0 }
  0xbe   :  { %v2803_v43 = vpop.f32.mrf.mxu2 }
  0xc2   :  { %v2697_v61 = vpop.f32.mrf.mxu0 }
  0xc3   :  { %v2816_v48 = vadd.f32 %v2760_v22, %v2697_v61  ;;  %v2851_v61 = vpop.f32.mrf.mxu3 }
  0xc5   :  { %2187 = vmatmul.msk.f32.gmra.mxu0 %vm97_vm1, %v52_v62  ;;  %v3743_v56 = vmax.f32 %v2816_v48, 0.0  ;;  %v3740_v62 = vmax.f32 %v2839_v57, 0.0 }
  0xc6   :  { %v431_v58 = vpop.f32.mrf.mxu2 }
  0xca   :  { %v338_v0 = vpop.f32.mrf.mxu0 }
  0xcb   :  { %v2806_v44 = vadd.f32 %v2760_v22, %v338_v0  ;;  %v3739_v0 = vmax.f32 %v2846_v60, 0.0 }
  0xcd   :  { %2188 = vmatmul.msk.f32.gmra.mxu0 %vm97_vm1, %v53_v1  ;;  %v3744_v52 = vmax.f32 %v2806_v44, 0.0 }
  0xce   :  { %v434_v1 = vpop.f32.mrf.mxu2 }
  0xd2   :  { %v341_v3 = vpop.f32.mrf.mxu0 }
  0xd3   :  { %v2798_v40 = vadd.f32 %v2760_v22, %v341_v3  ;;  %v2878_v3 = vadd.f32 %v2760_v22, %v2585_v29 }
  0xd5   :  { %2189 = vmatmul.msk.f32.gmra.mxu0 %vm97_vm1, %v54_v4  ;;  %v3745_v50 = vmax.f32 %v2798_v40, 0.0  ;;  %3794 = vst [vmem:[#allocation8_spill] sm:$0xff] %v2878_v3  ;;  %v2886_v4 = vpop.f32.mrf.mxu3  ;;  %v3736_v29 = vmax.f32 %v2878_v3, 0.0 }
  0xda   :  { %v344_v7 = vpop.f32.mrf.mxu0 }
  0xdb   :  { %v2787_v35 = vadd.f32 %v2760_v22, %v344_v7  ;;  %v437_v7 = vpop.f32.mrf.mxu2 }
  0xdd   :  { %2190 = vmatmul.msk.f32.gmra.mxu0 %vm97_vm1, %v55_v8  ;;  %v3746_v46 = vmax.f32 %v2787_v35, 0.0  ;;  %v2897_v10 = vpop.f32.mrf.mxu3 }
  0xe2   :  { %v347_v11 = vpop.f32.mrf.mxu0 }
  0xe3   :  { %v2781_v32 = vadd.f32 %v2760_v22, %v347_v11  ;;  %v440_v11 = vpop.f32.mrf.mxu2 }
  0xe5   :  { %2191 = vmatmul.msk.f32.gmra.mxu0 %vm97_vm1, %v56_v12  ;;  %v3747_v42 = vmax.f32 %v2781_v32, 0.0 }
  0xea   :  { %v350_v14 = vpop.f32.mrf.mxu0 }
  0xeb   :  { %v2776_v30 = vadd.f32 %v2760_v22, %v350_v14  ;;  %v443_v14 = vpop.f32.mrf.mxu2 }
  0xed   :  { %2192 = vmatmul.msk.f32.gmra.mxu0 %vm97_vm1, %v57_v15  ;;  %v3754_v36 = vmax.f32 %v2776_v30, 0.0  ;;  %v2901_v15 = vpop.f32.mrf.mxu3 }
  0xf2   :  { %v353_v18 = vpop.f32.mrf.mxu0 }
  0xf3   :  { %v2766_v25 = vadd.f32 %v2760_v22, %v353_v18 }
  0xf5   :  { %2193 = vmatmul.msk.f32.gmra.mxu0 %vm97_vm1, %v58_v19  ;;  %v3760_v34 = vmax.f32 %v2766_v25, 0.0  ;;  %v446_v19 = vpop.f32.mrf.mxu2 }
  0xfa   :  { %v356_v23 = vpop.f32.mrf.mxu0 }
  0xfb   :  { %v2769_v26 = vadd.f32 %v2760_v22, %v356_v23  ;;  %v2905_v23 = vpop.f32.mrf.mxu3 }
  0xfd   :  { %2194 = vmatmul.msk.f32.gmra.mxu0 %vm97_vm1, %v59_v24  ;;  %v3762_v31 = vmax.f32 %v2769_v26, 0.0 }
  0xff   :  { %578 = vmatpush.msra.mxu1 %v3762_v31 }
 0x101   :  { %579 = vmatpush.msra.mxu1 %v3760_v34 }
 0x102   :  { %v2792_v38 = vpop.f32.mrf.mxu0 }
 0x103   :  { %580 = vmatpush.msra.mxu1 %v3754_v36 }
 0x105   :  { %2195 = vmatmul.msk.f32.gmra.mxu0 %vm97_vm1, %v60_v39  ;;  %581 = vmatpush.msra.mxu1 %v3747_v42  ;;  %v449_v39 = vpop.f32.mrf.mxu2  ;;  %v2950_v42 = vadd.f32 %v2760_v22, %v434_v1 }
 0x107   :  { %582 = vmatpush.msra.mxu1 %v3746_v46  ;;  %v2947_v46 = vadd.f32 %v2760_v22, %v431_v58  ;;  %v3755_v58 = vmax.f32 %v2950_v42, 0.0 }
 0x109   :  { %583 = vmatpush.msra.mxu1 %v3745_v50  ;;  %v2941_v50 = vadd.f32 %v2760_v22, %v437_v7  ;;  %v3756_v1 = vmax.f32 %v2947_v46, 0.0 }
 0x10a   :  { %v2828_v54 = vpop.f32.mrf.mxu0 }
 0x10b   :  { %584 = vmatpush.msra.mxu1 %v3744_v52  ;;  %v3753_v7 = vmax.f32 %v2941_v50, 0.0 }
 0x10d   :  { %585 = vmatpush.msra.mxu1 %v3743_v56  ;;  %v2929_v56 = vadd.f32 %v2760_v22, %v440_v11 }
 0x10f   :  { %586 = vmatpush.msra.mxu1 %v3742_v59  ;;  %v2924_v59 = vadd.f32 %v2760_v22, %v446_v19  ;;  %v3752_v11 = vmax.f32 %v2929_v56, 0.0 }
 0x111   :  { %587 = vmatpush.msra.mxu1 %v3741_v53  ;;  %v2921_v53 = vadd.f32 %v2760_v22, %v443_v14  ;;  %v3749_v14 = vmax.f32 %v2924_v59, 0.0 }
 0x112   :  { %v2860_v63 = vpop.f32.mrf.mxu0 }
 0x113   :  { %588 = vmatpush.msra.mxu1 %v3740_v62  ;;  %v3750_v19 = vmax.f32 %v2921_v53, 0.0 }
 0x115   :  { %589 = vmatpush.msra.mxu1 %v3739_v0  ;;  %v2917_v0 = vadd.f32 %v2760_v22, %v449_v39 }
 0x117   :  { %590 = vmatpush.msra.mxu1 %v3738_v2 }
 0x119   :  { %591 = vmatpush.msra.mxu1 %v3737_v37  ;;  %v452_v37 = vpop.f32.mrf.mxu2 }
 0x11a   :  { %v2888_v6 = vpop.f32.mrf.mxu0  ;;  %v2914_v2 = vadd.f32 %v2760_v22, %v452_v37  ;;  %v3748_v37 = vmax.f32 %v2917_v0, 0.0 }
 0x11b   :  { %592 = vmatpush.msra.mxu1 %v3735_v33  ;;  %v2909_v33 = vpop.f32.mrf.mxu3 }
 0x11c   :  { %v3751_v62 = vmax.f32 %v2914_v2, 0.0 }
 0x11d   :  { %593 = vmatpush.msra.mxu1 %v3736_v29 }
 0x11f   :  { %618 = vmatpush.msrb.mxu1 %v3751_v62 }
 0x121   :  { %619 = vmatpush.msrb.mxu1 %v3748_v37  ;;  %v2956_v37 = vadd.f32 %v2760_v22, %v2803_v43 }
 0x122   :  { %v2895_v8 = vpop.f32.mrf.mxu0 }
 0x123   :  { %v2934_v39 = vpop.f32.mrf.mxu3  ;;  %620 = vmatpush.msrb.mxu1 %v3749_v14  ;;  %v3757_v43 = vmax.f32 %v2956_v37, 0.0 }
 0x125   :  { %621 = vmatpush.msrb.mxu1 %v3750_v19  ;;  %v2967_v19 = vadd.f32 %v2760_v22, %v2773_v28 }
 0x127   :  { %622 = vmatpush.msrb.mxu1 %v3752_v11  ;;  %v2976_v11 = vadd.f32 %v2760_v22, %v2754_v21  ;;  %v3758_v28 = vmax.f32 %v2967_v19, 0.0 }
 0x129   :  { %623 = vmatpush.msrb.mxu1 %v3753_v7  ;;  %v2982_v7 = vadd.f32 %v2760_v22, %v2746_v17  ;;  %v3759_v21 = vmax.f32 %v2976_v11, 0.0 }
 0x12a   :  { %v2899_v12 = vpop.f32.mrf.mxu0 }
 0x12b   :  { %v2969_v62 = vpop.f32.mrf.mxu3  ;;  %624 = vmatpush.msrb.mxu1 %v3755_v58  ;;  %3795 = vst [vmem:[#allocation9_spill] sm:$0xff] %v2982_v7  ;;  %v2989_v58 = vadd.f32 %v2760_v22, %v2738_v13  ;;  %v3761_v17 = vmax.f32 %v2982_v7, 0.0 }
 0x12d   :  { %625 = vmatpush.msrb.mxu1 %v3756_v1  ;;  %3796 = vst [vmem:[#allocation10_spill] sm:$0xff] %v2989_v58  ;;  %v2996_v1 = vadd.f32 %v2760_v22, %v2728_v9  ;;  %v567_v9 = vld [vmem:[%s3732_s5] sm:$0xff] }
 0x12e   :  { %569 = vst [vmem:[#allocation1] ss:$4 sm:$0xff] %v567_v9 }
 0x12f   :  { %626 = vmatpush.msrb.mxu1 %v3757_v43  ;;  %3797 = vst [vmem:[#allocation11_spill] sm:$0xff] %v2996_v1  ;;  %v3003_v43 = vadd.f32 %v2760_v22, %v2718_v5 }
 0x131   :  { %627 = vmatpush.msrb.mxu1 %v3758_v28  ;;  %3798 = vst [vmem:[#allocation12_spill] sm:$0xff] %v3003_v43  ;;  %v3771_v28 = vmax.f32 %v2989_v58, 0.0  ;;  %v3775_v5 = vmax.f32 %v3003_v43, 0.0 }
 0x132   :  { %v2903_v18 = vpop.f32.mrf.mxu0 }
 0x133   :  { %628 = vmatpush.msrb.mxu1 %v3759_v21  ;;  %v491_v13 = vpop.f32.mrf.mxu3  ;;  %v3772_v21 = vmax.f32 %v2996_v1, 0.0 }
 0x135   :  { %629 = vmatpush.msrb.mxu1 %v3761_v17  ;;  %v570_v17 = vld.sshfl [vmem:[#allocation1] sm:$0xff pattern:$0x73625140] }
 0x136   :  { %594 = vmatmul.f32.vlgmr.msra.gmra.mxu1 %v570_v17 }
 0x137   :  { %630 = vmatpush.msrb.mxu1 %v3771_v28 }
 0x139   :  { %631 = vmatpush.msrb.mxu1 %v3772_v21 }
 0x13a   :  { %v2907_v24 = vpop.f32.mrf.mxu0 }
 0x13b   :  { %632 = vmatpush.msrb.mxu1 %v3775_v5  ;;  %v494_v31 = vpop.f32.mrf.mxu3 }
 0x142   :  { %v2911_v29 = vpop.f32.mrf.mxu0 }
 0x143   :  { %v497_v7 = vpop.f32.mrf.mxu3 }
 0x14a   :  { %v2932_v52 = vpop.f32.mrf.mxu0 }
 0x14b   :  { %v500_v5 = vpop.f32.mrf.mxu3 }
 0x152   :  { %v389_v14 = vpop.f32.mrf.mxu0 }
 0x15a   :  { %v392_v36 = vpop.f32.mrf.mxu0 }
 0x162   :  { %v395_v34 = vpop.f32.mrf.mxu0 }
 0x163   :  { %v3030_v1 = vadd.f32 %v2760_v22, %v395_v34  ;;  %v3045_v34 = vadd.f32 %v2760_v22, %v389_v14 }
 0x165   :  { %3802 = vst [vmem:[#allocation16_spill] sm:$0xff] %v3030_v1 }
 0x166   :  { %3803 = vst [vmem:[#allocation17_spill] sm:$0xff] %v3045_v34 }
 0x16a   :  { %v398_v3 = vpop.f32.mrf.mxu0 }
 0x16b   :  { %v3026_v21 = vadd.f32 %v2760_v22, %v398_v3 }
 0x16d   :  { %3801 = vst [vmem:[#allocation15_spill] sm:$0xff] %v3026_v21  ;;  %v532_v3 = vmax.f32 %v3026_v21, 0.0  ;;  %v3075_v21 = vadd.f32 %v2760_v22, %v2969_v62  ;;  %v3113_v62 = vadd.f32 %v2760_v22, %v2905_v23 }
 0x16f   :  { %v3810_v23 = vmax.f32 %v3075_v21, 0.0 }
 0x172   :  { %v401_v41 = vpop.f32.mrf.mxu0 }
 0x173   :  { %v3020_v28 = vadd.f32 %v2760_v22, %v401_v41  ;;  %v3035_v41 = vadd.f32 %v2760_v22, %v500_v5  ;;  %v531_v5 = vmax.f32 %v3030_v1, 0.0  ;;  %v572_v1 = vld.sshfl [vmem:[#allocation1 + $0x10] sm:$0xff pattern:$0x73625140] }
 0x175   :  { %3799 = vst [vmem:[#allocation13_spill] sm:$0xff] %v3020_v28  ;;  %v533_v17 = vmax.f32 %v3020_v28, 0.0  ;;  %v3063_v28 = vadd.f32 %v2760_v22, %v491_v13 }
 0x17a   :  { %v404_v58 = vpop.f32.mrf.mxu0 }
 0x17b   :  { %v3023_v9 = vadd.f32 %v2760_v22, %v404_v58  ;;  %v3038_v58 = vadd.f32 %v2760_v22, %v392_v36  ;;  %v3053_v36 = vadd.f32 %v2760_v22, %v494_v31  ;;  %v3068_v31 = vadd.f32 %v2760_v22, %v2911_v29 }
 0x17c   :  { %v3083_v29 = vadd.f32 %v2760_v22, %v2907_v24 }
 0x17d   :  { %3800 = vst [vmem:[#allocation14_spill] sm:$0xff] %v3023_v9  ;;  %v534_v43 = vmax.f32 %v3023_v9, 0.0  ;;  %v3042_v9 = vadd.f32 %v2760_v22, %v497_v7  ;;  %v3058_v7 = vadd.f32 %v2760_v22, %v2932_v52  ;;  %v530_v14 = vmax.f32 %v3038_v58, 0.0 }
 0x17e   :  { %v529_v52 = vmax.f32 %v3045_v34, 0.0  ;;  %3805 = vst [vmem:[#allocation18_spill] sm:$0xff] %v3083_v29  ;;  %v3088_v34 = vadd.f32 %v2760_v22, %v2934_v39  ;;  %v527_v24 = vmax.f32 %v3068_v31, 0.0  ;;  %v3807_v39 = vmax.f32 %v3053_v36, 0.0 }
 0x17f   :  { %598 = vmatpush.msrb.mxu2 %v534_v43  ;;  %2244 = vmatpush.xpose.msk.msrb.mxu3 %vm668_vm2, %v534_v43  ;;  %v3806_v13 = vmax.f32 %v3042_v9, 0.0 }
 0x181   :  { %599 = vmatpush.msrb.mxu2 %v533_v17 }
 0x182   :  { %v407_v45 = vpop.f32.mrf.mxu0 }
 0x183   :  { %v3048_v43 = vadd.f32 %v2760_v22, %v407_v45  ;;  %600 = vmatpush.msrb.mxu2 %v532_v3  ;;  %2245 = vmatpush.xpose.msk.msrb.mxu3 %vm668_vm2, %v533_v17  ;;  %v3804_v17 = vmax.f32 %v3035_v41, 0.0 }
 0x185   :  { %601 = vmatpush.msrb.mxu2 %v531_v5  ;;  %v3784_v45 = vmax.f32 %v3048_v43, 0.0 }
 0x187   :  { %602 = vmatpush.msrb.mxu2 %v530_v14  ;;  %633 = vmatpush.msrb.mxu1 %v3784_v45  ;;  %v528_v45 = vmax.f32 %v3058_v7, 0.0 }
 0x188   :  { %2246 = vmatpush.xpose.msk.msrb.mxu3 %vm668_vm2, %v532_v3  ;;  %634 = vmatmul.f32.vlgmr.msrb.gmra.mxu1 %v572_v1  ;;  %v3095_v3 = vadd.f32 %v2760_v22, %v2903_v18  ;;  %v526_v18 = vmax.f32 %v3083_v29, 0.0  ;;  %v3809_v1 = vmax.f32 %v3063_v28, 0.0  ;;  %v3812_v29 = vmax.f32 %v3088_v34, 0.0 }
 0x189   :  { %638 = vmatpush.msra.mxu1 %v3804_v17  ;;  %603 = vmatpush.msrb.mxu2 %v529_v52  ;;  %v3100_v17 = vadd.f32 %v2760_v22, %v2909_v33  ;;  %v3138_v33 = vadd.f32 %v2760_v22, %v2897_v10 }
 0x18b   :  { %639 = vmatpush.msra.mxu1 %v3806_v13  ;;  %604 = vmatpush.msrb.mxu2 %v528_v45  ;;  %v3108_v13 = vadd.f32 %v2760_v22, %v2899_v12  ;;  %v525_v12 = vmax.f32 %v3095_v3, 0.0  ;;  %v3814_v10 = vmax.f32 %v3100_v17, 0.0 }
 0x18c   :  { %2247 = vmatpush.xpose.msk.msrb.mxu3 %vm668_vm2, %v531_v5  ;;  %v3120_v5 = vadd.f32 %v2760_v22, %v2895_v8 }
 0x18d   :  { %640 = vmatpush.msra.mxu1 %v3807_v39  ;;  %3808 = vst [vmem:[#allocation19_spill] sm:$0xff] %v3108_v13  ;;  %605 = vmatpush.msrb.mxu2 %v527_v24  ;;  %v3125_v39 = vadd.f32 %v2760_v22, %v2901_v15  ;;  %v524_v8 = vmax.f32 %v3108_v13, 0.0  ;;  %v3163_v15 = vadd.f32 %v2760_v22, %v2851_v61  ;;  %v3815_v13 = vmax.f32 %v3113_v62, 0.0 }
 0x18f   :  { %641 = vmatpush.msra.mxu1 %v3809_v1  ;;  %606 = vmatpush.msrb.mxu2 %v526_v18  ;;  %v3133_v1 = vadd.f32 %v2760_v22, %v2888_v6  ;;  %v523_v6 = vmax.f32 %v3120_v5, 0.0  ;;  %v3816_v61 = vmax.f32 %v3125_v39, 0.0 }
 0x190   :  { %2248 = vmatpush.xpose.msk.msrb.mxu3 %vm668_vm2, %v530_v14  ;;  %v3145_v14 = vadd.f32 %v2760_v22, %v2860_v63 }
 0x191   :  { %642 = vmatpush.msra.mxu1 %v3810_v23  ;;  %3811 = vst [vmem:[#allocation20_spill] sm:$0xff] %v3133_v1  ;;  %607 = vmatpush.msrb.mxu2 %v525_v12  ;;  %v3150_v23 = vadd.f32 %v2760_v22, %v2886_v4  ;;  %v522_v63 = vmax.f32 %v3133_v1, 0.0  ;;  %v555_v4 = vmax.f32 %v3163_v15, 0.0 }
 0x192   :  { %3813 = vst [vmem:[#allocation21_spill] sm:$0xff] %v3145_v14 }
 0x193   :  { %643 = vmatpush.msra.mxu1 %v3812_v29  ;;  %608 = vmatpush.msrb.mxu2 %v524_v8  ;;  %v3158_v29 = vadd.f32 %v2760_v22, %v2828_v54  ;;  %v521_v54 = vmax.f32 %v3145_v14, 0.0  ;;  %v3790_v1 = vmax.f32 %v3150_v23, 0.0  ;;  %v3817_v14 = vmax.f32 %v3138_v33, 0.0 }
 0x194   :  { %2249 = vmatpush.xpose.msk.msrb.mxu3 %vm668_vm2, %v529_v52  ;;  %v3170_v52 = vadd.f32 %v2760_v22, %v2792_v38  ;;  %v3184_v38 = vadd.f32 %v2760_v22, %v2771_v27  ;;  %v3200_v27 = vadd.f32 %v2760_v22, %v2744_v16  ;;  %v3820_v16 = vmax.f32 %v2766_v25, 0.0 }
 0x195   :  { %644 = vmatpush.msra.mxu1 %v3814_v10  ;;  %609 = vmatpush.msrb.mxu2 %v523_v6  ;;  %v3175_v10 = vadd.f32 %v2760_v22, %v2812_v47 }
 0x196   :  { %v519_v47 = vmax.f32 %v3170_v52, 0.0 }
 0x197   :  { %645 = vmatpush.msra.mxu1 %v3815_v13  ;;  %610 = vmatpush.msrb.mxu2 %v522_v63  ;;  %v520_v13 = vmax.f32 %v3158_v29, 0.0 }
 0x198   :  { %2250 = vmatpush.xpose.msk.msrb.mxu3 %vm668_vm2, %v528_v45  ;;  %v3192_v45 = vadd.f32 %v2760_v22, %v2752_v20  ;;  %v3818_v20 = vmax.f32 %v2769_v26, 0.0  ;;  %v3821_v22 = vmax.f32 %v2776_v30, 0.0 }
 0x199   :  { %646 = vmatpush.msra.mxu1 %v3816_v61  ;;  %611 = vmatpush.msrb.mxu2 %v521_v54 }
 0x19a   :  { %v552_v61 = vmax.f32 %v3192_v45, 0.0 }
 0x19b   :  { %647 = vmatpush.msra.mxu1 %v3817_v14  ;;  %612 = vmatpush.msrb.mxu2 %v520_v13  ;;  %v553_v14 = vmax.f32 %v3184_v38, 0.0 }
 0x19c   :  { %2251 = vmatpush.xpose.msk.msrb.mxu3 %vm668_vm2, %v527_v24  ;;  %v3819_v24 = vmax.f32 %v3175_v10, 0.0 }
 0x19d   :  { %648 = vmatpush.msra.mxu1 %v3790_v1  ;;  %613 = vmatpush.msrb.mxu2 %v519_v47  ;;  %v551_v1 = vmax.f32 %v3200_v27, 0.0 }
 0x19f   :  { %649 = vmatpush.msra.mxu1 %v555_v4  ;;  %2227 = vmatpush.xpose.msk.msra.mxu2 %vm668_vm2, %v3818_v20  ;;  %v3823_v20 = vmax.f32 %v2781_v32, 0.0 }
 0x1a0   :  { %2252 = vmatpush.xpose.msk.msrb.mxu3 %vm668_vm2, %v526_v18  ;;  %v3822_v18 = vmax.f32 %v2914_v2, 0.0 }
 0x1a1   :  { %650 = vmatpush.msra.mxu1 %v3819_v24  ;;  %v3825_v24 = vmax.f32 %v2787_v35, 0.0 }
 0x1a3   :  { %651 = vmatpush.msra.mxu1 %v553_v14  ;;  %2228 = vmatpush.xpose.msk.msra.mxu2 %vm668_vm2, %v3820_v16  ;;  %v3826_v16 = vmax.f32 %v2924_v59, 0.0 }
 0x1a4   :  { %2253 = vmatpush.xpose.msk.msrb.mxu3 %vm668_vm2, %v525_v12  ;;  %v3824_v12 = vmax.f32 %v2917_v0, 0.0 }
 0x1a5   :  { %652 = vmatpush.msra.mxu1 %v552_v61 }
 0x1a7   :  { %653 = vmatpush.msra.mxu1 %v551_v1  ;;  %2229 = vmatpush.xpose.msk.msra.mxu2 %vm668_vm2, %v3821_v22  ;;  %v3828_v22 = vmax.f32 %v2921_v53, 0.0 }
 0x1a8   :  { %2254 = vmatpush.xpose.msk.msrb.mxu3 %vm668_vm2, %v524_v8  ;;  %v3827_v8 = vmax.f32 %v2798_v40, 0.0 }
 0x1a9   :  { %2261 = vmatpush.xpose.msk.msrb.mxu1 %vm668_vm2, %v3822_v18  ;;  %v3829_v18 = vmax.f32 %v2806_v44, 0.0 }
 0x1ab   :  { %2230 = vmatpush.xpose.msk.msra.mxu2 %vm668_vm2, %v3823_v20  ;;  %v3830_v20 = vmax.f32 %v2929_v56, 0.0 }
 0x1ac   :  { %2255 = vmatpush.xpose.msk.msrb.mxu3 %vm668_vm2, %v523_v6  ;;  %v571_v6 = vld.sshfl [vmem:[#allocation1 + $0x8] sm:$0xff pattern:$0x73625140] }
 0x1ad   :  { %2262 = vmatpush.xpose.msk.msrb.mxu1 %vm668_vm2, %v3824_v12  ;;  %614 = vmatmul.f32.vlgmr.msrb.gmra.mxu2 %v571_v6  ;;  %v3832_v12 = vmax.f32 %v2941_v50, 0.0 }
 0x1af   :  { %2231 = vmatpush.xpose.msk.msra.mxu2 %vm668_vm2, %v3825_v24  ;;  %v3833_v24 = vmax.f32 %v2823_v51, 0.0 }
 0x1b0   :  { %2256 = vmatpush.xpose.msk.msrb.mxu3 %vm668_vm2, %v522_v63  ;;  %v3831_v63 = vmax.f32 %v2816_v48, 0.0 }
 0x1b1   :  { %2263 = vmatpush.xpose.msk.msrb.mxu1 %vm668_vm2, %v3826_v16  ;;  %v3834_v16 = vmax.f32 %v2950_v42, 0.0 }
 0x1b3   :  { %2232 = vmatpush.xpose.msk.msra.mxu2 %vm668_vm2, %v3827_v8  ;;  %v2427_v8 = vmov 0  }
 0x1b4   :  { %2257 = vmatpush.xpose.msk.msrb.mxu3 %vm668_vm2, %v521_v54  ;;  %v3269_v54 = vld [vmem:[%s3730_s3] sm:$0x1]  ;;  %2399 = vset.pattern.permute.xlu0 %v2427_v8 }
 0x1b5   :  { %2264 = vmatpush.xpose.msk.msrb.mxu1 %vm668_vm2, %v3828_v22  ;;  %v661_v22 = vld [vmem:[#allocation2] sm:$0x1] }
 0x1b6   :  { %664 = vperm.xlu0 %2399, %v661_v22  }
 0x1b7   :  { %2233 = vmatpush.xpose.msk.msra.mxu2 %vm668_vm2, %v3829_v18 }
 0x1b8   :  { %2258 = vmatpush.xpose.msk.msrb.mxu3 %vm668_vm2, %v520_v13  ;;  %v573_v13 = vld.sshfl [vmem:[#allocation1 + $0x18] sm:$0xff pattern:$0x73625140] }
 0x1b9   :  { %2265 = vmatpush.xpose.msk.msrb.mxu1 %vm668_vm2, %v3830_v20  ;;  %v3847_v20 = vld [vmem:[#allocation7_spill] sm:$0xff] }
 0x1ba   :  { %654 = vmatmul.f32.vlgmr.msra.gmra.mxu1 %v573_v13  ;;  %v3855_v13 = vmax.f32 %v3035_v41, 0.0 }
 0x1bb   :  { %2234 = vmatpush.xpose.msk.msra.mxu2 %vm668_vm2, %v3831_v63  ;;  %v3849_v63 = vld [vmem:[#allocation10_spill] sm:$0xff] }
 0x1bc   :  { %2259 = vmatpush.xpose.msk.msrb.mxu3 %vm668_vm2, %v519_v47  ;;  %v3836_v47 = vmax.f32 %v2947_v46, 0.0 }
 0x1bd   :  { %2266 = vmatpush.xpose.msk.msrb.mxu1 %vm668_vm2, %v3832_v12  ;;  %v3851_v12 = vld [vmem:[#allocation8_spill] sm:$0xff] }
 0x1bf   :  { %2235 = vmatpush.xpose.msk.msra.mxu2 %vm668_vm2, %v3833_v24  ;;  %2260 = vmatmul.msk.f32.vlgmr.msrb.gmra.mxu3 %vm668_vm2, %v3269_v54  ;;  %v3853_v24 = vld [vmem:[#allocation11_spill] sm:$0xff] }
 0x1c0   :  { %1499 = vmatpush.msra.mxu3 %v2769_v26  ;;  %v3835_v26 = vmax.f32 %v2832_v55, 0.0 }
 0x1c1   :  { %2267 = vmatpush.xpose.msk.msrb.mxu1 %vm668_vm2, %v3834_v16  ;;  %v3856_v16 = vld [vmem:[#allocation12_spill] sm:$0xff] }
 0x1c2   :  { %1500 = vmatpush.msra.mxu3 %v2766_v25  ;;  %v3837_v25 = vmax.f32 %v2839_v57, 0.0 }
 0x1c3   :  { %2236 = vmatpush.xpose.msk.msra.mxu2 %vm668_vm2, %v3835_v26  ;;  %v3857_v26 = vmax.f32 %v3856_v16, 0.0 }
 0x1c4   :  { %1501 = vmatpush.msra.mxu3 %v2776_v30  ;;  %v3838_v30 = vmax.f32 %v2956_v37, 0.0 }
 0x1c5   :  { %2268 = vmatpush.xpose.msk.msrb.mxu1 %vm668_vm2, %v3836_v47  ;;  %v3858_v47 = vmax.f32 %v3042_v9, 0.0 }
 0x1c6   :  { %1502 = vmatpush.msra.mxu3 %v2781_v32  ;;  %v3839_v32 = vmax.f32 %v2846_v60, 0.0 }
 0x1c7   :  { %2237 = vmatpush.xpose.msk.msra.mxu2 %vm668_vm2, %v3837_v25  ;;  %v3859_v25 = vmax.f32 %v3048_v43, 0.0 }
 0x1c8   :  { %1503 = vmatpush.msra.mxu3 %v2787_v35  ;;  %v3840_v35 = vmax.f32 %v2967_v19, 0.0 }
 0x1c9   :  { %2269 = vmatpush.xpose.msk.msrb.mxu1 %vm668_vm2, %v3838_v30  ;;  %v3862_v30 = vld [vmem:[#allocation13_spill] sm:$0xff] }
 0x1ca   :  { %1504 = vmatpush.msra.mxu3 %v2798_v40  ;;  %v3841_v40 = vmax.f32 %v2855_v49, 0.0 }
 0x1cb   :  { %2238 = vmatpush.xpose.msk.msra.mxu2 %vm668_vm2, %v3839_v32  ;;  %v3865_v32 = vld [vmem:[#allocation16_spill] sm:$0xff] }
 0x1cc   :  { %1505 = vmatpush.msra.mxu3 %v2806_v44  ;;  %v3842_v44 = vmax.f32 %v2976_v11, 0.0 }
 0x1cd   :  { %2270 = vmatpush.xpose.msk.msrb.mxu1 %vm668_vm2, %v3840_v35  ;;  %v3868_v35 = vmax.f32 %v3088_v34, 0.0 }
 0x1ce   :  { %1506 = vmatpush.msra.mxu3 %v2816_v48  ;;  %v3843_v48 = vld [vmem:[#allocation6_spill] sm:$0xff] }
 0x1cf   :  { %2239 = vmatpush.xpose.msk.msra.mxu2 %vm668_vm2, %v3841_v40  ;;  %v3844_v6 = vmax.f32 %v3843_v48, 0.0 }
 0x1d0   :  { %1507 = vmatpush.msra.mxu3 %v2823_v51  ;;  %v3845_v51 = vld [vmem:[#allocation9_spill] sm:$0xff] }
 0x1d1   :  { %2271 = vmatpush.xpose.msk.msrb.mxu1 %vm668_vm2, %v3842_v44  ;;  %v3846_v18 = vmax.f32 %v3845_v51, 0.0 }
 0x1d2   :  { %1508 = vmatpush.msra.mxu3 %v2832_v55  ;;  %v3848_v55 = vmax.f32 %v3847_v20, 0.0 }
 0x1d3   :  { %2240 = vmatpush.xpose.msk.msra.mxu2 %vm668_vm2, %v3844_v6 }
 0x1d4   :  { %1509 = vmatpush.msra.mxu3 %v2839_v57  ;;  %v3850_v57 = vmax.f32 %v3849_v63, 0.0 }
 0x1d5   :  { %2272 = vmatpush.xpose.msk.msrb.mxu1 %vm668_vm2, %v3846_v18 }
 0x1d6   :  { %1510 = vmatpush.msra.mxu3 %v2846_v60  ;;  %v3852_v60 = vmax.f32 %v3851_v12, 0.0 }
 0x1d7   :  { %2241 = vmatpush.xpose.msk.msra.mxu2 %vm668_vm2, %v3848_v55 }
 0x1d8   :  { %1511 = vmatpush.msra.mxu3 %v2855_v49  ;;  %v3854_v49 = vmax.f32 %v3853_v24, 0.0 }
 0x1d9   :  { %2273 = vmatpush.xpose.msk.msrb.mxu1 %vm668_vm2, %v3850_v57 }
 0x1da   :  { %1512 = vmatpush.msra.mxu3 %v3843_v48 }
 0x1db   :  { %2242 = vmatpush.xpose.msk.msra.mxu2 %vm668_vm2, %v3852_v60 }
 0x1dc   :  { %1513 = vmatpush.msra.mxu3 %v3847_v20 }
 0x1dd   :  { %2274 = vmatpush.xpose.msk.msrb.mxu1 %vm668_vm2, %v3854_v49 }
 0x1de   :  { %1514 = vmatpush.msra.mxu3 %v3851_v12  ;;  %2243 = vmatmul.msk.f32.vlgmr.msra.gmra.mxu2 %vm668_vm2, %v3269_v54 }
 0x1df   :  { %2278 = vmatpush.xpose.msk.msrb.mxu2 %vm668_vm2, %v3855_v13 }
 0x1e0   :  { %2085 = vmatpush.msrb.mxu3 %v2914_v2  ;;  %v3860_v2 = vmax.f32 %v3053_v36, 0.0 }
 0x1e1   :  { %2275 = vmatpush.xpose.msk.msrb.mxu1 %vm668_vm2, %v3857_v26 }
 0x1e2   :  { %2086 = vmatpush.msrb.mxu3 %v2917_v0  ;;  %v3861_v0 = vld [vmem:[#allocation14_spill] sm:$0xff] }
 0x1e3   :  { %2279 = vmatpush.xpose.msk.msrb.mxu2 %vm668_vm2, %v3858_v47 }
 0x1e4   :  { %2087 = vmatpush.msrb.mxu3 %v2924_v59  ;;  %v3863_v59 = vmax.f32 %v3063_v28, 0.0 }
 0x1e5   :  { %2276 = vmatpush.xpose.msk.msrb.mxu1 %vm668_vm2, %v3859_v25 }
 0x1e6   :  { %2088 = vmatpush.msrb.mxu3 %v2921_v53  ;;  %v3864_v53 = vld [vmem:[#allocation15_spill] sm:$0xff] }
 0x1e7   :  { %2280 = vmatpush.xpose.msk.msrb.mxu2 %vm668_vm2, %v3860_v2 }
 0x1e8   :  { %2089 = vmatpush.msrb.mxu3 %v2929_v56  ;;  %2277 = vmatmul.msk.f32.vlgmr.msrb.gmra.mxu1 %vm668_vm2, %v3269_v54  ;;  %v3866_v56 = vmax.f32 %v3075_v21, 0.0 }
 0x1e9   :  { %1522 = vmatpush.msra.mxu1 %v3861_v0 }
 0x1ea   :  { %2090 = vmatpush.msrb.mxu3 %v2941_v50  ;;  %v3867_v50 = vld [vmem:[#allocation17_spill] sm:$0xff] }
 0x1eb   :  { %1523 = vmatpush.msra.mxu1 %v3862_v30  ;;  %2281 = vmatpush.xpose.msk.msrb.mxu2 %vm668_vm2, %v3863_v59 }
 0x1ec   :  { %2091 = vmatpush.msrb.mxu3 %v2950_v42  ;;  %v3869_v42 = vmax.f32 %v3100_v17, 0.0 }
 0x1ed   :  { %1524 = vmatpush.msra.mxu1 %v3864_v53 }
 0x1ee   :  { %2092 = vmatpush.msrb.mxu3 %v2947_v46  ;;  %v3870_v46 = vld [vmem:[#allocation18_spill] sm:$0xff] }
 0x1ef   :  { %1525 = vmatpush.msra.mxu1 %v3865_v32  ;;  %2282 = vmatpush.xpose.msk.msrb.mxu2 %vm668_vm2, %v3866_v56 }
 0x1f0   :  { %2093 = vmatpush.msrb.mxu3 %v2956_v37  ;;  %v3871_v37 = vmax.f32 %v3113_v62, 0.0 }
 0x1f1   :  { %1526 = vmatpush.msra.mxu1 %v3038_v58  ;;  %v3874_v58 = vld [vmem:[#allocation20_spill] sm:$0xff] }
 0x1f2   :  { %2094 = vmatpush.msrb.mxu3 %v2967_v19  ;;  %v3872_v19 = vld [vmem:[#allocation19_spill] sm:$0xff] }
 0x1f3   :  { %1527 = vmatpush.msra.mxu1 %v3867_v50  ;;  %2283 = vmatpush.xpose.msk.msrb.mxu2 %vm668_vm2, %v3868_v35 }
 0x1f4   :  { %2095 = vmatpush.msrb.mxu3 %v2976_v11  ;;  %v3873_v11 = vmax.f32 %v3125_v39, 0.0 }
 0x1f5   :  { %1528 = vmatpush.msra.mxu1 %v3058_v7  ;;  %v3875_v7 = vld [vmem:[#allocation21_spill] sm:$0xff] }
 0x1f6   :  { %2096 = vmatpush.msrb.mxu3 %v3845_v51 }
 0x1f7   :  { %1529 = vmatpush.msra.mxu1 %v3068_v31  ;;  %2284 = vmatpush.xpose.msk.msrb.mxu2 %vm668_vm2, %v3869_v42  ;;  %v3876_v31 = vmax.f32 %v3138_v33, 0.0 }
 0x1f8   :  { %2097 = vmatpush.msrb.mxu3 %v3849_v63 }
 0x1f9   :  { %1530 = vmatpush.msra.mxu1 %v3870_v46 }
 0x1fa   :  { %2098 = vmatpush.msrb.mxu3 %v3853_v24 }
 0x1fb   :  { %1531 = vmatpush.msra.mxu1 %v3095_v3  ;;  %2285 = vmatpush.xpose.msk.msrb.mxu2 %vm668_vm2, %v3871_v37  ;;  %v3878_v3 = vmax.f32 %v3175_v10, 0.0 }
 0x1fc   :  { %2099 = vmatpush.msrb.mxu3 %v3856_v16 }
 0x1fd   :  { %1532 = vmatpush.msra.mxu1 %v3872_v19 }
 0x1fe   :  { %2100 = vmatpush.msrb.mxu3 %v3048_v43  ;;  %v3877_v43 = vmax.f32 %v3150_v23, 0.0 }
 0x1ff   :  { %1533 = vmatpush.msra.mxu1 %v3120_v5  ;;  %2286 = vmatpush.xpose.msk.msrb.mxu2 %vm668_vm2, %v3873_v11 }
 0x201   :  { %1534 = vmatpush.msra.mxu1 %v3874_v58 }
 0x203   :  { %1535 = vmatpush.msra.mxu1 %v3875_v7  ;;  %2287 = vmatpush.xpose.msk.msrb.mxu2 %vm668_vm2, %v3876_v31 }
 0x205   :  { %1536 = vmatpush.msra.mxu1 %v3158_v29 }
 0x207   :  { %1537 = vmatpush.msra.mxu1 %v3170_v52  ;;  %2288 = vmatpush.xpose.msk.msrb.mxu2 %vm668_vm2, %v3877_v43 }
 0x209   :  { %2108 = vmatpush.msrb.mxu1 %v3035_v41 }
 0x20b   :  { %2109 = vmatpush.msrb.mxu1 %v3042_v9  ;;  %2289 = vmatpush.xpose.msk.msrb.mxu2 %vm668_vm2, %v555_v4 }
 0x20d   :  { %2110 = vmatpush.msrb.mxu1 %v3053_v36 }
 0x20f   :  { %2111 = vmatpush.msrb.mxu1 %v3063_v28  ;;  %2290 = vmatpush.xpose.msk.msrb.mxu2 %vm668_vm2, %v3878_v3  ;;  %v595_v28 = vpop.f32.mrf.mxu1 }
 0x211   :  { %2112 = vmatpush.msrb.mxu1 %v3075_v21 }
 0x213   :  { %2113 = vmatpush.msrb.mxu1 %v3088_v34  ;;  %2291 = vmatpush.xpose.msk.msrb.mxu2 %vm668_vm2, %v553_v14 }
 0x215   :  { %2114 = vmatpush.msrb.mxu1 %v3100_v17 }
 0x217   :  { %2115 = vmatpush.msrb.mxu1 %v3113_v62  ;;  %2292 = vmatpush.xpose.msk.msrb.mxu2 %vm668_vm2, %v552_v61  ;;  %v635_v21 = vpop.f32.mrf.mxu1 }
 0x219   :  { %2116 = vmatpush.msrb.mxu1 %v3125_v39 }
 0x21b   :  { %2117 = vmatpush.msrb.mxu1 %v3138_v33  ;;  %2293 = vmatpush.xpose.msk.msrb.mxu2 %vm668_vm2, %v551_v1 }
 0x21d   :  { %2118 = vmatpush.msrb.mxu1 %v3150_v23 }
 0x21e   :  { %2294 = vmatmul.msk.f32.vlgmr.msrb.gmra.mxu2 %vm668_vm2, %v3269_v54  ;;  %v944_v54 = vlaneseq }
 0x21f   :  { %2119 = vmatpush.msrb.mxu1 %v3163_v15 }
 0x220   :  { %v3451_v8 = vand.u32 127, %v944_v54 }
 0x221   :  { %2120 = vmatpush.msrb.mxu1 %v3175_v10 }
 0x222   :  { %v3454_v22 = vadd.s32 128, %v3451_v8 }
 0x223   :  { %2121 = vmatpush.msrb.mxu1 %v3184_v38 }
 0x225   :  { %2122 = vmatpush.msrb.mxu1 %v3192_v45 }
 0x227   :  { %2123 = vmatpush.msrb.mxu1 %v3200_v27 }
 0x228   :  { %v665_v17 = vpop.permute.xlu0 %664 }
 0x229   :  { %v3444_v33 = vperm.slane %v665_v17, 0 }
 0x230   :  { %v615_v9 = vpop.f32.mrf.mxu2 }
 0x231   :  { %v616_v41 = vadd.f32 %v615_v9, %v595_v28 }
 0x233   :  { %v636_v34 = vadd.f32 %v635_v21, %v616_v41 }
 0x237   :  { %v655_v36 = vpop.f32.mrf.mxu1 }
 0x238   :  { %v656_v62 = vadd.f32 %v655_v36, %v636_v34 }
 0x23a   :  { %659 = vst.msk [vmem:[#allocation3] sm:$0x3] %vm658_vm3, %v656_v62 }
 0x242   :  { %v901_v5 = vpop.f32.mrf.mxu3 }
 0x243   :  { %v902_v39 = vadd.f32 %v901_v5, %v3444_v33 }
 0x245   :  { %v952_v23 = vsel %vm950_vm4, %v902_v39, -inf }
 0x261   :  { %v881_v1 = vpop.f32.mrf.mxu2 }
 0x262   :  { %v882_v15 = vadd.f32 %v881_v1, %v3444_v33 }
 0x264   :  { %v951_v29 = vsel %vm950_vm4, %v882_v15, -inf }
 0x265   :  { %v953_v4 = vmax.f32 %v951_v29, %v952_v23 }
 0x267   :  { %954 = vmax.xlane.f32.xlu0 %v953_v4 }
 0x2da   :  { %v955_v52 = vpop.xlane.xlu0 %954 }
 0x2db   :  { %v956_v10 = vrot.slane %v955_v52, 4 }
 0x2dd   :  { %v957_v38 = vmax.f32 %v955_v52, %v956_v10 }
 0x2df   :  { %v958_v45 = vrot.slane %v957_v38, 2 }
 0x2e1   :  { %v959_v61 = vmax.f32 %v957_v38, %v958_v45 }
 0x2e3   :  { %v960_v27 = vrot.slane %v959_v61, 1 }
 0x2e5   :  { %v961_v14 = vmax.f32 %v959_v61, %v960_v27 }
 0x2e7   :  { %2315 = vpush %v961_v14  ;;  %v3469_v14 = vshrl.u32 %v944_v54, 7 }
 0x318   :  { %s2316_s3 = spop %2315 }
 0x319   :  { %v963_v40 = vstv %s2316_s3 }
 0x31a   :  { %vm964_vm5 = vcmp.eq.f32.partialorder %v882_v15, %v963_v40  ;;  %vm965_vm6 = vcmp.eq.f32.partialorder %v902_v39, %v963_v40 }
 0x31b   :  { %v966_v44 = vsel %vm964_vm5, %v3451_v8, 256  ;;  %v967_v48 = vsel %vm965_vm6, %v3454_v22, 256  ;;  %vm996_vm6 = vcmp.eq.s32.totalorder %v3469_v14, 0 }
 0x31c   :  { %v968_v6 = vsel %vm950_vm4, %v966_v44, 2147483647  ;;  %v969_v51 = vsel %vm950_vm4, %v967_v48, 2147483647 }
 0x31d   :  { %vm970_vm7 = vcmp.lt.s32.totalorder %v968_v6, %v969_v51 }
 0x31e   :  { %v971_v18 = vsel %vm970_vm7, %v968_v6, %v969_v51  ;;  %vm1050_vm7 = vcmp.eq.s32.totalorder %v3469_v14, 1 }
 0x31f   :  { %v973_v20 = vshra.s32 %v971_v18, 16  ;;  %v972_v63 = vand.u32 65535, %v971_v18 }
 0x321   :  { %v975_v55 = vcvt.s32.f32 %v973_v20  ;;  %v974_v12 = vcvt.s32.f32 %v972_v63 }
 0x323   :  { %976 = vmin.xlane.f32.xlu1 %v975_v55 }
 0x396   :  { %v977_v57 = vpop.xlane.xlu1 %976 }
 0x397   :  { %vm978_vm8 = vcmp.eq.f32.partialorder %v975_v55, %v977_v57  ;;  %v983_v24 = vcvt.f32.s32 %v977_v57 }
 0x398   :  { %v979_v60 = vsel %vm978_vm8, %v974_v12, inf }
 0x399   :  { %980 = vmin.xlane.f32.xlu1 %v979_v60  ;;  %v984_v13 = vshll.u32 %v983_v24, 16 }
 0x40c   :  { %v981_v49 = vpop.xlane.xlu1 %980 }
 0x40d   :  { %v982_v16 = vcvt.f32.s32 %v981_v49 }
 0x40f   :  { %v985_v26 = vadd.s32 %v984_v13, %v982_v16 }
 0x411   :  { %v986_v47 = vrot.slane %v985_v26, 4 }
 0x413   :  { %vm987_vm9 = vcmp.lt.s32.totalorder %v985_v26, %v986_v47 }
 0x414   :  { %v988_v25 = vsel %vm987_vm9, %v985_v26, %v986_v47 }
 0x415   :  { %v989_v2 = vrot.slane %v988_v25, 2 }
 0x417   :  { %vm990_vm10 = vcmp.lt.s32.totalorder %v988_v25, %v989_v2 }
 0x418   :  { %v991_v0 = vsel %vm990_vm10, %v988_v25, %v989_v2 }
 0x419   :  { %v992_v30 = vrot.slane %v991_v0, 1 }
 0x41b   :  { %vm993_vm11 = vcmp.lt.s32.totalorder %v991_v0, %v992_v30 }
 0x41c   :  { %v994_v59 = vsel %vm993_vm11, %v991_v0, %v992_v30 }
 0x41d   :  { %2317 = vpush %v994_v59 }
 0x44e   :  { %s2318_s9 = spop %2317 }
 0x44f   :  { %v998_v53 = vstv %s2318_s9 }
 0x450   :  { %vm1001_vm12 = vcmp.eq.s32.totalorder %v3451_v8, %v998_v53  ;;  %vm1002_vm13 = vcmp.eq.s32.totalorder %v3454_v22, %v998_v53  ;;  %v999_v40 = vsel %vm996_vm6, %v998_v53, 0 }
 0x451   :  { %v1003_v32 = vsel %vm1001_vm12, -inf, %v882_v15  ;;  %v1004_v56 = vsel %vm1002_vm13, -inf, %v902_v39 }
 0x452   :  { %v1005_v50 = vsel %vm950_vm4, %v1003_v32, -inf  ;;  %v1006_v35 = vsel %vm950_vm4, %v1004_v56, -inf }
 0x453   :  { %v1007_v42 = vmax.f32 %v1005_v50, %v1006_v35 }
 0x455   :  { %1008 = vmax.xlane.f32.xlu2 %v1007_v42 }
 0x4c8   :  { %v1009_v46 = vpop.xlane.xlu2 %1008 }
 0x4c9   :  { %v1010_v37 = vrot.slane %v1009_v46, 4 }
 0x4cb   :  { %v1011_v19 = vmax.f32 %v1009_v46, %v1010_v37 }
 0x4cd   :  { %v1012_v11 = vrot.slane %v1011_v19, 2 }
 0x4cf   :  { %v1013_v58 = vmax.f32 %v1011_v19, %v1012_v11 }
 0x4d1   :  { %v1014_v7 = vrot.slane %v1013_v58, 1 }
 0x4d3   :  { %v1015_v31 = vmax.f32 %v1013_v58, %v1014_v7 }
 0x4d5   :  { %2319 = vpush %v1015_v31 }
 0x506   :  { %s2320_s10 = spop %2319 }
 0x507   :  { %v1017_v43 = vstv %s2320_s10 }
 0x508   :  { %vm1018_vm14 = vcmp.eq.f32.partialorder %v1003_v32, %v1017_v43  ;;  %vm1019_vm15 = vcmp.eq.f32.partialorder %v1004_v56, %v1017_v43 }
 0x509   :  { %v1020_v3 = vsel %vm1018_vm14, %v3451_v8, 256  ;;  %v1021_v28 = vsel %vm1019_vm15, %v3454_v22, 256 }
 0x50a   :  { %v1022_v21 = vsel %vm950_vm4, %v1020_v3, 2147483647  ;;  %v1023_v9 = vsel %vm950_vm4, %v1021_v28, 2147483647 }
 0x50b   :  { %vm1024_vm0 = vcmp.lt.s32.totalorder %v1022_v21, %v1023_v9 }
 0x50c   :  { %v1025_v41 = vsel %vm1024_vm0, %v1022_v21, %v1023_v9 }
 0x50d   :  { %v1027_v34 = vshra.s32 %v1025_v41, 16  ;;  %v1026_v62 = vand.u32 65535, %v1025_v41 }
 0x50f   :  { %v1029_v36 = vcvt.s32.f32 %v1027_v34  ;;  %v1028_v5 = vcvt.s32.f32 %v1026_v62 }
 0x511   :  { %1030 = vmin.xlane.f32.xlu2 %v1029_v36 }
 0x584   :  { %v1031_v17 = vpop.xlane.xlu2 %1030 }
 0x585   :  { %vm1032_vm1 = vcmp.eq.f32.partialorder %v1029_v36, %v1031_v17  ;;  %v1037_v1 = vcvt.f32.s32 %v1031_v17 }
 0x586   :  { %v1033_v39 = vsel %vm1032_vm1, %v1028_v5, inf  ;;  %vm1104_vm1 = vcmp.eq.s32.totalorder %v3469_v14, 2 }
 0x587   :  { %1034 = vmin.xlane.f32.xlu1 %v1033_v39  ;;  %v1038_v23 = vshll.u32 %v1037_v1, 16 }
 0x5fa   :  { %v1035_v15 = vpop.xlane.xlu1 %1034 }
 0x5fb   :  { %v1036_v29 = vcvt.f32.s32 %v1035_v15 }
 0x5fd   :  { %v1039_v4 = vadd.s32 %v1038_v23, %v1036_v29 }
 0x5ff   :  { %v1040_v52 = vrot.slane %v1039_v4, 4 }
 0x601   :  { %vm1041_vm2 = vcmp.lt.s32.totalorder %v1039_v4, %v1040_v52 }
 0x602   :  { %v1042_v10 = vsel %vm1041_vm2, %v1039_v4, %v1040_v52 }
 0x603   :  { %v1043_v38 = vrot.slane %v1042_v10, 2 }
 0x605   :  { %vm1044_vm3 = vcmp.lt.s32.totalorder %v1042_v10, %v1043_v38 }
 0x606   :  { %v1045_v45 = vsel %vm1044_vm3, %v1042_v10, %v1043_v38 }
 0x607   :  { %v1046_v61 = vrot.slane %v1045_v45, 1 }
 0x609   :  { %vm1047_vm5 = vcmp.lt.s32.totalorder %v1045_v45, %v1046_v61 }
 0x60a   :  { %v1048_v27 = vsel %vm1047_vm5, %v1045_v45, %v1046_v61 }
 0x60b   :  { %2321 = vpush %v1048_v27 }
 0x63c   :  { %s2322_s11 = spop %2321 }
 0x63d   :  { %v1052_v44 = vstv %s2322_s11 }
 0x63e   :  { %v1053_v48 = vsel %vm1050_vm7, %v1052_v44, %v999_v40  ;;  %vm1055_vm8 = vcmp.eq.s32.totalorder %v3451_v8, %v1052_v44  ;;  %vm1056_vm9 = vcmp.eq.s32.totalorder %v3454_v22, %v1052_v44 }
 0x63f   :  { %v1057_v6 = vsel %vm1055_vm8, -inf, %v1003_v32  ;;  %v1058_v51 = vsel %vm1056_vm9, -inf, %v1004_v56 }
 0x640   :  { %v1059_v54 = vsel %vm950_vm4, %v1057_v6, -inf  ;;  %v1060_v18 = vsel %vm950_vm4, %v1058_v51, -inf }
 0x641   :  { %v1061_v20 = vmax.f32 %v1059_v54, %v1060_v18 }
 0x643   :  { %1062 = vmax.xlane.f32.xlu2 %v1061_v20 }
 0x6b6   :  { %v1063_v55 = vpop.xlane.xlu2 %1062 }
 0x6b7   :  { %v1064_v63 = vrot.slane %v1063_v55, 4 }
 0x6b9   :  { %v1065_v57 = vmax.f32 %v1063_v55, %v1064_v63 }
 0x6bb   :  { %v1066_v12 = vrot.slane %v1065_v57, 2 }
 0x6bd   :  { %v1067_v60 = vmax.f32 %v1065_v57, %v1066_v12 }
 0x6bf   :  { %v1068_v24 = vrot.slane %v1067_v60, 1 }
 0x6c1   :  { %v1069_v49 = vmax.f32 %v1067_v60, %v1068_v24 }
 0x6c3   :  { %2323 = vpush %v1069_v49 }
 0x6f4   :  { %s2324_s12 = spop %2323 }
 0x6f5   :  { %v1071_v13 = vstv %s2324_s12 }
 0x6f6   :  { %vm1072_vm10 = vcmp.eq.f32.partialorder %v1057_v6, %v1071_v13  ;;  %vm1073_vm11 = vcmp.eq.f32.partialorder %v1058_v51, %v1071_v13 }
 0x6f7   :  { %v1074_v16 = vsel %vm1072_vm10, %v3451_v8, 256  ;;  %v1075_v26 = vsel %vm1073_vm11, %v3454_v22, 256 }
 0x6f8   :  { %v1076_v47 = vsel %vm950_vm4, %v1074_v16, 2147483647  ;;  %v1077_v25 = vsel %vm950_vm4, %v1075_v26, 2147483647 }
 0x6f9   :  { %vm1078_vm12 = vcmp.lt.s32.totalorder %v1076_v47, %v1077_v25 }
 0x6fa   :  { %v1079_v2 = vsel %vm1078_vm12, %v1076_v47, %v1077_v25 }
 0x6fb   :  { %v1081_v0 = vshra.s32 %v1079_v2, 16  ;;  %v1080_v59 = vand.u32 65535, %v1079_v2 }
 0x6fd   :  { %v1083_v30 = vcvt.s32.f32 %v1081_v0  ;;  %v1082_v32 = vcvt.s32.f32 %v1080_v59 }
 0x6ff   :  { %1084 = vmin.xlane.f32.xlu1 %v1083_v30 }
 0x772   :  { %v1085_v53 = vpop.xlane.xlu1 %1084 }
 0x773   :  { %vm1086_vm13 = vcmp.eq.f32.partialorder %v1083_v30, %v1085_v53  ;;  %v1091_v50 = vcvt.f32.s32 %v1085_v53 }
 0x774   :  { %v1087_v56 = vsel %vm1086_vm13, %v1082_v32, inf }
 0x775   :  { %1088 = vmin.xlane.f32.xlu2 %v1087_v56  ;;  %v1092_v42 = vshll.u32 %v1091_v50, 16 }
 0x7e8   :  { %v1089_v35 = vpop.xlane.xlu2 %1088 }
 0x7e9   :  { %v1090_v46 = vcvt.f32.s32 %v1089_v35 }
 0x7eb   :  { %v1093_v37 = vadd.s32 %v1092_v42, %v1090_v46 }
 0x7ed   :  { %v1094_v19 = vrot.slane %v1093_v37, 4 }
 0x7ef   :  { %vm1095_vm14 = vcmp.lt.s32.totalorder %v1093_v37, %v1094_v19 }
 0x7f0   :  { %v1096_v11 = vsel %vm1095_vm14, %v1093_v37, %v1094_v19  ;;  %vm1158_vm14 = vcmp.eq.s32.totalorder %v3469_v14, 3 }
 0x7f1   :  { %v1097_v58 = vrot.slane %v1096_v11, 2 }
 0x7f3   :  { %vm1098_vm15 = vcmp.lt.s32.totalorder %v1096_v11, %v1097_v58 }
 0x7f4   :  { %v1099_v7 = vsel %vm1098_vm15, %v1096_v11, %v1097_v58 }
 0x7f5   :  { %v1100_v31 = vrot.slane %v1099_v7, 1 }
 0x7f7   :  { %vm1101_vm0 = vcmp.lt.s32.totalorder %v1099_v7, %v1100_v31 }
 0x7f8   :  { %v1102_v43 = vsel %vm1101_vm0, %v1099_v7, %v1100_v31 }
 0x7f9   :  { %2325 = vpush %v1102_v43 }
 0x82a   :  { %s2326_s13 = spop %2325 }
 0x82b   :  { %v1106_v3 = vstv %s2326_s13 }
 0x82c   :  { %v1107_v28 = vsel %vm1104_vm1, %v1106_v3, %v1053_v48  ;;  %vm1109_vm2 = vcmp.eq.s32.totalorder %v3451_v8, %v1106_v3  ;;  %vm1110_vm3 = vcmp.eq.s32.totalorder %v3454_v22, %v1106_v3 }
 0x82d   :  { %v1111_v21 = vsel %vm1109_vm2, -inf, %v1057_v6  ;;  %v1112_v9 = vsel %vm1110_vm3, -inf, %v1058_v51 }
 0x82e   :  { %v1113_v41 = vsel %vm950_vm4, %v1111_v21, -inf  ;;  %v1114_v34 = vsel %vm950_vm4, %v1112_v9, -inf }
 0x82f   :  { %v1115_v36 = vmax.f32 %v1113_v41, %v1114_v34 }
 0x831   :  { %1116 = vmax.xlane.f32.xlu1 %v1115_v36 }
 0x8a4   :  { %v1117_v62 = vpop.xlane.xlu1 %1116 }
 0x8a5   :  { %v1118_v17 = vrot.slane %v1117_v62, 4 }
 0x8a7   :  { %v1119_v5 = vmax.f32 %v1117_v62, %v1118_v17 }
 0x8a9   :  { %v1120_v39 = vrot.slane %v1119_v5, 2 }
 0x8ab   :  { %v1121_v1 = vmax.f32 %v1119_v5, %v1120_v39 }
 0x8ad   :  { %v1122_v15 = vrot.slane %v1121_v1, 1 }
 0x8af   :  { %v1123_v23 = vmax.f32 %v1121_v1, %v1122_v15 }
 0x8b1   :  { %2327 = vpush %v1123_v23 }
 0x8e2   :  { %s2328_s14 = spop %2327 }
 0x8e3   :  { %v1125_v29 = vstv %s2328_s14 }
 0x8e4   :  { %vm1126_vm5 = vcmp.eq.f32.partialorder %v1111_v21, %v1125_v29  ;;  %vm1127_vm8 = vcmp.eq.f32.partialorder %v1112_v9, %v1125_v29 }
 0x8e5   :  { %v1128_v4 = vsel %vm1126_vm5, %v3451_v8, 256  ;;  %v1129_v52 = vsel %vm1127_vm8, %v3454_v22, 256 }
 0x8e6   :  { %v1130_v10 = vsel %vm950_vm4, %v1128_v4, 2147483647  ;;  %v1131_v38 = vsel %vm950_vm4, %v1129_v52, 2147483647 }
 0x8e7   :  { %vm1132_vm9 = vcmp.lt.s32.totalorder %v1130_v10, %v1131_v38 }
 0x8e8   :  { %v1133_v45 = vsel %vm1132_vm9, %v1130_v10, %v1131_v38 }
 0x8e9   :  { %v1135_v61 = vshra.s32 %v1133_v45, 16  ;;  %v1134_v40 = vand.u32 65535, %v1133_v45 }
 0x8eb   :  { %v1137_v27 = vcvt.s32.f32 %v1135_v61  ;;  %v1136_v48 = vcvt.s32.f32 %v1134_v40 }
 0x8ed   :  { %1138 = vmin.xlane.f32.xlu2 %v1137_v27 }
 0x960   :  { %v1139_v44 = vpop.xlane.xlu2 %1138 }
 0x961   :  { %vm1140_vm10 = vcmp.eq.f32.partialorder %v1137_v27, %v1139_v44  ;;  %v1145_v51 = vcvt.f32.s32 %v1139_v44 }
 0x962   :  { %v1141_v6 = vsel %vm1140_vm10, %v1136_v48, inf }
 0x963   :  { %1142 = vmin.xlane.f32.xlu1 %v1141_v6  ;;  %v1146_v18 = vshll.u32 %v1145_v51, 16 }
 0x9d6   :  { %v1143_v54 = vpop.xlane.xlu1 %1142 }
 0x9d7   :  { %v1144_v20 = vcvt.f32.s32 %v1143_v54 }
 0x9d9   :  { %v1147_v55 = vadd.s32 %v1146_v18, %v1144_v20 }
 0x9db   :  { %v1148_v63 = vrot.slane %v1147_v55, 4 }
 0x9dd   :  { %vm1149_vm11 = vcmp.lt.s32.totalorder %v1147_v55, %v1148_v63 }
 0x9de   :  { %v1150_v57 = vsel %vm1149_vm11, %v1147_v55, %v1148_v63 }
 0x9df   :  { %v1151_v12 = vrot.slane %v1150_v57, 2 }
 0x9e1   :  { %vm1152_vm12 = vcmp.lt.s32.totalorder %v1150_v57, %v1151_v12 }
 0x9e2   :  { %v1153_v60 = vsel %vm1152_vm12, %v1150_v57, %v1151_v12  ;;  %vm1212_vm12 = vcmp.eq.s32.totalorder %v3469_v14, 4 }
 0x9e3   :  { %v1154_v24 = vrot.slane %v1153_v60, 1 }
 0x9e5   :  { %vm1155_vm13 = vcmp.lt.s32.totalorder %v1153_v60, %v1154_v24 }
 0x9e6   :  { %v1156_v49 = vsel %vm1155_vm13, %v1153_v60, %v1154_v24 }
 0x9e7   :  { %2329 = vpush %v1156_v49 }
 0xa18   :  { %s2330_s15 = spop %2329 }
 0xa19   :  { %v1160_v13 = vstv %s2330_s15 }
 0xa1a   :  { %v1161_v16 = vsel %vm1158_vm14, %v1160_v13, %v1107_v28  ;;  %vm1163_vm15 = vcmp.eq.s32.totalorder %v3451_v8, %v1160_v13  ;;  %vm1164_vm0 = vcmp.eq.s32.totalorder %v3454_v22, %v1160_v13 }
 0xa1b   :  { %v1165_v26 = vsel %vm1163_vm15, -inf, %v1111_v21  ;;  %v1166_v47 = vsel %vm1164_vm0, -inf, %v1112_v9 }
 0xa1c   :  { %v1167_v25 = vsel %vm950_vm4, %v1165_v26, -inf  ;;  %v1168_v2 = vsel %vm950_vm4, %v1166_v47, -inf }
 0xa1d   :  { %v1169_v0 = vmax.f32 %v1167_v25, %v1168_v2 }
 0xa1f   :  { %1170 = vmax.xlane.f32.xlu2 %v1169_v0 }
 0xa92   :  { %v1171_v30 = vpop.xlane.xlu2 %1170 }
 0xa93   :  { %v1172_v59 = vrot.slane %v1171_v30, 4 }
 0xa95   :  { %v1173_v53 = vmax.f32 %v1171_v30, %v1172_v59 }
 0xa97   :  { %v1174_v32 = vrot.slane %v1173_v53, 2 }
 0xa99   :  { %v1175_v56 = vmax.f32 %v1173_v53, %v1174_v32 }
 0xa9b   :  { %v1176_v50 = vrot.slane %v1175_v56, 1 }
 0xa9d   :  { %v1177_v35 = vmax.f32 %v1175_v56, %v1176_v50 }
 0xa9f   :  { %2331 = vpush %v1177_v35 }
 0xad0   :  { %s2332_s16 = spop %2331 }
 0xad1   :  { %v1179_v42 = vstv %s2332_s16 }
 0xad2   :  { %vm1180_vm2 = vcmp.eq.f32.partialorder %v1165_v26, %v1179_v42  ;;  %vm1181_vm3 = vcmp.eq.f32.partialorder %v1166_v47, %v1179_v42 }
 0xad3   :  { %v1182_v46 = vsel %vm1180_vm2, %v3451_v8, 256  ;;  %v1183_v37 = vsel %vm1181_vm3, %v3454_v22, 256 }
 0xad4   :  { %v1184_v19 = vsel %vm950_vm4, %v1182_v46, 2147483647  ;;  %v1185_v11 = vsel %vm950_vm4, %v1183_v37, 2147483647 }
 0xad5   :  { %vm1186_vm5 = vcmp.lt.s32.totalorder %v1184_v19, %v1185_v11 }
 0xad6   :  { %v1187_v58 = vsel %vm1186_vm5, %v1184_v19, %v1185_v11 }
 0xad7   :  { %v1189_v7 = vshra.s32 %v1187_v58, 16  ;;  %v1188_v43 = vand.u32 65535, %v1187_v58 }
 0xad9   :  { %v1191_v31 = vcvt.s32.f32 %v1189_v7  ;;  %v1190_v28 = vcvt.s32.f32 %v1188_v43 }
 0xadb   :  { %1192 = vmin.xlane.f32.xlu1 %v1191_v31 }
 0xb4e   :  { %v1193_v3 = vpop.xlane.xlu1 %1192 }
 0xb4f   :  { %vm1194_vm8 = vcmp.eq.f32.partialorder %v1191_v31, %v1193_v3  ;;  %v1199_v9 = vcvt.f32.s32 %v1193_v3 }
 0xb50   :  { %v1195_v21 = vsel %vm1194_vm8, %v1190_v28, inf }
 0xb51   :  { %1196 = vmin.xlane.f32.xlu2 %v1195_v21  ;;  %v1200_v34 = vshll.u32 %v1199_v9, 16 }
 0xbc4   :  { %v1197_v41 = vpop.xlane.xlu2 %1196 }
 0xbc5   :  { %v1198_v36 = vcvt.f32.s32 %v1197_v41 }
 0xbc7   :  { %v1201_v62 = vadd.s32 %v1200_v34, %v1198_v36 }
 0xbc9   :  { %v1202_v17 = vrot.slane %v1201_v62, 4 }
 0xbcb   :  { %vm1203_vm9 = vcmp.lt.s32.totalorder %v1201_v62, %v1202_v17 }
 0xbcc   :  { %v1204_v5 = vsel %vm1203_vm9, %v1201_v62, %v1202_v17 }
 0xbcd   :  { %v1205_v39 = vrot.slane %v1204_v5, 2 }
 0xbcf   :  { %vm1206_vm10 = vcmp.lt.s32.totalorder %v1204_v5, %v1205_v39 }
 0xbd0   :  { %v1207_v1 = vsel %vm1206_vm10, %v1204_v5, %v1205_v39 }
 0xbd1   :  { %v1208_v15 = vrot.slane %v1207_v1, 1 }
 0xbd3   :  { %vm1209_vm11 = vcmp.lt.s32.totalorder %v1207_v1, %v1208_v15 }
 0xbd4   :  { %v1210_v23 = vsel %vm1209_vm11, %v1207_v1, %v1208_v15  ;;  %vm1266_vm11 = vcmp.eq.s32.totalorder %v3469_v14, 5 }
 0xbd5   :  { %2333 = vpush %v1210_v23 }
 0xc06   :  { %s2334_s17 = spop %2333 }
 0xc07   :  { %v1214_v29 = vstv %s2334_s17  ;;  %s2429_s17 = smov 96  }
 0xc08   :  { %v1215_v4 = vsel %vm1212_vm12, %v1214_v29, %v1161_v16  ;;  %vm1217_vm13 = vcmp.eq.s32.totalorder %v3451_v8, %v1214_v29  ;;  %vm1218_vm15 = vcmp.eq.s32.totalorder %v3454_v22, %v1214_v29 }
 0xc09   :  { %v1219_v52 = vsel %vm1217_vm13, -inf, %v1165_v26  ;;  %v1220_v10 = vsel %vm1218_vm15, -inf, %v1166_v47 }
 0xc0a   :  { %v1221_v38 = vsel %vm950_vm4, %v1219_v52, -inf  ;;  %v1222_v45 = vsel %vm950_vm4, %v1220_v10, -inf }
 0xc0b   :  { %v1223_v61 = vmax.f32 %v1221_v38, %v1222_v45 }
 0xc0d   :  { %1224 = vmax.xlane.f32.xlu0 %v1223_v61 }
 0xc80   :  { %v1225_v27 = vpop.xlane.xlu0 %1224 }
 0xc81   :  { %v1226_v40 = vrot.slane %v1225_v27, 4 }
 0xc83   :  { %v1227_v44 = vmax.f32 %v1225_v27, %v1226_v40 }
 0xc85   :  { %v1228_v48 = vrot.slane %v1227_v44, 2 }
 0xc87   :  { %v1229_v6 = vmax.f32 %v1227_v44, %v1228_v48 }
 0xc89   :  { %v1230_v51 = vrot.slane %v1229_v6, 1 }
 0xc8b   :  { %v1231_v54 = vmax.f32 %v1229_v6, %v1230_v51 }
 0xc8d   :  { %2335 = vpush %v1231_v54 }
 0xcbe   :  { %s2336_s18 = spop %2335 }
 0xcbf   :  { %v1233_v18 = vstv %s2336_s18 }
 0xcc0   :  { %vm1234_vm0 = vcmp.eq.f32.partialorder %v1219_v52, %v1233_v18  ;;  %vm1235_vm2 = vcmp.eq.f32.partialorder %v1220_v10, %v1233_v18 }
 0xcc1   :  { %v1236_v20 = vsel %vm1234_vm0, %v3451_v8, 256  ;;  %v1237_v55 = vsel %vm1235_vm2, %v3454_v22, 256 }
 0xcc2   :  { %v1238_v63 = vsel %vm950_vm4, %v1236_v20, 2147483647  ;;  %v1239_v57 = vsel %vm950_vm4, %v1237_v55, 2147483647 }
 0xcc3   :  { %vm1240_vm3 = vcmp.lt.s32.totalorder %v1238_v63, %v1239_v57 }
 0xcc4   :  { %v1241_v12 = vsel %vm1240_vm3, %v1238_v63, %v1239_v57 }
 0xcc5   :  { %v1243_v60 = vshra.s32 %v1241_v12, 16  ;;  %v1242_v49 = vand.u32 65535, %v1241_v12 }
 0xcc7   :  { %v1245_v24 = vcvt.s32.f32 %v1243_v60  ;;  %v1244_v16 = vcvt.s32.f32 %v1242_v49 }
 0xcc9   :  { %1246 = vmin.xlane.f32.xlu1 %v1245_v24 }
 0xd3c   :  { %v1247_v13 = vpop.xlane.xlu1 %1246 }
 0xd3d   :  { %vm1248_vm5 = vcmp.eq.f32.partialorder %v1245_v24, %v1247_v13  ;;  %v1253_v47 = vcvt.f32.s32 %v1247_v13 }
 0xd3e   :  { %v1249_v26 = vsel %vm1248_vm5, %v1244_v16, inf }
 0xd3f   :  { %1250 = vmin.xlane.f32.xlu2 %v1249_v26  ;;  %v1254_v2 = vshll.u32 %v1253_v47, 16 }
 0xdb2   :  { %v1251_v25 = vpop.xlane.xlu2 %1250 }
 0xdb3   :  { %v1252_v0 = vcvt.f32.s32 %v1251_v25 }
 0xdb5   :  { %v1255_v30 = vadd.s32 %v1254_v2, %v1252_v0 }
 0xdb7   :  { %v1256_v59 = vrot.slane %v1255_v30, 4 }
 0xdb9   :  { %vm1257_vm8 = vcmp.lt.s32.totalorder %v1255_v30, %v1256_v59 }
 0xdba   :  { %v1258_v53 = vsel %vm1257_vm8, %v1255_v30, %v1256_v59 }
 0xdbb   :  { %v1259_v32 = vrot.slane %v1258_v53, 2 }
 0xdbd   :  { %vm1260_vm9 = vcmp.lt.s32.totalorder %v1258_v53, %v1259_v32 }
 0xdbe   :  { %v1261_v56 = vsel %vm1260_vm9, %v1258_v53, %v1259_v32 }
 0xdbf   :  { %v1262_v50 = vrot.slane %v1261_v56, 1 }
 0xdc1   :  { %vm1263_vm10 = vcmp.lt.s32.totalorder %v1261_v56, %v1262_v50 }
 0xdc2   :  { %v1264_v35 = vsel %vm1263_vm10, %v1261_v56, %v1262_v50 }
 0xdc3   :  { %2337 = vpush %v1264_v35 }
 0xdf4   :  { %s2338_s19 = spop %2337 }
 0xdf5   :  { %v1268_v42 = vstv %s2338_s19 }
 0xdf6   :  { %v1269_v46 = vsel %vm1266_vm11, %v1268_v42, %v1215_v4  ;;  %vm1271_vm13 = vcmp.eq.s32.totalorder %v3451_v8, %v1268_v42  ;;  %vm1272_vm15 = vcmp.eq.s32.totalorder %v3454_v22, %v1268_v42 }
 0xdf7   :  { %v1273_v37 = vsel %vm1271_vm13, -inf, %v1219_v52  ;;  %v1274_v19 = vsel %vm1272_vm15, -inf, %v1220_v10  ;;  %vm1320_vm13 = vcmp.eq.s32.totalorder %v3469_v14, 6 }
 0xdf8   :  { %v1275_v11 = vsel %vm950_vm4, %v1273_v37, -inf  ;;  %v1276_v58 = vsel %vm950_vm4, %v1274_v19, -inf }
 0xdf9   :  { %v1277_v7 = vmax.f32 %v1275_v11, %v1276_v58 }
 0xdfb   :  { %1278 = vmax.xlane.f32.xlu0 %v1277_v7 }
 0xe6e   :  { %v1279_v31 = vpop.xlane.xlu0 %1278 }
 0xe6f   :  { %v1280_v43 = vrot.slane %v1279_v31, 4 }
 0xe71   :  { %v1281_v3 = vmax.f32 %v1279_v31, %v1280_v43 }
 0xe73   :  { %v1282_v28 = vrot.slane %v1281_v3, 2 }
 0xe75   :  { %v1283_v21 = vmax.f32 %v1281_v3, %v1282_v28 }
 0xe77   :  { %v1284_v9 = vrot.slane %v1283_v21, 1 }
 0xe79   :  { %v1285_v41 = vmax.f32 %v1283_v21, %v1284_v9 }
 0xe7b   :  { %2339 = vpush %v1285_v41 }
 0xeac   :  { %s2340_s20 = spop %2339 }
 0xead   :  { %v1287_v34 = vstv %s2340_s20 }
 0xeae   :  { %vm1288_vm0 = vcmp.eq.f32.partialorder %v1273_v37, %v1287_v34  ;;  %vm1289_vm2 = vcmp.eq.f32.partialorder %v1274_v19, %v1287_v34 }
 0xeaf   :  { %v1290_v36 = vsel %vm1288_vm0, %v3451_v8, 256  ;;  %v1291_v62 = vsel %vm1289_vm2, %v3454_v22, 256 }
 0xeb0   :  { %v1292_v17 = vsel %vm950_vm4, %v1290_v36, 2147483647  ;;  %v1293_v5 = vsel %vm950_vm4, %v1291_v62, 2147483647 }
 0xeb1   :  { %vm1294_vm3 = vcmp.lt.s32.totalorder %v1292_v17, %v1293_v5 }
 0xeb2   :  { %v1295_v39 = vsel %vm1294_vm3, %v1292_v17, %v1293_v5  ;;  %v2428_v5 = vmov 1.0  }
 0xeb3   :  { %v1297_v1 = vshra.s32 %v1295_v39, 16  ;;  %v1296_v23 = vand.u32 65535, %v1295_v39 }
 0xeb5   :  { %v1299_v15 = vcvt.s32.f32 %v1297_v1  ;;  %v1298_v4 = vcvt.s32.f32 %v1296_v23 }
 0xeb7   :  { %1300 = vmin.xlane.f32.xlu1 %v1299_v15 }
 0xf2a   :  { %v1301_v29 = vpop.xlane.xlu1 %1300 }
 0xf2b   :  { %vm1302_vm5 = vcmp.eq.f32.partialorder %v1299_v15, %v1301_v29  ;;  %v1307_v10 = vcvt.f32.s32 %v1301_v29 }
 0xf2c   :  { %v1303_v52 = vsel %vm1302_vm5, %v1298_v4, inf }
 0xf2d   :  { %1304 = vmin.xlane.f32.xlu2 %v1303_v52  ;;  %v1308_v45 = vshll.u32 %v1307_v10, 16 }
 0xfa0   :  { %v1305_v38 = vpop.xlane.xlu2 %1304 }
 0xfa1   :  { %v1306_v61 = vcvt.f32.s32 %v1305_v38 }
 0xfa3   :  { %v1309_v27 = vadd.s32 %v1308_v45, %v1306_v61 }
 0xfa5   :  { %v1310_v40 = vrot.slane %v1309_v27, 4 }
 0xfa7   :  { %vm1311_vm8 = vcmp.lt.s32.totalorder %v1309_v27, %v1310_v40 }
 0xfa8   :  { %v1312_v44 = vsel %vm1311_vm8, %v1309_v27, %v1310_v40 }
 0xfa9   :  { %v1313_v48 = vrot.slane %v1312_v44, 2 }
 0xfab   :  { %vm1314_vm9 = vcmp.lt.s32.totalorder %v1312_v44, %v1313_v48 }
 0xfac   :  { %v1315_v6 = vsel %vm1314_vm9, %v1312_v44, %v1313_v48 }
 0xfad   :  { %v1316_v51 = vrot.slane %v1315_v6, 1 }
 0xfaf   :  { %vm1317_vm10 = vcmp.lt.s32.totalorder %v1315_v6, %v1316_v51 }
 0xfb0   :  { %v1318_v54 = vsel %vm1317_vm10, %v1315_v6, %v1316_v51 }
 0xfb1   :  { %2341 = vpush %v1318_v54 }
 0xfe2   :  { %s2342_s21 = spop %2341 }
 0xfe3   :  { %v1322_v18 = vstv %s2342_s21 }
 0xfe4   :  { %v1323_v20 = vsel %vm1320_vm13, %v1322_v18, %v1269_v46  ;;  %vm1325_vm15 = vcmp.eq.s32.totalorder %v3451_v8, %v1322_v18  ;;  %vm1326_vm0 = vcmp.eq.s32.totalorder %v3454_v22, %v1322_v18 }
 0xfe5   :  { %v1327_v55 = vsel %vm1325_vm15, -inf, %v1273_v37  ;;  %v1328_v63 = vsel %vm1326_vm0, -inf, %v1274_v19  ;;  %vm1374_vm0 = vcmp.eq.s32.totalorder %v3469_v14, 7 }
 0xfe6   :  { %v1329_v57 = vsel %vm950_vm4, %v1327_v55, -inf  ;;  %v1330_v12 = vsel %vm950_vm4, %v1328_v63, -inf }
 0xfe7   :  { %v1331_v60 = vmax.f32 %v1329_v57, %v1330_v12 }
 0xfe9   :  { %1332 = vmax.xlane.f32.xlu0 %v1331_v60 }
0x105c   :  { %v1333_v24 = vpop.xlane.xlu0 %1332 }
0x105d   :  { %v1334_v49 = vrot.slane %v1333_v24, 4 }
0x105f   :  { %v1335_v13 = vmax.f32 %v1333_v24, %v1334_v49 }
0x1061   :  { %v1336_v16 = vrot.slane %v1335_v13, 2 }
0x1063   :  { %v1337_v26 = vmax.f32 %v1335_v13, %v1336_v16 }
0x1065   :  { %v1338_v47 = vrot.slane %v1337_v26, 1 }
0x1067   :  { %v1339_v25 = vmax.f32 %v1337_v26, %v1338_v47 }
0x1069   :  { %2343 = vpush %v1339_v25 }
0x109a   :  { %s2344_s22 = spop %2343 }
0x109b   :  { %v1341_v2 = vstv %s2344_s22 }
0x109c   :  { %vm1342_vm2 = vcmp.eq.f32.partialorder %v1327_v55, %v1341_v2  ;;  %vm1343_vm3 = vcmp.eq.f32.partialorder %v1328_v63, %v1341_v2 }
0x109d   :  { %v1344_v0 = vsel %vm1342_vm2, %v3451_v8, 256  ;;  %v1345_v30 = vsel %vm1343_vm3, %v3454_v22, 256 }
0x109e   :  { %v1346_v59 = vsel %vm950_vm4, %v1344_v0, 2147483647  ;;  %v1347_v53 = vsel %vm950_vm4, %v1345_v30, 2147483647  ;;  %v941_v30 = vpop.f32.mrf.mxu2 }
0x109f   :  { %vm1348_vm5 = vcmp.lt.s32.totalorder %v1346_v59, %v1347_v53 }
0x10a0   :  { %v1349_v32 = vsel %vm1348_vm5, %v1346_v59, %v1347_v53 }
0x10a1   :  { %v1351_v56 = vshra.s32 %v1349_v32, 16  ;;  %v1350_v35 = vand.u32 65535, %v1349_v32 }
0x10a3   :  { %v1353_v50 = vcvt.s32.f32 %v1351_v56  ;;  %v1352_v46 = vcvt.s32.f32 %v1350_v35 }
0x10a5   :  { %1354 = vmin.xlane.f32.xlu1 %v1353_v50 }
0x1118   :  { %v1355_v42 = vpop.xlane.xlu1 %1354 }
0x1119   :  { %vm1356_vm8 = vcmp.eq.f32.partialorder %v1353_v50, %v1355_v42  ;;  %v1361_v19 = vcvt.f32.s32 %v1355_v42  ;;  %v921_v50 = vpop.f32.mrf.mxu1  ;;  %v3564_v42 = vadd.f32 %v941_v30, %v3444_v33 }
0x111a   :  { %v1357_v37 = vsel %vm1356_vm8, %v1352_v46, inf  ;;  %v3567_v46 = vadd.f32 %v921_v50, %v3444_v33 }
0x111b   :  { %1358 = vmin.xlane.f32.xlu2 %v1357_v37  ;;  %v1362_v58 = vshll.u32 %v1361_v19, 16  ;;  %v1558_v37 = vsel %vm950_vm4, %v3564_v42, -inf }
0x111c   :  { %v1557_v19 = vsel %vm950_vm4, %v3567_v46, -inf }
0x118e   :  { %v1359_v11 = vpop.xlane.xlu2 %1358 }
0x118f   :  { %v1360_v7 = vcvt.f32.s32 %v1359_v11  ;;  %v1559_v11 = vmax.f32 %v1557_v19, %v1558_v37 }
0x1191   :  { %v1363_v31 = vadd.s32 %v1362_v58, %v1360_v7 }
0x1193   :  { %v1364_v43 = vrot.slane %v1363_v31, 4 }
0x1195   :  { %vm1365_vm9 = vcmp.lt.s32.totalorder %v1363_v31, %v1364_v43 }
0x1196   :  { %v1366_v3 = vsel %vm1365_vm9, %v1363_v31, %v1364_v43 }
0x1197   :  { %v1367_v28 = vrot.slane %v1366_v3, 2 }
0x1199   :  { %vm1368_vm10 = vcmp.lt.s32.totalorder %v1366_v3, %v1367_v28 }
0x119a   :  { %v1369_v21 = vsel %vm1368_vm10, %v1366_v3, %v1367_v28 }
0x119b   :  { %v1370_v9 = vrot.slane %v1369_v21, 1 }
0x119d   :  { %vm1371_vm15 = vcmp.lt.s32.totalorder %v1369_v21, %v1370_v9 }
0x119e   :  { %v1372_v41 = vsel %vm1371_vm15, %v1369_v21, %v1370_v9 }
0x119f   :  { %2345 = vpush %v1372_v41 }
0x11d0   :  { %s2346_s23 = spop %2345 }
0x11d1   :  { %v1376_v34 = vstv %s2346_s23 }
0x11d2   :  { %v1377_v36 = vsel %vm1374_vm0, %v1376_v34, %v1323_v20  ;;  %vm1379_vm2 = vcmp.eq.s32.totalorder %v3451_v8, %v1376_v34  ;;  %vm1380_vm3 = vcmp.eq.s32.totalorder %v3454_v22, %v1376_v34 }
0x11d3   :  { %v1381_v62 = vsel %vm1379_vm2, -inf, %v1327_v55  ;;  %v1382_v17 = vsel %vm1380_vm3, -inf, %v1328_v63  ;;  %vm1487_vm5 = vcmp.eq.s32.totalorder %v3451_v8, %v1377_v36  ;;  %vm1488_vm8 = vcmp.eq.s32.totalorder %v3454_v22, %v1377_v36 }
0x11d4   :  { %2299 = vmatmul.msk.f32.vlgmr.msra.gmra.mxu3 %vm1487_vm5, %v2428_v5  ;;  %2301 = vmatmul.msk.f32.vlgmr.msra.gmra.mxu1 %vm1488_vm8, %v2428_v5  ;;  %v1383_v39 = vsel %vm950_vm4, %v1381_v62, -inf  ;;  %v1384_v1 = vsel %vm950_vm4, %v1382_v17, -inf }
0x11d5   :  { %v1385_v15 = vmax.f32 %v1383_v39, %v1384_v1 }
0x11d7   :  { %1386 = vmax.xlane.f32.xlu0 %v1385_v15 }
0x124a   :  { %v1387_v23 = vpop.xlane.xlu0 %1386 }
0x124b   :  { %v1388_v29 = vrot.slane %v1387_v23, 4 }
0x124d   :  { %v1389_v4 = vmax.f32 %v1387_v23, %v1388_v29 }
0x124f   :  { %v1390_v52 = vrot.slane %v1389_v4, 2 }
0x1251   :  { %v1391_v10 = vmax.f32 %v1389_v4, %v1390_v52 }
0x1253   :  { %v1392_v38 = vrot.slane %v1391_v10, 1 }
0x1255   :  { %v1393_v45 = vmax.f32 %v1391_v10, %v1392_v38 }
0x1257   :  { %2347 = vpush %v1393_v45 }
0x1288   :  { %s2348_s24 = spop %2347 }
0x1289   :  { %v1395_v61 = vstv %s2348_s24 }
0x128a   :  { %vm1396_vm9 = vcmp.eq.f32.partialorder %v1381_v62, %v1395_v61  ;;  %vm1397_vm10 = vcmp.eq.f32.partialorder %v1382_v17, %v1395_v61 }
0x128b   :  { %v1398_v27 = vsel %vm1396_vm9, %v3451_v8, 256  ;;  %v1399_v40 = vsel %vm1397_vm10, %v3454_v22, 256 }
0x128c   :  { %v1400_v44 = vsel %vm950_vm4, %v1398_v27, 2147483647  ;;  %v1401_v48 = vsel %vm950_vm4, %v1399_v40, 2147483647 }
0x128d   :  { %vm1402_vm15 = vcmp.lt.s32.totalorder %v1400_v44, %v1401_v48 }
0x128e   :  { %v1403_v6 = vsel %vm1402_vm15, %v1400_v44, %v1401_v48 }
0x128f   :  { %v1405_v51 = vshra.s32 %v1403_v6, 16  ;;  %v1404_v18 = vand.u32 65535, %v1403_v6 }
0x1291   :  { %v1407_v54 = vcvt.s32.f32 %v1405_v51  ;;  %v1406_v55 = vcvt.s32.f32 %v1404_v18 }
0x1293   :  { %1408 = vmin.xlane.f32.xlu1 %v1407_v54 }
0x1306   :  { %v1409_v20 = vpop.xlane.xlu1 %1408 }
0x1307   :  { %vm1410_vm2 = vcmp.eq.f32.partialorder %v1407_v54, %v1409_v20  ;;  %v1415_v57 = vcvt.f32.s32 %v1409_v20 }
0x1308   :  { %v1411_v63 = vsel %vm1410_vm2, %v1406_v55, inf }
0x1309   :  { %1412 = vmin.xlane.f32.xlu2 %v1411_v63  ;;  %v1416_v60 = vshll.u32 %v1415_v57, 16 }
0x137c   :  { %v1413_v12 = vpop.xlane.xlu2 %1412 }
0x137d   :  { %v1414_v24 = vcvt.f32.s32 %v1413_v12  ;;  %v3578_v12 = vadd.s32 8, %v3469_v14 }
0x137f   :  { %v1417_v49 = vadd.s32 %v1416_v60, %v1414_v24 }
0x1381   :  { %v1418_v13 = vrot.slane %v1417_v49, 4 }
0x1383   :  { %vm1419_vm3 = vcmp.lt.s32.totalorder %v1417_v49, %v1418_v13 }
0x1384   :  { %v1420_v16 = vsel %vm1419_vm3, %v1417_v49, %v1418_v13 }
0x1385   :  { %v1421_v26 = vrot.slane %v1420_v16, 2 }
0x1387   :  { %vm1422_vm5 = vcmp.lt.s32.totalorder %v1420_v16, %v1421_v26 }
0x1388   :  { %v1423_v47 = vsel %vm1422_vm5, %v1420_v16, %v1421_v26 }
0x1389   :  { %v1424_v25 = vrot.slane %v1423_v47, 1 }
0x138b   :  { %vm1425_vm8 = vcmp.lt.s32.totalorder %v1423_v47, %v1424_v25 }
0x138c   :  { %v1426_v2 = vsel %vm1425_vm8, %v1423_v47, %v1424_v25 }
0x138d   :  { %2349 = vpush %v1426_v2 }
0x13be   :  { %s2350_s25 = spop %2349 }
0x13bf   :  { %v3555_v0 = vstv %s2350_s25 }
0x13c0   :  { %vm1433_vm9 = vcmp.eq.s32.totalorder %v3451_v8, %v3555_v0  ;;  %vm1434_vm10 = vcmp.eq.s32.totalorder %v3454_v22, %v3555_v0 }
0x13c1   :  { %v1435_v59 = vsel %vm1433_vm9, -inf, %v1381_v62  ;;  %v1436_v53 = vsel %vm1434_vm10, -inf, %v1382_v17 }
0x13c2   :  { %v1437_v32 = vsel %vm950_vm4, %v1435_v59, -inf  ;;  %v1438_v56 = vsel %vm950_vm4, %v1436_v53, -inf }
0x13c3   :  { %v1439_v35 = vmax.f32 %v1437_v32, %v1438_v56 }
0x13c5   :  { %1440 = vmax.xlane.f32.xlu0 %v1439_v35 }
0x13cd   :  { %1560 = vmax.xlane.f32.xlu0 %v1559_v11 }
0x1438   :  { %v1441_v58 = vpop.xlane.xlu0 %1440 }
0x1439   :  { %v1442_v7 = vrot.slane %v1441_v58, 4 }
0x143b   :  { %v1443_v31 = vmax.f32 %v1441_v58, %v1442_v7 }
0x143d   :  { %v1444_v43 = vrot.slane %v1443_v31, 2 }
0x143f   :  { %v1445_v3 = vmax.f32 %v1443_v31, %v1444_v43 }
0x1440   :  { %v1561_v4 = vpop.xlane.xlu0 %1560 }
0x1441   :  { %v1446_v28 = vrot.slane %v1445_v3, 1  ;;  %v1562_v52 = vrot.slane %v1561_v4, 4 }
0x1443   :  { %v1447_v21 = vmax.f32 %v1445_v3, %v1446_v28  ;;  %v1563_v38 = vmax.f32 %v1561_v4, %v1562_v52 }
0x1445   :  { %2351 = vpush %v1447_v21  ;;  %v1564_v44 = vrot.slane %v1563_v38, 2 }
0x1447   :  { %v1565_v51 = vmax.f32 %v1563_v38, %v1564_v44 }
0x1449   :  { %v1566_v20 = vrot.slane %v1565_v51, 1 }
0x144b   :  { %v1567_v57 = vmax.f32 %v1565_v51, %v1566_v20 }
0x1476   :  { %s2352_s26 = spop %2351 }
0x1477   :  { %v1449_v9 = vstv %s2352_s26  ;;  %s2430_s26 = smov [#allocation3]  }
0x1478   :  { %vm1450_vm15 = vcmp.eq.f32.partialorder %v1435_v59, %v1449_v9  ;;  %vm1451_vm2 = vcmp.eq.f32.partialorder %v1436_v53, %v1449_v9 }
0x1479   :  { %v1452_v33 = vsel %vm1450_vm15, %v3451_v8, 256  ;;  %v1453_v41 = vsel %vm1451_vm2, %v3454_v22, 256  ;;  %vm1429_vm15 = vcmp.eq.s32.totalorder %v3578_v12, 8  ;;  %vm3791_vm2 = vcmp.eq.s32.totalorder %v3578_v12, 9 }
0x147a   :  { %v1454_v34 = vsel %vm950_vm4, %v1452_v33, 2147483647  ;;  %v1455_v36 = vsel %vm950_vm4, %v1453_v41, 2147483647  ;;  %v1432_v60 = vsel %vm1429_vm15, %v3555_v0, 0 }
0x147b   :  { %vm1456_vm3 = vcmp.lt.s32.totalorder %v1454_v34, %v1455_v36 }
0x147c   :  { %v1457_v62 = vsel %vm1456_vm3, %v1454_v34, %v1455_v36 }
0x147d   :  { %v1459_v17 = vshra.s32 %v1457_v62, 16  ;;  %v1458_v1 = vand.u32 65535, %v1457_v62 }
0x147f   :  { %v1461_v39 = vcvt.s32.f32 %v1459_v17  ;;  %v1460_v23 = vcvt.s32.f32 %v1458_v1 }
0x1481   :  { %1462 = vmin.xlane.f32.xlu1 %v1461_v39 }
0x14f4   :  { %v1463_v15 = vpop.xlane.xlu1 %1462 }
0x14f5   :  { %vm1464_vm5 = vcmp.eq.f32.partialorder %v1461_v39, %v1463_v15  ;;  %v1469_v10 = vcvt.f32.s32 %v1463_v15 }
0x14f6   :  { %v1465_v29 = vsel %vm1464_vm5, %v1460_v23, inf }
0x14f7   :  { %1466 = vmin.xlane.f32.xlu2 %v1465_v29  ;;  %v1470_v61 = vshll.u32 %v1469_v10, 16 }
0x156a   :  { %v1467_v45 = vpop.xlane.xlu2 %1466 }
0x156b   :  { %v1468_v27 = vcvt.f32.s32 %v1467_v45 }
0x156d   :  { %v1471_v40 = vadd.s32 %v1470_v61, %v1468_v27 }
0x156f   :  { %v1472_v48 = vrot.slane %v1471_v40, 4 }
0x1571   :  { %vm1473_vm8 = vcmp.lt.s32.totalorder %v1471_v40, %v1472_v48 }
0x1572   :  { %v1474_v6 = vsel %vm1473_vm8, %v1471_v40, %v1472_v48 }
0x1573   :  { %v1475_v54 = vrot.slane %v1474_v6, 2 }
0x1575   :  { %vm1476_vm9 = vcmp.lt.s32.totalorder %v1474_v6, %v1475_v54 }
0x1576   :  { %v1477_v18 = vsel %vm1476_vm9, %v1474_v6, %v1475_v54 }
0x1577   :  { %v1478_v55 = vrot.slane %v1477_v18, 1 }
0x1579   :  { %vm1479_vm10 = vcmp.lt.s32.totalorder %v1477_v18, %v1478_v55 }
0x157a   :  { %v1480_v63 = vsel %vm1479_vm10, %v1477_v18, %v1478_v55 }
0x157b   :  { %2353 = vpush %v1480_v63 }
0x157c   :  { %2355 = vpush %v1567_v57 }
0x15ac   :  { %s2354_s27 = spop %2353 }
0x15ad   :  { %v1484_v24 = vstv %s2354_s27  ;;  %s2356_s28 = spop %2355  ;;  %s2147_s27 = sshll.u32 %s2430_s26, 4  ;;  %s2148_s27 = int_to_ptr.vmem [resolvable:$true] %s2147_s27 }
0x15ae   :  { %v1569_v49 = vstv %s2356_s28  ;;  %v1486_v13 = vsel %vm3791_vm2, %v1484_v24, %v1432_v60 }
0x15af   :  { %vm1570_vm3 = vcmp.eq.f32.partialorder %v3567_v46, %v1569_v49  ;;  %vm1571_vm5 = vcmp.eq.f32.partialorder %v3564_v42, %v1569_v49  ;;  %vm1489_vm8 = vcmp.eq.s32.totalorder %v3451_v8, %v1486_v13  ;;  %vm1490_vm9 = vcmp.eq.s32.totalorder %v3454_v22, %v1486_v13 }
0x15b0   :  { %v1572_v16 = vsel %vm1570_vm3, %v3451_v8, 256  ;;  %v1573_v26 = vsel %vm1571_vm5, %v3454_v22, 256  ;;  %2300 = vmatmul.msk.f32.gmra.mxu3 %vm1489_vm8, %v2428_v5  ;;  %2302 = vmatmul.msk.f32.gmra.mxu1 %vm1490_vm9, %v2428_v5 }
0x15b1   :  { %v1574_v47 = vsel %vm950_vm4, %v1572_v16, 2147483647  ;;  %v1575_v25 = vsel %vm950_vm4, %v1573_v26, 2147483647 }
0x15b2   :  { %vm1576_vm10 = vcmp.lt.s32.totalorder %v1574_v47, %v1575_v25 }
0x15b3   :  { %v1577_v2 = vsel %vm1576_vm10, %v1574_v47, %v1575_v25 }
0x15b4   :  { %v1579_v0 = vshra.s32 %v1577_v2, 16  ;;  %v1578_v59 = vand.u32 65535, %v1577_v2 }
0x15b6   :  { %v1581_v30 = vcvt.s32.f32 %v1579_v0  ;;  %v1580_v32 = vcvt.s32.f32 %v1578_v59 }
0x15b8   :  { %1582 = vmin.xlane.f32.xlu1 %v1581_v30 }
0x162b   :  { %v1583_v53 = vpop.xlane.xlu1 %1582 }
0x162c   :  { %vm1584_vm2 = vcmp.eq.f32.partialorder %v1581_v30, %v1583_v53  ;;  %v1589_v50 = vcvt.f32.s32 %v1583_v53 }
0x162d   :  { %v1585_v56 = vsel %vm1584_vm2, %v1580_v32, inf }
0x162e   :  { %1586 = vmin.xlane.f32.xlu2 %v1585_v56  ;;  %v1590_v37 = vshll.u32 %v1589_v50, 16 }
0x16a1   :  { %v1587_v35 = vpop.xlane.xlu2 %1586 }
0x16a2   :  { %v1588_v19 = vcvt.f32.s32 %v1587_v35 }
0x16a4   :  { %v1591_v11 = vadd.s32 %v1590_v37, %v1588_v19 }
0x16a6   :  { %v1592_v58 = vrot.slane %v1591_v11, 4 }
0x16a8   :  { %vm1593_vm3 = vcmp.lt.s32.totalorder %v1591_v11, %v1592_v58 }
0x16a9   :  { %v1594_v7 = vsel %vm1593_vm3, %v1591_v11, %v1592_v58 }
0x16aa   :  { %v1595_v31 = vrot.slane %v1594_v7, 2 }
0x16ac   :  { %vm1596_vm5 = vcmp.lt.s32.totalorder %v1594_v7, %v1595_v31 }
0x16ad   :  { %v1597_v43 = vsel %vm1596_vm5, %v1594_v7, %v1595_v31 }
0x16ae   :  { %v1598_v3 = vrot.slane %v1597_v43, 1 }
0x16b0   :  { %vm1599_vm8 = vcmp.lt.s32.totalorder %v1597_v43, %v1598_v3 }
0x16b1   :  { %v1600_v28 = vsel %vm1599_vm8, %v1597_v43, %v1598_v3 }
0x16b2   :  { %2357 = vpush %v1600_v28 }
0x16e3   :  { %s2358_s29 = spop %2357 }
0x16e4   :  { %v1602_v21 = vstv %s2358_s29 }
0x16e5   :  { %vm1605_vm2 = vcmp.eq.s32.totalorder %v3451_v8, %v1602_v21  ;;  %vm1606_vm9 = vcmp.eq.s32.totalorder %v3454_v22, %v1602_v21  ;;  %v1603_v13 = vsel %vm996_vm6, %v1602_v21, 0 }
0x16e6   :  { %v1607_v9 = vsel %vm1605_vm2, -inf, %v3567_v46  ;;  %v1608_v33 = vsel %vm1606_vm9, -inf, %v3564_v42 }
0x16e7   :  { %v1609_v41 = vsel %vm950_vm4, %v1607_v9, -inf  ;;  %v1610_v34 = vsel %vm950_vm4, %v1608_v33, -inf }
0x16e8   :  { %v1611_v36 = vmax.f32 %v1609_v41, %v1610_v34 }
0x16ea   :  { %1612 = vmax.xlane.f32.xlu0 %v1611_v36 }
0x175d   :  { %v1613_v62 = vpop.xlane.xlu0 %1612 }
0x175e   :  { %v1614_v17 = vrot.slane %v1613_v62, 4 }
0x1760   :  { %v1615_v39 = vmax.f32 %v1613_v62, %v1614_v17 }
0x1762   :  { %v1616_v1 = vrot.slane %v1615_v39, 2 }
0x1764   :  { %v1617_v15 = vmax.f32 %v1615_v39, %v1616_v1 }
0x1766   :  { %v1618_v23 = vrot.slane %v1617_v15, 1 }
0x1768   :  { %v1619_v29 = vmax.f32 %v1617_v15, %v1618_v23 }
0x176a   :  { %2359 = vpush %v1619_v29 }
0x179b   :  { %s2360_s30 = spop %2359 }
0x179c   :  { %v1621_v4 = vstv %s2360_s30  ;;  %s2149_s30 = sshll.u32 %s3733_s6, 4  ;;  %s2150_s30 = int_to_ptr.hbm [resolvable:$true] %s2149_s30 }
0x179d   :  { %vm1622_vm10 = vcmp.eq.f32.partialorder %v1607_v9, %v1621_v4  ;;  %vm1623_vm3 = vcmp.eq.f32.partialorder %v1608_v33, %v1621_v4  ;;  %2152 = dma.vmem_to_hbm [thread:$0]  %s2148_s27, 32, %s2150_s30, [#allocation4]  }
0x179e   :  { %v1624_v42 = vsel %vm1622_vm10, %v3451_v8, 256  ;;  %v1625_v46 = vsel %vm1623_vm3, %v3454_v22, 256 }
0x179f   :  { %v1626_v52 = vsel %vm950_vm4, %v1624_v42, 2147483647  ;;  %v1627_v10 = vsel %vm950_vm4, %v1625_v46, 2147483647 }
0x17a0   :  { %vm1628_vm5 = vcmp.lt.s32.totalorder %v1626_v52, %v1627_v10 }
0x17a1   :  { %v1629_v38 = vsel %vm1628_vm5, %v1626_v52, %v1627_v10 }
0x17a2   :  { %v1631_v45 = vshra.s32 %v1629_v38, 16  ;;  %v1630_v27 = vand.u32 65535, %v1629_v38 }
0x17a4   :  { %v1633_v61 = vcvt.s32.f32 %v1631_v45  ;;  %v1632_v44 = vcvt.s32.f32 %v1630_v27 }
0x17a6   :  { %1634 = vmin.xlane.f32.xlu1 %v1633_v61 }
0x1819   :  { %v1635_v40 = vpop.xlane.xlu1 %1634 }
0x181a   :  { %vm1636_vm8 = vcmp.eq.f32.partialorder %v1633_v61, %v1635_v40  ;;  %v1641_v6 = vcvt.f32.s32 %v1635_v40 }
0x181b   :  { %v1637_v48 = vsel %vm1636_vm8, %v1632_v44, inf }
0x181c   :  { %1638 = vmin.xlane.f32.xlu2 %v1637_v48  ;;  %v1642_v54 = vshll.u32 %v1641_v6, 16 }
0x188f   :  { %v1639_v51 = vpop.xlane.xlu2 %1638 }
0x1890   :  { %v1640_v18 = vcvt.f32.s32 %v1639_v51 }
0x1892   :  { %v1643_v20 = vadd.s32 %v1642_v54, %v1640_v18 }
0x1894   :  { %v1644_v55 = vrot.slane %v1643_v20, 4 }
0x1896   :  { %vm1645_vm2 = vcmp.lt.s32.totalorder %v1643_v20, %v1644_v55 }
0x1897   :  { %v1646_v63 = vsel %vm1645_vm2, %v1643_v20, %v1644_v55 }
0x1898   :  { %v1647_v57 = vrot.slane %v1646_v63, 2 }
0x189a   :  { %vm1648_vm9 = vcmp.lt.s32.totalorder %v1646_v63, %v1647_v57 }
0x189b   :  { %v1649_v60 = vsel %vm1648_vm9, %v1646_v63, %v1647_v57 }
0x189c   :  { %v1650_v24 = vrot.slane %v1649_v60, 1 }
0x189e   :  { %vm1651_vm10 = vcmp.lt.s32.totalorder %v1649_v60, %v1650_v24 }
0x189f   :  { %v1652_v49 = vsel %vm1651_vm10, %v1649_v60, %v1650_v24 }
0x18a0   :  { %2361 = vpush %v1652_v49 }
0x18d1   :  { %s2362_s2 = spop %2361 }
0x18d2   :  { %v1654_v16 = vstv %s2362_s2 }
0x18d3   :  { %v1655_v26 = vsel %vm1050_vm7, %v1654_v16, %v1603_v13  ;;  %vm1657_vm3 = vcmp.eq.s32.totalorder %v3451_v8, %v1654_v16  ;;  %vm1658_vm5 = vcmp.eq.s32.totalorder %v3454_v22, %v1654_v16 }
0x18d4   :  { %v1659_v47 = vsel %vm1657_vm3, -inf, %v1607_v9  ;;  %v1660_v25 = vsel %vm1658_vm5, -inf, %v1608_v33 }
0x18d5   :  { %v1661_v2 = vsel %vm950_vm4, %v1659_v47, -inf  ;;  %v1662_v0 = vsel %vm950_vm4, %v1660_v25, -inf }
0x18d6   :  { %v1663_v30 = vmax.f32 %v1661_v2, %v1662_v0 }
0x18d8   :  { %1664 = vmax.xlane.f32.xlu0 %v1663_v30 }
0x194b   :  { %v1665_v59 = vpop.xlane.xlu0 %1664 }
0x194c   :  { %v1666_v53 = vrot.slane %v1665_v59, 4 }
0x194e   :  { %v1667_v32 = vmax.f32 %v1665_v59, %v1666_v53 }
0x1950   :  { %v1668_v56 = vrot.slane %v1667_v32, 2 }
0x1952   :  { %v1669_v50 = vmax.f32 %v1667_v32, %v1668_v56 }
0x1954   :  { %v1670_v35 = vrot.slane %v1669_v50, 1 }
0x1956   :  { %v1671_v37 = vmax.f32 %v1669_v50, %v1670_v35 }
0x1958   :  { %2363 = vpush %v1671_v37 }
0x1989   :  { %s2364_s8 = spop %2363 }
0x198a   :  { %v1673_v19 = vstv %s2364_s8 }
0x198b   :  { %vm1674_vm6 = vcmp.eq.f32.partialorder %v1659_v47, %v1673_v19  ;;  %vm1675_vm7 = vcmp.eq.f32.partialorder %v1660_v25, %v1673_v19 }
0x198c   :  { %v1676_v11 = vsel %vm1674_vm6, %v3451_v8, 256  ;;  %v1677_v58 = vsel %vm1675_vm7, %v3454_v22, 256 }
0x198d   :  { %v1678_v7 = vsel %vm950_vm4, %v1676_v11, 2147483647  ;;  %v1679_v31 = vsel %vm950_vm4, %v1677_v58, 2147483647 }
0x198e   :  { %vm1680_vm8 = vcmp.lt.s32.totalorder %v1678_v7, %v1679_v31 }
0x198f   :  { %v1681_v43 = vsel %vm1680_vm8, %v1678_v7, %v1679_v31 }
0x1990   :  { %v1683_v3 = vshra.s32 %v1681_v43, 16  ;;  %v1682_v21 = vand.u32 65535, %v1681_v43 }
0x1992   :  { %v1685_v28 = vcvt.s32.f32 %v1683_v3  ;;  %v1684_v33 = vcvt.s32.f32 %v1682_v21 }
0x1994   :  { %1686 = vmin.xlane.f32.xlu1 %v1685_v28 }
0x1a07   :  { %v1687_v9 = vpop.xlane.xlu1 %1686 }
0x1a08   :  { %vm1688_vm2 = vcmp.eq.f32.partialorder %v1685_v28, %v1687_v9  ;;  %v1693_v34 = vcvt.f32.s32 %v1687_v9 }
0x1a09   :  { %v1689_v41 = vsel %vm1688_vm2, %v1684_v33, inf }
0x1a0a   :  { %1690 = vmin.xlane.f32.xlu2 %v1689_v41  ;;  %v1694_v62 = vshll.u32 %v1693_v34, 16 }
0x1a7d   :  { %v1691_v36 = vpop.xlane.xlu2 %1690 }
0x1a7e   :  { %v1692_v17 = vcvt.f32.s32 %v1691_v36 }
0x1a80   :  { %v1695_v39 = vadd.s32 %v1694_v62, %v1692_v17 }
0x1a82   :  { %v1696_v1 = vrot.slane %v1695_v39, 4 }
0x1a84   :  { %vm1697_vm9 = vcmp.lt.s32.totalorder %v1695_v39, %v1696_v1 }
0x1a85   :  { %v1698_v15 = vsel %vm1697_vm9, %v1695_v39, %v1696_v1 }
0x1a86   :  { %v1699_v23 = vrot.slane %v1698_v15, 2 }
0x1a88   :  { %vm1700_vm10 = vcmp.lt.s32.totalorder %v1698_v15, %v1699_v23 }
0x1a89   :  { %v1701_v29 = vsel %vm1700_vm10, %v1698_v15, %v1699_v23 }
0x1a8a   :  { %v1702_v4 = vrot.slane %v1701_v29, 1 }
0x1a8c   :  { %vm1703_vm3 = vcmp.lt.s32.totalorder %v1701_v29, %v1702_v4 }
0x1a8d   :  { %v1704_v42 = vsel %vm1703_vm3, %v1701_v29, %v1702_v4 }
0x1a8e   :  { %2365 = vpush %v1704_v42 }
0x1abf   :  { %s2366_s0 = spop %2365 }
0x1ac0   :  { %v1706_v46 = vstv %s2366_s0 }
0x1ac1   :  { %v1707_v52 = vsel %vm1104_vm1, %v1706_v46, %v1655_v26  ;;  %vm1709_vm5 = vcmp.eq.s32.totalorder %v3451_v8, %v1706_v46  ;;  %vm1710_vm6 = vcmp.eq.s32.totalorder %v3454_v22, %v1706_v46 }
0x1ac2   :  { %v1711_v10 = vsel %vm1709_vm5, -inf, %v1659_v47  ;;  %v1712_v38 = vsel %vm1710_vm6, -inf, %v1660_v25 }
0x1ac3   :  { %v1713_v45 = vsel %vm950_vm4, %v1711_v10, -inf  ;;  %v1714_v61 = vsel %vm950_vm4, %v1712_v38, -inf }
0x1ac4   :  { %v1715_v27 = vmax.f32 %v1713_v45, %v1714_v61 }
0x1ac6   :  { %1716 = vmax.xlane.f32.xlu0 %v1715_v27 }
0x1b39   :  { %v1717_v40 = vpop.xlane.xlu0 %1716 }
0x1b3a   :  { %v1718_v44 = vrot.slane %v1717_v40, 4 }
0x1b3c   :  { %v1719_v48 = vmax.f32 %v1717_v40, %v1718_v44 }
0x1b3e   :  { %v1720_v6 = vrot.slane %v1719_v48, 2 }
0x1b40   :  { %v1721_v51 = vmax.f32 %v1719_v48, %v1720_v6 }
0x1b42   :  { %v1722_v54 = vrot.slane %v1721_v51, 1 }
0x1b44   :  { %v1723_v18 = vmax.f32 %v1721_v51, %v1722_v54 }
0x1b46   :  { %2367 = vpush %v1723_v18 }
0x1b77   :  { %s2368_s4 = spop %2367 }
0x1b78   :  { %v1725_v20 = vstv %s2368_s4 }
0x1b79   :  { %vm1726_vm1 = vcmp.eq.f32.partialorder %v1711_v10, %v1725_v20  ;;  %vm1727_vm7 = vcmp.eq.f32.partialorder %v1712_v38, %v1725_v20 }
0x1b7a   :  { %v1728_v55 = vsel %vm1726_vm1, %v3451_v8, 256  ;;  %v1729_v63 = vsel %vm1727_vm7, %v3454_v22, 256 }
0x1b7b   :  { %v1730_v57 = vsel %vm950_vm4, %v1728_v55, 2147483647  ;;  %v1731_v60 = vsel %vm950_vm4, %v1729_v63, 2147483647 }
0x1b7c   :  { %vm1732_vm8 = vcmp.lt.s32.totalorder %v1730_v57, %v1731_v60 }
0x1b7d   :  { %v1733_v24 = vsel %vm1732_vm8, %v1730_v57, %v1731_v60 }
0x1b7e   :  { %v1735_v49 = vshra.s32 %v1733_v24, 16  ;;  %v1734_v16 = vand.u32 65535, %v1733_v24 }
0x1b80   :  { %v1737_v13 = vcvt.s32.f32 %v1735_v49  ;;  %v1736_v47 = vcvt.s32.f32 %v1734_v16 }
0x1b82   :  { %1738 = vmin.xlane.f32.xlu1 %v1737_v13 }
0x1bf5   :  { %v1739_v26 = vpop.xlane.xlu1 %1738 }
0x1bf6   :  { %vm1740_vm2 = vcmp.eq.f32.partialorder %v1737_v13, %v1739_v26  ;;  %v1745_v2 = vcvt.f32.s32 %v1739_v26 }
0x1bf7   :  { %v1741_v25 = vsel %vm1740_vm2, %v1736_v47, inf }
0x1bf8   :  { %1742 = vmin.xlane.f32.xlu2 %v1741_v25  ;;  %v1746_v30 = vshll.u32 %v1745_v2, 16 }
0x1c6b   :  { %v1743_v0 = vpop.xlane.xlu2 %1742 }
0x1c6c   :  { %v1744_v59 = vcvt.f32.s32 %v1743_v0 }
0x1c6e   :  { %v1747_v53 = vadd.s32 %v1746_v30, %v1744_v59 }
0x1c70   :  { %v1748_v32 = vrot.slane %v1747_v53, 4 }
0x1c72   :  { %vm1749_vm9 = vcmp.lt.s32.totalorder %v1747_v53, %v1748_v32 }
0x1c73   :  { %v1750_v56 = vsel %vm1749_vm9, %v1747_v53, %v1748_v32 }
0x1c74   :  { %v1751_v50 = vrot.slane %v1750_v56, 2 }
0x1c76   :  { %vm1752_vm10 = vcmp.lt.s32.totalorder %v1750_v56, %v1751_v50 }
0x1c77   :  { %v1753_v35 = vsel %vm1752_vm10, %v1750_v56, %v1751_v50 }
0x1c78   :  { %v1754_v37 = vrot.slane %v1753_v35, 1 }
0x1c7a   :  { %vm1755_vm3 = vcmp.lt.s32.totalorder %v1753_v35, %v1754_v37 }
0x1c7b   :  { %v1756_v19 = vsel %vm1755_vm3, %v1753_v35, %v1754_v37 }
0x1c7c   :  { %2369 = vpush %v1756_v19 }
0x1cad   :  { %s2370_s5 = spop %2369 }
0x1cae   :  { %v1758_v11 = vstv %s2370_s5 }
0x1caf   :  { %v1759_v58 = vsel %vm1158_vm14, %v1758_v11, %v1707_v52  ;;  %vm1761_vm5 = vcmp.eq.s32.totalorder %v3451_v8, %v1758_v11  ;;  %vm1762_vm6 = vcmp.eq.s32.totalorder %v3454_v22, %v1758_v11 }
0x1cb0   :  { %v1763_v7 = vsel %vm1761_vm5, -inf, %v1711_v10  ;;  %v1764_v31 = vsel %vm1762_vm6, -inf, %v1712_v38 }
0x1cb1   :  { %v1765_v43 = vsel %vm950_vm4, %v1763_v7, -inf  ;;  %v1766_v3 = vsel %vm950_vm4, %v1764_v31, -inf }
0x1cb2   :  { %v1767_v28 = vmax.f32 %v1765_v43, %v1766_v3 }
0x1cb4   :  { %1768 = vmax.xlane.f32.xlu0 %v1767_v28 }
0x1d27   :  { %v1769_v21 = vpop.xlane.xlu0 %1768 }
0x1d28   :  { %v1770_v9 = vrot.slane %v1769_v21, 4 }
0x1d2a   :  { %v1771_v33 = vmax.f32 %v1769_v21, %v1770_v9 }
0x1d2c   :  { %v1772_v41 = vrot.slane %v1771_v33, 2 }
0x1d2e   :  { %v1773_v34 = vmax.f32 %v1771_v33, %v1772_v41 }
0x1d30   :  { %v1774_v36 = vrot.slane %v1773_v34, 1 }
0x1d32   :  { %v1775_v62 = vmax.f32 %v1773_v34, %v1774_v36 }
0x1d34   :  { %2371 = vpush %v1775_v62 }
0x1d65   :  { %s2372_s1 = spop %2371 }
0x1d66   :  { %v1777_v17 = vstv %s2372_s1 }
0x1d67   :  { %vm1778_vm14 = vcmp.eq.f32.partialorder %v1763_v7, %v1777_v17  ;;  %vm1779_vm1 = vcmp.eq.f32.partialorder %v1764_v31, %v1777_v17 }
0x1d68   :  { %v1780_v39 = vsel %vm1778_vm14, %v3451_v8, 256  ;;  %v1781_v1 = vsel %vm1779_vm1, %v3454_v22, 256 }
0x1d69   :  { %v1782_v15 = vsel %vm950_vm4, %v1780_v39, 2147483647  ;;  %v1783_v23 = vsel %vm950_vm4, %v1781_v1, 2147483647 }
0x1d6a   :  { %vm1784_vm7 = vcmp.lt.s32.totalorder %v1782_v15, %v1783_v23 }
0x1d6b   :  { %v1785_v29 = vsel %vm1784_vm7, %v1782_v15, %v1783_v23 }
0x1d6c   :  { %v1787_v4 = vshra.s32 %v1785_v29, 16  ;;  %v1786_v46 = vand.u32 65535, %v1785_v29 }
0x1d6e   :  { %v1789_v42 = vcvt.s32.f32 %v1787_v4  ;;  %v1788_v10 = vcvt.s32.f32 %v1786_v46 }
0x1d70   :  { %1790 = vmin.xlane.f32.xlu1 %v1789_v42 }
0x1de3   :  { %v1791_v52 = vpop.xlane.xlu1 %1790 }
0x1de4   :  { %vm1792_vm8 = vcmp.eq.f32.partialorder %v1789_v42, %v1791_v52  ;;  %v1797_v45 = vcvt.f32.s32 %v1791_v52 }
0x1de5   :  { %v1793_v38 = vsel %vm1792_vm8, %v1788_v10, inf }
0x1de6   :  { %1794 = vmin.xlane.f32.xlu2 %v1793_v38  ;;  %v1798_v27 = vshll.u32 %v1797_v45, 16 }
0x1e59   :  { %v1795_v61 = vpop.xlane.xlu2 %1794 }
0x1e5a   :  { %v1796_v40 = vcvt.f32.s32 %v1795_v61 }
0x1e5c   :  { %v1799_v44 = vadd.s32 %v1798_v27, %v1796_v40 }
0x1e5e   :  { %v1800_v48 = vrot.slane %v1799_v44, 4 }
0x1e60   :  { %vm1801_vm2 = vcmp.lt.s32.totalorder %v1799_v44, %v1800_v48 }
0x1e61   :  { %v1802_v6 = vsel %vm1801_vm2, %v1799_v44, %v1800_v48 }
0x1e62   :  { %v1803_v51 = vrot.slane %v1802_v6, 2 }
0x1e64   :  { %vm1804_vm9 = vcmp.lt.s32.totalorder %v1802_v6, %v1803_v51 }
0x1e65   :  { %v1805_v54 = vsel %vm1804_vm9, %v1802_v6, %v1803_v51 }
0x1e66   :  { %v1806_v18 = vrot.slane %v1805_v54, 1 }
0x1e68   :  { %vm1807_vm10 = vcmp.lt.s32.totalorder %v1805_v54, %v1806_v18 }
0x1e69   :  { %v1808_v20 = vsel %vm1807_vm10, %v1805_v54, %v1806_v18 }
0x1e6a   :  { %2373 = vpush %v1808_v20 }
0x1e9b   :  { %s2374_s3 = spop %2373 }
0x1e9c   :  { %v1810_v55 = vstv %s2374_s3 }
0x1e9d   :  { %v1811_v63 = vsel %vm1212_vm12, %v1810_v55, %v1759_v58  ;;  %vm1813_vm3 = vcmp.eq.s32.totalorder %v3451_v8, %v1810_v55  ;;  %vm1814_vm5 = vcmp.eq.s32.totalorder %v3454_v22, %v1810_v55 }
0x1e9e   :  { %v1815_v57 = vsel %vm1813_vm3, -inf, %v1763_v7  ;;  %v1816_v60 = vsel %vm1814_vm5, -inf, %v1764_v31 }
0x1e9f   :  { %v1817_v24 = vsel %vm950_vm4, %v1815_v57, -inf  ;;  %v1818_v49 = vsel %vm950_vm4, %v1816_v60, -inf }
0x1ea0   :  { %v1819_v13 = vmax.f32 %v1817_v24, %v1818_v49 }
0x1ea2   :  { %1820 = vmax.xlane.f32.xlu0 %v1819_v13 }
0x1f15   :  { %v1821_v16 = vpop.xlane.xlu0 %1820 }
0x1f16   :  { %v1822_v26 = vrot.slane %v1821_v16, 4 }
0x1f18   :  { %v1823_v47 = vmax.f32 %v1821_v16, %v1822_v26 }
0x1f1a   :  { %v1824_v25 = vrot.slane %v1823_v47, 2 }
0x1f1c   :  { %v1825_v2 = vmax.f32 %v1823_v47, %v1824_v25 }
0x1f1e   :  { %v1826_v0 = vrot.slane %v1825_v2, 1 }
0x1f20   :  { %v1827_v30 = vmax.f32 %v1825_v2, %v1826_v0 }
0x1f22   :  { %2375 = vpush %v1827_v30 }
0x1f53   :  { %s2376_s9 = spop %2375 }
0x1f54   :  { %v1829_v59 = vstv %s2376_s9 }
0x1f55   :  { %vm1830_vm12 = vcmp.eq.f32.partialorder %v1815_v57, %v1829_v59  ;;  %vm1831_vm6 = vcmp.eq.f32.partialorder %v1816_v60, %v1829_v59 }
0x1f56   :  { %v1832_v53 = vsel %vm1830_vm12, %v3451_v8, 256  ;;  %v1833_v32 = vsel %vm1831_vm6, %v3454_v22, 256 }
0x1f57   :  { %v1834_v56 = vsel %vm950_vm4, %v1832_v53, 2147483647  ;;  %v1835_v50 = vsel %vm950_vm4, %v1833_v32, 2147483647 }
0x1f58   :  { %vm1836_vm14 = vcmp.lt.s32.totalorder %v1834_v56, %v1835_v50 }
0x1f59   :  { %v1837_v35 = vsel %vm1836_vm14, %v1834_v56, %v1835_v50 }
0x1f5a   :  { %v1839_v37 = vshra.s32 %v1837_v35, 16  ;;  %v1838_v11 = vand.u32 65535, %v1837_v35 }
0x1f5c   :  { %v1841_v19 = vcvt.s32.f32 %v1839_v37  ;;  %v1840_v7 = vcvt.s32.f32 %v1838_v11 }
0x1f5e   :  { %1842 = vmin.xlane.f32.xlu1 %v1841_v19 }
0x1fd1   :  { %v1843_v58 = vpop.xlane.xlu1 %1842 }
0x1fd2   :  { %vm1844_vm1 = vcmp.eq.f32.partialorder %v1841_v19, %v1843_v58  ;;  %v1849_v43 = vcvt.f32.s32 %v1843_v58 }
0x1fd3   :  { %v1845_v31 = vsel %vm1844_vm1, %v1840_v7, inf }
0x1fd4   :  { %1846 = vmin.xlane.f32.xlu2 %v1845_v31  ;;  %v1850_v28 = vshll.u32 %v1849_v43, 16 }
0x2047   :  { %v1847_v3 = vpop.xlane.xlu2 %1846 }
0x2048   :  { %v1848_v21 = vcvt.f32.s32 %v1847_v3 }
0x204a   :  { %v1851_v9 = vadd.s32 %v1850_v28, %v1848_v21 }
0x204c   :  { %v1852_v33 = vrot.slane %v1851_v9, 4 }
0x204e   :  { %vm1853_vm7 = vcmp.lt.s32.totalorder %v1851_v9, %v1852_v33 }
0x204f   :  { %v1854_v41 = vsel %vm1853_vm7, %v1851_v9, %v1852_v33 }
0x2050   :  { %v1855_v34 = vrot.slane %v1854_v41, 2 }
0x2052   :  { %vm1856_vm8 = vcmp.lt.s32.totalorder %v1854_v41, %v1855_v34 }
0x2053   :  { %v1857_v36 = vsel %vm1856_vm8, %v1854_v41, %v1855_v34 }
0x2054   :  { %v1858_v62 = vrot.slane %v1857_v36, 1 }
0x2056   :  { %vm1859_vm2 = vcmp.lt.s32.totalorder %v1857_v36, %v1858_v62 }
0x2057   :  { %v1860_v17 = vsel %vm1859_vm2, %v1857_v36, %v1858_v62 }
0x2058   :  { %2377 = vpush %v1860_v17 }
0x2089   :  { %s2378_s10 = spop %2377 }
0x208a   :  { %v1862_v39 = vstv %s2378_s10 }
0x208b   :  { %v1863_v1 = vsel %vm1266_vm11, %v1862_v39, %v1811_v63  ;;  %vm1865_vm9 = vcmp.eq.s32.totalorder %v3451_v8, %v1862_v39  ;;  %vm1866_vm10 = vcmp.eq.s32.totalorder %v3454_v22, %v1862_v39 }
0x208c   :  { %v1867_v15 = vsel %vm1865_vm9, -inf, %v1815_v57  ;;  %v1868_v23 = vsel %vm1866_vm10, -inf, %v1816_v60 }
0x208d   :  { %v1869_v29 = vsel %vm950_vm4, %v1867_v15, -inf  ;;  %v1870_v4 = vsel %vm950_vm4, %v1868_v23, -inf }
0x208e   :  { %v1871_v42 = vmax.f32 %v1869_v29, %v1870_v4 }
0x2090   :  { %1872 = vmax.xlane.f32.xlu0 %v1871_v42 }
0x2103   :  { %v1873_v46 = vpop.xlane.xlu0 %1872 }
0x2104   :  { %v1874_v52 = vrot.slane %v1873_v46, 4 }
0x2106   :  { %v1875_v10 = vmax.f32 %v1873_v46, %v1874_v52 }
0x2108   :  { %v1876_v38 = vrot.slane %v1875_v10, 2 }
0x210a   :  { %v1877_v45 = vmax.f32 %v1875_v10, %v1876_v38 }
0x210c   :  { %v1878_v61 = vrot.slane %v1877_v45, 1 }
0x210e   :  { %v1879_v27 = vmax.f32 %v1877_v45, %v1878_v61 }
0x2110   :  { %2379 = vpush %v1879_v27 }
0x2141   :  { %s2380_s11 = spop %2379 }
0x2142   :  { %v1881_v40 = vstv %s2380_s11 }
0x2143   :  { %vm1882_vm11 = vcmp.eq.f32.partialorder %v1867_v15, %v1881_v40  ;;  %vm1883_vm3 = vcmp.eq.f32.partialorder %v1868_v23, %v1881_v40 }
0x2144   :  { %v1884_v44 = vsel %vm1882_vm11, %v3451_v8, 256  ;;  %v1885_v48 = vsel %vm1883_vm3, %v3454_v22, 256 }
0x2145   :  { %v1886_v6 = vsel %vm950_vm4, %v1884_v44, 2147483647  ;;  %v1887_v51 = vsel %vm950_vm4, %v1885_v48, 2147483647 }
0x2146   :  { %vm1888_vm5 = vcmp.lt.s32.totalorder %v1886_v6, %v1887_v51 }
0x2147   :  { %v1889_v54 = vsel %vm1888_vm5, %v1886_v6, %v1887_v51 }
0x2148   :  { %v1891_v18 = vshra.s32 %v1889_v54, 16  ;;  %v1890_v55 = vand.u32 65535, %v1889_v54 }
0x214a   :  { %v1893_v20 = vcvt.s32.f32 %v1891_v18  ;;  %v1892_v57 = vcvt.s32.f32 %v1890_v55 }
0x214c   :  { %1894 = vmin.xlane.f32.xlu1 %v1893_v20 }
0x21bf   :  { %v1895_v63 = vpop.xlane.xlu1 %1894 }
0x21c0   :  { %vm1896_vm12 = vcmp.eq.f32.partialorder %v1893_v20, %v1895_v63  ;;  %v1901_v24 = vcvt.f32.s32 %v1895_v63 }
0x21c1   :  { %v1897_v60 = vsel %vm1896_vm12, %v1892_v57, inf }
0x21c2   :  { %1898 = vmin.xlane.f32.xlu2 %v1897_v60  ;;  %v1902_v13 = vshll.u32 %v1901_v24, 16 }
0x2235   :  { %v1899_v49 = vpop.xlane.xlu2 %1898 }
0x2236   :  { %v1900_v16 = vcvt.f32.s32 %v1899_v49 }
0x2238   :  { %v1903_v26 = vadd.s32 %v1902_v13, %v1900_v16 }
0x223a   :  { %v1904_v47 = vrot.slane %v1903_v26, 4 }
0x223c   :  { %vm1905_vm6 = vcmp.lt.s32.totalorder %v1903_v26, %v1904_v47 }
0x223d   :  { %v1906_v25 = vsel %vm1905_vm6, %v1903_v26, %v1904_v47 }
0x223e   :  { %v1907_v2 = vrot.slane %v1906_v25, 2 }
0x2240   :  { %vm1908_vm14 = vcmp.lt.s32.totalorder %v1906_v25, %v1907_v2 }
0x2241   :  { %v1909_v0 = vsel %vm1908_vm14, %v1906_v25, %v1907_v2 }
0x2242   :  { %v1910_v30 = vrot.slane %v1909_v0, 1 }
0x2244   :  { %vm1911_vm1 = vcmp.lt.s32.totalorder %v1909_v0, %v1910_v30 }
0x2245   :  { %v1912_v59 = vsel %vm1911_vm1, %v1909_v0, %v1910_v30 }
0x2246   :  { %2381 = vpush %v1912_v59 }
0x2277   :  { %s2382_s12 = spop %2381 }
0x2278   :  { %v1914_v53 = vstv %s2382_s12 }
0x2279   :  { %v1915_v32 = vsel %vm1320_vm13, %v1914_v53, %v1863_v1  ;;  %vm1917_vm7 = vcmp.eq.s32.totalorder %v3451_v8, %v1914_v53  ;;  %vm1918_vm8 = vcmp.eq.s32.totalorder %v3454_v22, %v1914_v53 }
0x227a   :  { %v1919_v56 = vsel %vm1917_vm7, -inf, %v1867_v15  ;;  %v1920_v50 = vsel %vm1918_vm8, -inf, %v1868_v23 }
0x227b   :  { %v1921_v35 = vsel %vm950_vm4, %v1919_v56, -inf  ;;  %v1922_v37 = vsel %vm950_vm4, %v1920_v50, -inf }
0x227c   :  { %v1923_v19 = vmax.f32 %v1921_v35, %v1922_v37 }
0x227e   :  { %1924 = vmax.xlane.f32.xlu0 %v1923_v19 }
0x22f1   :  { %v1925_v11 = vpop.xlane.xlu0 %1924 }
0x22f2   :  { %v1926_v58 = vrot.slane %v1925_v11, 4 }
0x22f4   :  { %v1927_v7 = vmax.f32 %v1925_v11, %v1926_v58 }
0x22f6   :  { %v1928_v31 = vrot.slane %v1927_v7, 2 }
0x22f8   :  { %v1929_v43 = vmax.f32 %v1927_v7, %v1928_v31 }
0x22fa   :  { %v1930_v3 = vrot.slane %v1929_v43, 1 }
0x22fc   :  { %v1931_v28 = vmax.f32 %v1929_v43, %v1930_v3 }
0x22fe   :  { %2383 = vpush %v1931_v28 }
0x232f   :  { %s2384_s13 = spop %2383 }
0x2330   :  { %v1933_v21 = vstv %s2384_s13 }
0x2331   :  { %vm1934_vm13 = vcmp.eq.f32.partialorder %v1919_v56, %v1933_v21  ;;  %vm1935_vm2 = vcmp.eq.f32.partialorder %v1920_v50, %v1933_v21 }
0x2332   :  { %v1936_v9 = vsel %vm1934_vm13, %v3451_v8, 256  ;;  %v1937_v33 = vsel %vm1935_vm2, %v3454_v22, 256 }
0x2333   :  { %v1938_v41 = vsel %vm950_vm4, %v1936_v9, 2147483647  ;;  %v1939_v34 = vsel %vm950_vm4, %v1937_v33, 2147483647 }
0x2334   :  { %vm1940_vm9 = vcmp.lt.s32.totalorder %v1938_v41, %v1939_v34 }
0x2335   :  { %v1941_v36 = vsel %vm1940_vm9, %v1938_v41, %v1939_v34 }
0x2336   :  { %v1943_v62 = vshra.s32 %v1941_v36, 16  ;;  %v1942_v39 = vand.u32 65535, %v1941_v36 }
0x2338   :  { %v1945_v17 = vcvt.s32.f32 %v1943_v62  ;;  %v1944_v15 = vcvt.s32.f32 %v1942_v39  ;;  %v1516_v62 = vpop.f32.mrf.mxu3 }
0x233a   :  { %1946 = vmin.xlane.f32.xlu1 %v1945_v17 }
0x23ad   :  { %v1947_v1 = vpop.xlane.xlu1 %1946 }
0x23ae   :  { %vm1948_vm10 = vcmp.eq.f32.partialorder %v1945_v17, %v1947_v1  ;;  %v1953_v29 = vcvt.f32.s32 %v1947_v1  ;;  %v1539_v17 = vpop.f32.mrf.mxu1 }
0x23af   :  { %v1949_v23 = vsel %vm1948_vm10, %v1944_v15, inf  ;;  %v1540_v39 = vadd.f32 %v1539_v17, %v1516_v62 }
0x23b0   :  { %1950 = vmin.xlane.f32.xlu2 %v1949_v23  ;;  %v1954_v42 = vshll.u32 %v1953_v29, 16 }
0x2423   :  { %v1951_v4 = vpop.xlane.xlu2 %1950 }
0x2424   :  { %v1952_v46 = vcvt.f32.s32 %v1951_v4 }
0x2426   :  { %v1955_v52 = vadd.s32 %v1954_v42, %v1952_v46 }
0x2428   :  { %v1956_v10 = vrot.slane %v1955_v52, 4 }
0x242a   :  { %vm1957_vm11 = vcmp.lt.s32.totalorder %v1955_v52, %v1956_v10 }
0x242b   :  { %v1958_v38 = vsel %vm1957_vm11, %v1955_v52, %v1956_v10 }
0x242c   :  { %v1959_v45 = vrot.slane %v1958_v38, 2 }
0x242e   :  { %vm1960_vm3 = vcmp.lt.s32.totalorder %v1958_v38, %v1959_v45 }
0x242f   :  { %v1961_v61 = vsel %vm1960_vm3, %v1958_v38, %v1959_v45 }
0x2430   :  { %v1962_v27 = vrot.slane %v1961_v61, 1 }
0x2432   :  { %vm1963_vm5 = vcmp.lt.s32.totalorder %v1961_v61, %v1962_v27 }
0x2433   :  { %v1964_v40 = vsel %vm1963_vm5, %v1961_v61, %v1962_v27  ;;  %vm1553_vm5 = vcmask 64512  }
0x2434   :  { %2385 = vpush %v1964_v40 }
0x2465   :  { %s2386_s14 = spop %2385 }
0x2466   :  { %v1966_v44 = vstv %s2386_s14 }
0x2467   :  { %v1967_v48 = vsel %vm1374_vm0, %v1966_v44, %v1915_v32  ;;  %vm1969_vm12 = vcmp.eq.s32.totalorder %v3451_v8, %v1966_v44  ;;  %vm1970_vm6 = vcmp.eq.s32.totalorder %v3454_v22, %v1966_v44 }
0x2468   :  { %v1971_v6 = vsel %vm1969_vm12, -inf, %v1919_v56  ;;  %v1972_v51 = vsel %vm1970_vm6, -inf, %v1920_v50  ;;  %vm2073_vm14 = vcmp.eq.s32.totalorder %v3451_v8, %v1967_v48  ;;  %vm2074_vm1 = vcmp.eq.s32.totalorder %v3454_v22, %v1967_v48 }
0x2469   :  { %2307 = vmatmul.msk.f32.vlgmr.msrb.gmra.mxu3 %vm2073_vm14, %v2428_v5  ;;  %2309 = vmatmul.msk.f32.vlgmr.msrb.gmra.mxu1 %vm2074_vm1, %v2428_v5  ;;  %v1973_v54 = vsel %vm950_vm4, %v1971_v6, -inf  ;;  %v1974_v18 = vsel %vm950_vm4, %v1972_v51, -inf }
0x246a   :  { %v1975_v14 = vmax.f32 %v1973_v54, %v1974_v18 }
0x246c   :  { %1976 = vmax.xlane.f32.xlu0 %v1975_v14 }
0x24df   :  { %v1977_v20 = vpop.xlane.xlu0 %1976 }
0x24e0   :  { %v1978_v55 = vrot.slane %v1977_v20, 4 }
0x24e2   :  { %v1979_v63 = vmax.f32 %v1977_v20, %v1978_v55 }
0x24e4   :  { %v1980_v57 = vrot.slane %v1979_v63, 2 }
0x24e6   :  { %v1981_v60 = vmax.f32 %v1979_v63, %v1980_v57 }
0x24e8   :  { %v1982_v24 = vrot.slane %v1981_v60, 1 }
0x24ea   :  { %v1983_v49 = vmax.f32 %v1981_v60, %v1982_v24 }
0x24ec   :  { %2387 = vpush %v1983_v49 }
0x251d   :  { %s2388_s15 = spop %2387 }
0x251e   :  { %v1985_v13 = vstv %s2388_s15 }
0x251f   :  { %vm1986_vm0 = vcmp.eq.f32.partialorder %v1971_v6, %v1985_v13  ;;  %vm1987_vm7 = vcmp.eq.f32.partialorder %v1972_v51, %v1985_v13 }
0x2520   :  { %v1988_v16 = vsel %vm1986_vm0, %v3451_v8, 256  ;;  %v1989_v26 = vsel %vm1987_vm7, %v3454_v22, 256  ;;  %vm1555_vm0 = vcmask 58368  }
0x2521   :  { %v1990_v47 = vsel %vm950_vm4, %v1988_v16, 2147483647  ;;  %v1991_v25 = vsel %vm950_vm4, %v1989_v26, 2147483647 }
0x2522   :  { %vm1992_vm8 = vcmp.lt.s32.totalorder %v1990_v47, %v1991_v25 }
0x2523   :  { %v1993_v2 = vsel %vm1992_vm8, %v1990_v47, %v1991_v25 }
0x2524   :  { %v1995_v0 = vshra.s32 %v1993_v2, 16  ;;  %v1994_v59 = vand.u32 65535, %v1993_v2 }
0x2526   :  { %v1997_v30 = vcvt.s32.f32 %v1995_v0  ;;  %v1996_v32 = vcvt.s32.f32 %v1994_v59 }
0x2528   :  { %1998 = vmin.xlane.f32.xlu1 %v1997_v30 }
0x259b   :  { %v1999_v53 = vpop.xlane.xlu1 %1998 }
0x259c   :  { %vm2000_vm13 = vcmp.eq.f32.partialorder %v1997_v30, %v1999_v53  ;;  %v2005_v50 = vcvt.f32.s32 %v1999_v53 }
0x259d   :  { %v2001_v56 = vsel %vm2000_vm13, %v1996_v32, inf  ;;  %vm3879_vm13 = vcmp.eq.s32.totalorder %v3578_v12, 9 }
0x259e   :  { %2002 = vmin.xlane.f32.xlu2 %v2001_v56  ;;  %v2006_v37 = vshll.u32 %v2005_v50, 16 }
0x2611   :  { %v2003_v35 = vpop.xlane.xlu2 %2002 }
0x2612   :  { %v2004_v19 = vcvt.f32.s32 %v2003_v35 }
0x2614   :  { %v2007_v11 = vadd.s32 %v2006_v37, %v2004_v19 }
0x2616   :  { %v2008_v58 = vrot.slane %v2007_v11, 4 }
0x2618   :  { %vm2009_vm2 = vcmp.lt.s32.totalorder %v2007_v11, %v2008_v58 }
0x2619   :  { %v2010_v7 = vsel %vm2009_vm2, %v2007_v11, %v2008_v58 }
0x261a   :  { %v2011_v31 = vrot.slane %v2010_v7, 2 }
0x261c   :  { %vm2012_vm9 = vcmp.lt.s32.totalorder %v2010_v7, %v2011_v31 }
0x261d   :  { %v2013_v43 = vsel %vm2012_vm9, %v2010_v7, %v2011_v31 }
0x261e   :  { %v2014_v3 = vrot.slane %v2013_v43, 1 }
0x2620   :  { %vm2015_vm10 = vcmp.lt.s32.totalorder %v2013_v43, %v2014_v3 }
0x2621   :  { %v2016_v28 = vsel %vm2015_vm10, %v2013_v43, %v2014_v3 }
0x2622   :  { %2389 = vpush %v2016_v28 }
0x2653   :  { %s2390_s16 = spop %2389 }
0x2654   :  { %v3683_v21 = vstv %s2390_s16 }
0x2655   :  { %vm2021_vm11 = vcmp.eq.s32.totalorder %v3451_v8, %v3683_v21  ;;  %vm2022_vm3 = vcmp.eq.s32.totalorder %v3454_v22, %v3683_v21  ;;  %v2020_v56 = vsel %vm1429_vm15, %v3683_v21, 0 }
0x2656   :  { %v2023_v9 = vsel %vm2021_vm11, -inf, %v1971_v6  ;;  %v2024_v33 = vsel %vm2022_vm3, -inf, %v1972_v51  ;;  %v1519_v6 = vpop.f32.mrf.mxu3  ;;  %v1542_v51 = vpop.f32.mrf.mxu1 }
0x2657   :  { %v2025_v41 = vsel %vm950_vm4, %v2023_v9, -inf  ;;  %v2026_v34 = vsel %vm950_vm4, %v2024_v33, -inf  ;;  %v1543_v54 = vadd.f32 %v1542_v51, %v1519_v6 }
0x2658   :  { %v2027_v36 = vmax.f32 %v2025_v41, %v2026_v34 }
0x265a   :  { %2028 = vmax.xlane.f32.xlu0 %v2027_v36 }
0x265e   :  { %v2102_v63 = vpop.f32.mrf.mxu3  ;;  %v2125_v57 = vpop.f32.mrf.mxu1 }
0x265f   :  { %v2126_v24 = vadd.f32 %v2125_v57, %v2102_v63 }
0x266e   :  { %1547 = vrot.lane.b32.xlu0 %v1540_v39, %s2429_s17 }
0x26cd   :  { %v2029_v1 = vpop.xlane.xlu0 %2028 }
0x26ce   :  { %v2030_v15 = vrot.slane %v2029_v1, 4 }
0x26d0   :  { %v2031_v23 = vmax.f32 %v2029_v1, %v2030_v15 }
0x26d2   :  { %v2032_v29 = vrot.slane %v2031_v23, 2 }
0x26d4   :  { %v2033_v4 = vmax.f32 %v2031_v23, %v2032_v29 }
0x26d6   :  { %v2034_v42 = vrot.slane %v2033_v4, 1 }
0x26d8   :  { %v2035_v46 = vmax.f32 %v2033_v4, %v2034_v42 }
0x26da   :  { %2391 = vpush %v2035_v46 }
0x26e0   :  { %v1548_v52 = vpop.permute.xlu0 %1547 }
0x26e1   :  { %1554 = vst.msk [vmem:[%s3734_s7] sm:$0xff] %vm1553_vm5, %v1548_v52 }
0x270b   :  { %s2392_s20 = spop %2391 }
0x270c   :  { %v2037_v10 = vstv %s2392_s20 }
0x270d   :  { %vm2038_vm12 = vcmp.eq.f32.partialorder %v2023_v9, %v2037_v10  ;;  %vm2039_vm6 = vcmp.eq.f32.partialorder %v2024_v33, %v2037_v10 }
0x270e   :  { %v2040_v38 = vsel %vm2038_vm12, %v3451_v8, 256  ;;  %v2041_v45 = vsel %vm2039_vm6, %v3454_v22, 256 }
0x270f   :  { %v2042_v61 = vsel %vm950_vm4, %v2040_v38, 2147483647  ;;  %v2043_v27 = vsel %vm950_vm4, %v2041_v45, 2147483647 }
0x2710   :  { %vm2044_vm14 = vcmp.lt.s32.totalorder %v2042_v61, %v2043_v27 }
0x2711   :  { %v2045_v40 = vsel %vm2044_vm14, %v2042_v61, %v2043_v27 }
0x2712   :  { %v2047_v44 = vshra.s32 %v2045_v40, 16  ;;  %v2046_v18 = vand.u32 65535, %v2045_v40 }
0x2714   :  { %v2049_v48 = vcvt.s32.f32 %v2047_v44  ;;  %v2048_v20 = vcvt.s32.f32 %v2046_v18 }
0x2716   :  { %2050 = vmin.xlane.f32.xlu1 %v2049_v48 }
0x272f   :  { %1549 = vrot.lane.b32.xlu1 %v1543_v54, %s2429_s17 }
0x2789   :  { %v2051_v14 = vpop.xlane.xlu1 %2050 }
0x278a   :  { %vm2052_vm1 = vcmp.eq.f32.partialorder %v2049_v48, %v2051_v14  ;;  %v2057_v49 = vcvt.f32.s32 %v2051_v14 }
0x278b   :  { %v2053_v55 = vsel %vm2052_vm1, %v2048_v20, inf }
0x278c   :  { %2054 = vmin.xlane.f32.xlu2 %v2053_v55  ;;  %v2058_v16 = vshll.u32 %v2057_v49, 16 }
0x27a1   :  { %v1550_v60 = vpop.permute.xlu1 %1549 }
0x27a2   :  { %1556 = vst.msk [vmem:[%s3734_s7 + $0x8] sm:$0x3] %vm1555_vm0, %v1550_v60 }
0x27a4   :  { %2133 = vrot.lane.b32.xlu2 %v2126_v24, %s2429_s17 }
0x27ff   :  { %v2055_v13 = vpop.xlane.xlu2 %2054 }
0x2800   :  { %v2056_v26 = vcvt.f32.s32 %v2055_v13 }
0x2802   :  { %v2059_v47 = vadd.s32 %v2058_v16, %v2056_v26 }
0x2804   :  { %v2060_v25 = vrot.slane %v2059_v47, 4 }
0x2806   :  { %vm2061_vm4 = vcmp.lt.s32.totalorder %v2059_v47, %v2060_v25 }
0x2807   :  { %v2134_v2 = vpop.permute.xlu2 %2133  ;;  %v2062_v0 = vsel %vm2061_vm4, %v2059_v47, %v2060_v25 }
0x2808   :  { %2311 = vst.msk [vmem:[%s3734_s7 + $0x10] sm:$0xff] %vm1553_vm5, %v2134_v2  ;;  %v2063_v30 = vrot.slane %v2062_v0, 2 }
0x280a   :  { %vm2064_vm7 = vcmp.lt.s32.totalorder %v2062_v0, %v2063_v30 }
0x280b   :  { %v2065_v59 = vsel %vm2064_vm7, %v2062_v0, %v2063_v30 }
0x280c   :  { %v2066_v53 = vrot.slane %v2065_v59, 1 }
0x280e   :  { %vm2067_vm8 = vcmp.lt.s32.totalorder %v2065_v59, %v2066_v53 }
0x280f   :  { %v2068_v32 = vsel %vm2067_vm8, %v2065_v59, %v2066_v53 }
0x2810   :  { %2393 = vpush %v2068_v32 }
0x2841   :  { %s2394_s25 = spop %2393 }
0x2842   :  { %v2070_v50 = vstv %s2394_s25 }
0x2843   :  { %v2072_v35 = vsel %vm3879_vm13, %v2070_v50, %v2020_v56 }
0x2844   :  { %vm2075_vm2 = vcmp.eq.s32.totalorder %v3451_v8, %v2072_v35  ;;  %vm2076_vm9 = vcmp.eq.s32.totalorder %v3454_v22, %v2072_v35 }
0x2845   :  { %2308 = vmatmul.msk.f32.gmra.mxu3 %vm2075_vm2, %v2428_v5  ;;  %2310 = vmatmul.msk.f32.gmra.mxu1 %vm2076_vm9, %v2428_v5 }
0x28c2   :  { %v2128_v37 = vpop.f32.mrf.mxu1 }
0x28c8   :  { %v2105_v12 = vpop.f32.mrf.mxu3 }
0x28c9   :  { %v2129_v19 = vadd.f32 %v2128_v37, %v2105_v12 }
0x28cb   :  { %2135 = vrot.lane.b32.xlu0 %v2129_v19, %s2429_s17 }
0x293d   :  { %v2136_v8 = vpop.permute.xlu0 %2135 }
0x293e   :  { %2312 = vst.msk [vmem:[%s3734_s7 + $0x18] sm:$0x3] %vm1555_vm0, %v2136_v8 }
0x293f   :  { %2425 = dma.done.wait [#allocation4], 32  }
0x2940   :  { %2426 = vsyncadd [#allocation4], 4294967264 }
0x2941   :  { %2161 = vsyncpa [#allocation4], 1 }

</bundles_post_ra>
